<compile_context>
chip_gen: v7x
topology: tpu7x:2x2x1
jax: 0.10.0
libtpu: 0.0.40
codegen_flags: <defaults>
</compile_context>

<pallas_src>
import functools

import jax
import jax.numpy as jnp
from jax.experimental import pallas as pl
from jax.experimental.pallas import tpu as pltpu

EPS = 1e-5                      # torch.nn.LayerNorm default
COMPUTE_DTYPE = jnp.bfloat16    # MXU operand dtype; accumulation stays f32


# ---------------------------------------------------------------------------
# Config helpers (VMEM limit, single-buffered weights, tile sizing, padding)
# ---------------------------------------------------------------------------
@functools.lru_cache(maxsize=None)
def _vmem_limit_bytes():
    cap = 64 * 1024 * 1024
    try:
        cap = int(pltpu.get_tpu_info().vmem_capacity_bytes)
    except Exception:
        pass
    return int(min(cap * 3 // 4, 100 * 1024 * 1024))


def _probe_buffered_kernel(x_ref, o_ref):
    o_ref[...] = x_ref[...]


@functools.lru_cache(maxsize=None)
def _weight_pipeline_mode():
    """pl.Buffered(1) halves VMEM for grid-invariant weight blocks (nothing to prefetch).
    Probe once; fall back to default double-buffering if unsupported."""
    try:
        spec = pl.BlockSpec((8, 128), lambda i: (0, 0), pipeline_mode=pl.Buffered(1))
        fn = pl.pallas_call(
            _probe_buffered_kernel,
            out_shape=jax.ShapeDtypeStruct((8, 128), jnp.float32),
            grid=(2,),
            in_specs=[spec],
            out_specs=pl.BlockSpec((8, 128), lambda i: (0, 0)),
        )
        jax.block_until_ready(fn(jnp.zeros((8, 128), jnp.float32)))
        return pl.Buffered(1)
    except Exception:
        return None


def _rep_spec(shape, grid_rank):
    """Grid-invariant (weight / bias) block: constant index_map, single-buffered if possible."""
    zeros = (0,) * len(shape)
    index_map = (lambda i: zeros) if grid_rank == 1 else (lambda i, j: zeros)
    pm = _weight_pipeline_mode()
    if pm is None:
        return pl.BlockSpec(shape, index_map)
    return pl.BlockSpec(shape, index_map, pipeline_mode=pm)


def _pick_tb(n, s, budget_rows=1024):
    """Sequences per grid step.  Large tb feeds the MXU / amortizes per-step overhead, but
    keep >= 2 grid steps so both v7x TensorCores get work; prefer exact divisors of n and
    fall back to padding (in the wrapper) for awkward n instead of starving the MXU."""
    if n <= 1:
        return 1
    target = max(1, min(n, budget_rows // max(s, 1)))
    target = min(target, pl.cdiv(n, 2))          # at least two grid steps
    best = 1
    for tb in range(target, 0, -1):
        if n % tb == 0:
            best = tb
            break
    if best * 4 >= target:
        return best
    return target                                 # awkward / prime n -> wrapper pads


def _pick_hidden_tile(h, cap=2048):
    for th in range(min(h, cap), 0, -1):
        if h % th == 0 and th % 128 == 0:
            return th
    return h


def _pad_rows(arr, n_pad):
    n = arr.shape[0]
    if n_pad == n:
        return arr
    return jnp.pad(arr, ((0, n_pad - n),) + ((0, 0),) * (arr.ndim - 1))


# ---------------------------------------------------------------------------
# In-kernel helpers (traced inside Pallas bodies)
# ---------------------------------------------------------------------------
def _layernorm_noaffine(x):
    """x: f32.  gamma/beta are folded into the downstream weights on the host."""
    mean = jnp.mean(x, axis=-1, keepdims=True)
    xc = x - mean
    var = jnp.mean(xc * xc, axis=-1, keepdims=True)
    return xc * jax.lax.rsqrt(var + EPS)


def _softmax_last(scores):
    m = jnp.max(scores, axis=-1, keepdims=True)
    e = jnp.exp(scores - m)
    # exact (non-approx) reciprocal for the denominator (numerics note from review)
    return e * pl.reciprocal(jnp.sum(e, axis=-1, keepdims=True))


def _quick_gelu(h):
    # h * sigmoid(1.702 h) == h / (1 + exp(-1.702 h)); reciprocal goes to the EUP.
    return h * pl.reciprocal(1.0 + jnp.exp(-1.702 * h), approx=True)


def _attention_core(xn, wqkv_ref, bqkv_ref, wout_ref, bout_ref, nheads, tb, s, d):
    """xn: (tb*s, d) bf16, already LayerNorm-normalised (LN affine folded into wqkv/bqkv,
    q pre-scaled by head_dim**-0.5).  wout_ref: (nheads, hd, d).  Returns (tb*s, d) f32.

    Heads: static loop of 3-D (single batch dim) einsums + accumulated per-head output
    projection — no lane-axis concat, no list of per-head temporaries, no 4-D dot_general."""
    cd = COMPUTE_DTYPE
    hd = d // nheads
    m = tb * s

    qkv = jnp.dot(xn, wqkv_ref[...], preferred_element_type=jnp.float32) + bqkv_ref[...]
    qkv = qkv.astype(cd)                                               # (m, 3d)

    out = jnp.zeros((m, d), jnp.float32) + bout_ref[...]
    for h in range(nheads):
        q = qkv[:, h * hd:(h + 1) * hd].reshape(tb, s, hd)             # pre-scaled
        k = qkv[:, d + h * hd:d + (h + 1) * hd].reshape(tb, s, hd)
        v = qkv[:, 2 * d + h * hd:2 * d + (h + 1) * hd].reshape(tb, s, hd)
        scores = jnp.einsum('bqc,bkc->bqk', q, k, preferred_element_type=jnp.float32)
        p = _softmax_last(scores).astype(cd)
        ctx = jnp.einsum('bqk,bkc->bqc', p, v, preferred_element_type=jnp.float32)
        out = out + jnp.dot(ctx.reshape(m, hd).astype(cd), wout_ref[h],
                            preferred_element_type=jnp.float32)
    return out


# ---------------------------------------------------------------------------
# Kernel 1: temporal branch — LN_time + MHA + temporal_fc + residual add
# ---------------------------------------------------------------------------
def temporal_attn_kernel(x_ref, wqkv_ref, bqkv_ref, wout_ref, bout_ref,
                         wtfc_ref, btfc_ref, o_ref, *, nheads):
    tb, s, d = x_ref.shape
    x = x_ref[...].astype(jnp.float32).reshape(tb * s, d)
    xn = _layernorm_noaffine(x).astype(COMPUTE_DTYPE)
    attn = _attention_core(xn, wqkv_ref, bqkv_ref, wout_ref, bout_ref, nheads, tb, s, d)
    y = jnp.dot(attn.astype(COMPUTE_DTYPE), wtfc_ref[...],
                preferred_element_type=jnp.float32) + btfc_ref[...]
    o_ref[...] = (x + y).reshape(tb, s, d).astype(o_ref.dtype)


# ---------------------------------------------------------------------------
# Kernel 2: spatial branch — concat CLS in VMEM + LN_1 + MHA (incl. out projection)
# ---------------------------------------------------------------------------
def spatial_attn_kernel(cls_ref, xs_ref, wqkv_ref, bqkv_ref, wout_ref, bout_ref,
                        o_ref, *, nheads):
    tb, hw, d = xs_ref.shape
    s = hw + 1
    x = jnp.concatenate([cls_ref[...], xs_ref[...]], axis=1)           # VMEM concat
    x = x.astype(jnp.float32).reshape(tb * s, d)
    xn = _layernorm_noaffine(x).astype(COMPUTE_DTYPE)
    attn = _attention_core(xn, wqkv_ref, bqkv_ref, wout_ref, bout_ref, nheads, tb, s, d)
    o_ref[...] = attn.reshape(tb, s, d).astype(o_ref.dtype)


# ---------------------------------------------------------------------------
# Kernel 3: fused  x = [cls_a+cls_b ; a+b] ; out = x + c_proj(QuickGELU(c_fc(LN2(x))))
#           hidden dim tiled on the second ("arbitrary") grid axis
# ---------------------------------------------------------------------------
def add_ln_mlp_kernel(a_cls_ref, b_cls_ref, a_ref, b_ref, wfc_ref, bfc_ref,
                      wproj_ref, bproj_ref, o_ref, xn_scr, acc_scr):
    hi = pl.program_id(1)
    tb, s, d = o_ref.shape
    m = tb * s

    @pl.when(hi == 0)
    def _():
        x_cls = a_cls_ref[...].astype(jnp.float32) + b_cls_ref[...].astype(jnp.float32)
        x_tok = a_ref[...].astype(jnp.float32) + b_ref[...].astype(jnp.float32)
        x = jnp.concatenate([x_cls, x_tok], axis=1).reshape(m, d)
        xn_scr[...] = _layernorm_noaffine(x).astype(COMPUTE_DTYPE)
        acc_scr[...] = x + bproj_ref[...]           # residual + c_proj bias (added once)

    h = jnp.dot(xn_scr[...], wfc_ref[...], preferred_element_type=jnp.float32) + bfc_ref[...]
    h = _quick_gelu(h)
    acc_scr[...] += jnp.dot(h.astype(COMPUTE_DTYPE), wproj_ref[...],
                            preferred_element_type=jnp.float32)

    @pl.when(hi == pl.num_programs(1) - 1)
    def _():
        o_ref[...] = acc_scr[...].reshape(tb, s, d).astype(o_ref.dtype)


# ---------------------------------------------------------------------------
# Wrappers
# ---------------------------------------------------------------------------
def temporal_attention(x, wqkv, bqkv, wout, bout, wtfc, btfc, nheads):
    N, S, D = x.shape
    tb = _pick_tb(N, S)
    n_pad = pl.cdiv(N, tb) * tb
    x = _pad_rows(x, n_pad)
    tokens = n_pad * S
    cost = pl.CostEstimate(
        flops=int(tokens * 10 * D * D + n_pad * 4 * S * S * D),
        transcendentals=int(n_pad * nheads * S * S),
        bytes_accessed=int(2 * tokens * D * 2 + 10 * D * D),
    )
    out = pl.pallas_call(
        functools.partial(temporal_attn_kernel, nheads=nheads),
        out_shape=jax.ShapeDtypeStruct((n_pad, S, D), COMPUTE_DTYPE),
        grid=(n_pad // tb,),
        in_specs=[
            pl.BlockSpec((tb, S, D), lambda i: (i, 0, 0)),
            _rep_spec(wqkv.shape, 1), _rep_spec(bqkv.shape, 1),
            _rep_spec(wout.shape, 1), _rep_spec(bout.shape, 1),
            _rep_spec(wtfc.shape, 1), _rep_spec(btfc.shape, 1),
        ],
        out_specs=pl.BlockSpec((tb, S, D), lambda i: (i, 0, 0)),
        compiler_params=pltpu.CompilerParams(
            dimension_semantics=("parallel",),
            vmem_limit_bytes=_vmem_limit_bytes()),
        cost_estimate=cost,
    )(x, wqkv, bqkv, wout, bout, wtfc, btfc)
    return out[:N] if n_pad != N else out


def spatial_attention(cls_rows, xs, wqkv, bqkv, wout, bout, nheads):
    N, HW, D = xs.shape
    S = HW + 1
    tb = _pick_tb(N, S)
    n_pad = pl.cdiv(N, tb) * tb
    cls_rows = _pad_rows(cls_rows, n_pad)
    xs = _pad_rows(xs, n_pad)
    tokens = n_pad * S
    cost = pl.CostEstimate(
        flops=int(tokens * 8 * D * D + n_pad * 4 * S * S * D),
        transcendentals=int(n_pad * nheads * S * S),
        bytes_accessed=int(2 * tokens * D * 2 + 8 * D * D),
    )
    out = pl.pallas_call(
        functools.partial(spatial_attn_kernel, nheads=nheads),
        out_shape=jax.ShapeDtypeStruct((n_pad, S, D), COMPUTE_DTYPE),
        grid=(n_pad // tb,),
        in_specs=[
            pl.BlockSpec((tb, 1, D), lambda i: (i, 0, 0)),
            pl.BlockSpec((tb, HW, D), lambda i: (i, 0, 0)),
            _rep_spec(wqkv.shape, 1), _rep_spec(bqkv.shape, 1),
            _rep_spec(wout.shape, 1), _rep_spec(bout.shape, 1),
        ],
        out_specs=pl.BlockSpec((tb, S, D), lambda i: (i, 0, 0)),
        compiler_params=pltpu.CompilerParams(
            dimension_semantics=("parallel",),
            vmem_limit_bytes=_vmem_limit_bytes()),
        cost_estimate=cost,
    )(cls_rows, xs, wqkv, bqkv, wout, bout)
    return out[:N] if n_pad != N else out


def fused_mlp_block(a_cls, b_cls, a_tok, b_tok, wfc, bfc, wproj, bproj, out_dtype):
    B, T, D = a_tok.shape
    H = wfc.shape[1]
    S = T + 1
    tb = _pick_tb(B, S)
    b_pad = pl.cdiv(B, tb) * tb
    a_cls = _pad_rows(a_cls, b_pad)
    b_cls = _pad_rows(b_cls, b_pad)
    a_tok = _pad_rows(a_tok, b_pad)
    b_tok = _pad_rows(b_tok, b_pad)
    th = _pick_hidden_tile(H)
    m = tb * S
    tokens = b_pad * S
    cost = pl.CostEstimate(
        flops=int(4 * tokens * D * H),
        transcendentals=int(tokens * H),
        bytes_accessed=int(5 * tokens * D * 2 + 4 * D * H),
    )
    out = pl.pallas_call(
        add_ln_mlp_kernel,
        out_shape=jax.ShapeDtypeStruct((b_pad, S, D), out_dtype),
        grid=(b_pad // tb, H // th),
        in_specs=[
            pl.BlockSpec((tb, 1, D), lambda i, h: (i, 0, 0)),
            pl.BlockSpec((tb, 1, D), lambda i, h: (i, 0, 0)),
            pl.BlockSpec((tb, T, D), lambda i, h: (i, 0, 0)),
            pl.BlockSpec((tb, T, D), lambda i, h: (i, 0, 0)),
            pl.BlockSpec((D, th), lambda i, h: (0, h)),
            pl.BlockSpec((1, th), lambda i, h: (0, h)),
            pl.BlockSpec((th, D), lambda i, h: (h, 0)),
            _rep_spec(bproj.shape, 2),
        ],
        out_specs=pl.BlockSpec((tb, S, D), lambda i, h: (i, 0, 0)),
        scratch_shapes=[pltpu.VMEM((m, D), COMPUTE_DTYPE),
                        pltpu.VMEM((m, D), jnp.float32)],
        compiler_params=pltpu.CompilerParams(
            dimension_semantics=("parallel", "arbitrary"),
            vmem_limit_bytes=_vmem_limit_bytes()),
        cost_estimate=cost,
    )(a_cls, b_cls, a_tok, b_tok, wfc, bfc, wproj, bproj)
    return out[:B] if b_pad != B else out


# ---------------------------------------------------------------------------
# Parameters (PyTorch layout) + host-side prep (transpose, fold LN/scale, bf16)
# ---------------------------------------------------------------------------
def trunc_normal(key, shape, std=0.02):
    return jax.random.truncated_normal(key, -2.0, 2.0, shape, jnp.float32) * std


def init_torch_params(key, d_model):
    ks = jax.random.split(key, 8)
    p = {}
    p["attn_in_w"] = trunc_normal(ks[0], (3 * d_model, d_model))
    p["attn_in_b"] = jnp.zeros((3 * d_model,), jnp.float32)
    p["attn_out_w"] = trunc_normal(ks[1], (d_model, d_model))
    p["attn_out_b"] = jnp.zeros((d_model,), jnp.float32)
    p["tattn_in_w"] = trunc_normal(ks[2], (3 * d_model, d_model))
    p["tattn_in_b"] = jnp.zeros((3 * d_model,), jnp.float32)
    p["tattn_out_w"] = trunc_normal(ks[3], (d_model, d_model))
    p["tattn_out_b"] = jnp.zeros((d_model,), jnp.float32)
    for name in ("ln1", "ln2", "lnt"):
        p[f"{name}_g"] = jnp.ones((d_model,), jnp.float32)
        p[f"{name}_b"] = jnp.zeros((d_model,), jnp.float32)
    p["fc_w"] = trunc_normal(ks[4], (4 * d_model, d_model))
    p["fc_b"] = jnp.zeros((4 * d_model,), jnp.float32)
    p["proj_w"] = trunc_normal(ks[5], (d_model, 4 * d_model))
    p["proj_b"] = jnp.zeros((d_model,), jnp.float32)
    p["tfc_w"] = trunc_normal(ks[6], (d_model, d_model))
    p["tfc_b"] = jnp.zeros((d_model,), jnp.float32)
    return p


def prepare_kernel_params(p, n_head):
    """One-time host prep: weights -> (in, out) bf16, LN affine + q-scaling folded into
    the in-projections, out-projection split per head, biases / etc -> (1, K) f32."""
    d = p["ln1_g"].shape[0]
    hd = d // n_head
    cd = COMPUTE_DTYPE

    def fold_ln(gamma, beta, w_pt, b_pt):
        # y = (norm(x)*gamma + beta) @ W^T + b = norm(x) @ (gamma[:,None]*W^T) + (beta@W^T + b)
        wt = jnp.asarray(w_pt, jnp.float32).T
        return gamma[:, None] * wt, beta @ wt + jnp.asarray(b_pt, jnp.float32)

    qscale = jnp.concatenate([jnp.full((d,), float(hd) ** (-0.5), jnp.float32),
                              jnp.ones((2 * d,), jnp.float32)])

    kp = {}
    # spatial attention (ln_1 folded, q pre-scaled)
    w, b = fold_ln(p["ln1_g"], p["ln1_b"], p["attn_in_w"], p["attn_in_b"])
    kp["attn_in_w"] = (w * qscale[None, :]).astype(cd)
    kp["attn_in_b"] = (b * qscale).reshape(1, -1)
    kp["attn_out_w"] = jnp.asarray(p["attn_out_w"], jnp.float32).T.reshape(n_head, hd, d).astype(cd)
    kp["attn_out_b"] = jnp.asarray(p["attn_out_b"], jnp.float32).reshape(1, -1)
    # temporal attention (ln_time folded, q pre-scaled)
    w, b = fold_ln(p["lnt_g"], p["lnt_b"], p["tattn_in_w"], p["tattn_in_b"])
    kp["tattn_in_w"] = (w * qscale[None, :]).astype(cd)
    kp["tattn_in_b"] = (b * qscale).reshape(1, -1)
    kp["tattn_out_w"] = jnp.asarray(p["tattn_out_w"], jnp.float32).T.reshape(n_head, hd, d).astype(cd)
    kp["tattn_out_b"] = jnp.asarray(p["tattn_out_b"], jnp.float32).reshape(1, -1)
    kp["tfc_w"] = jnp.asarray(p["tfc_w"], jnp.float32).T.astype(cd)
    kp["tfc_b"] = jnp.asarray(p["tfc_b"], jnp.float32).reshape(1, -1)
    # MLP (ln_2 folded into c_fc)
    w, b = fold_ln(p["ln2_g"], p["ln2_b"], p["fc_w"], p["fc_b"])
    kp["fc_w"] = w.astype(cd)
    kp["fc_b"] = b.reshape(1, -1)
    kp["proj_w"] = jnp.asarray(p["proj_w"], jnp.float32).T.astype(cd)
    kp["proj_b"] = jnp.asarray(p["proj_b"], jnp.float32).reshape(1, -1)
    return kp


# ---------------------------------------------------------------------------
# ResidualAttentionBlock.forward
# ---------------------------------------------------------------------------
def residual_attention_block_forward(kp, x, B, F, gridW, n_head):
    D = x.shape[-1]
    num_spatial_tokens = (x.shape[1] - 1) // F
    gridH = num_spatial_tokens // gridW
    HW = gridH * gridW
    cd = COMPUTE_DTYPE

    init_cls = x[:, 0:1, :]                                            # (B, 1, D) f32
    x_tokens = x[:, 1:, :].astype(cd)                                  # (B, HW*F, D) bf16

    # ---- temporal branch: 'b (h w t) m -> (b h w) t m' is a pure reshape; LN_time +
    #      MHA + temporal_fc + residual add are fused into one kernel.
    xt = temporal_attention(x_tokens.reshape(B * HW, F, D),
                            kp["tattn_in_w"], kp["tattn_in_b"],
                            kp["tattn_out_w"], kp["tattn_out_b"],
                            kp["tfc_w"], kp["tfc_b"], n_head)          # (B*HW, F, D) bf16

    # ---- spatial branch: '(b h w) t m -> (b t) (h w) m'
    # TODO(synk): fold this layout change (and its inverse below) into a BlockSpec
    # index_map gather to remove the two remaining full-tensor HBM layout passes.
    xs = xt.reshape(B, HW, F, D).transpose(0, 2, 1, 3).reshape(B * F, HW, D)
    cls_rows = jnp.broadcast_to(init_cls.astype(cd), (B, F, D)).reshape(B * F, 1, D)
    sp = spatial_attention(cls_rows, xs,
                           kp["attn_in_w"], kp["attn_in_b"],
                           kp["attn_out_w"], kp["attn_out_b"], n_head)  # (B*F, 1+HW, D) bf16

    cls_out = jnp.mean(sp[:, 0, :].astype(jnp.float32).reshape(B, F, D),
                       axis=1, keepdims=True)                           # (B, 1, D) f32
    res_spatial = (sp[:, 1:, :].reshape(B, F, HW, D)
                   .transpose(0, 2, 1, 3).reshape(B, HW * F, D))        # temporal order

    # ---- MLP branch: the residual combine, ln_2, c_fc, QuickGELU, c_proj and the final
    #      residual are one kernel; the CLS row is concatenated in VMEM (no host concats).
    return fused_mlp_block(init_cls.astype(cd), cls_out.astype(cd),
                           xt.reshape(B, HW * F, D), res_spatial,
                           kp["fc_w"], kp["fc_b"], kp["proj_w"], kp["proj_b"],
                           x.dtype)


# ---------------------------------------------------------------------------
if __name__ == "__main__":
    d_model, n_head = 32, 4
    B, F, gridH, gridW = 2, 2, 2, 2
    seq = 1 + gridH * gridW * F                                         # 9 tokens

    # Probe optional features eagerly (outside jit) so specs are fixed before tracing.
    _weight_pipeline_mode()
    _vmem_limit_bytes()

    key = jax.random.PRNGKey(0)
    k_x, k_p = jax.random.split(key)
    x = jax.random.normal(k_x, (B, seq, d_model), jnp.float32)

    torch_params = init_torch_params(k_p, d_model)
    kparams = prepare_kernel_params(torch_params, n_head)

    fwd = jax.jit(residual_attention_block_forward, static_argnums=(2, 3, 4, 5))
    out = jax.block_until_ready(fwd(kparams, x, B, F, gridW, n_head))

    assert out.shape == (B, seq, d_model), out.shape
    assert bool(jnp.all(jnp.isfinite(out)))
    print("KERNEL_OK")
</pallas_src>

<mosaic_0001>
module attributes {stable_mosaic.version = 11 : i64} {
  func.func @_probe_buffered_kernel(%arg0: i32, %arg1: memref<8x128xf32, #tpu.memory_space<vmem>>, %arg2: memref<8x128xf32, #tpu.memory_space<vmem>>) attributes {dimension_semantics = [#tpu.dimension_semantics<arbitrary>], iteration_bounds = array<i64: 2>, scalar_prefetch = 0 : i64, scratch_operands = 0 : i64, tpu.core_type = #tpu.core_type<tc>, window_params = [{pipeline_mode = #tpu.pipeline_mode<synchronous>, transform_indices = @transform_0, window_bounds = array<i64: 8, 128>}, {pipeline_mode = #tpu.pipeline_mode<synchronous>, transform_indices = @transform_1, window_bounds = array<i64: 8, 128>}]} {
    %c0 = arith.constant 0 : index
    %c0_0 = arith.constant 0 : index
    %0 = vector.load %arg1[%c0, %c0_0] : memref<8x128xf32, #tpu.memory_space<vmem>>, vector<8x128xf32>
    %c0_1 = arith.constant 0 : index
    %c0_2 = arith.constant 0 : index
    %1 = vector.load %arg2[%c0_1, %c0_2] : memref<8x128xf32, #tpu.memory_space<vmem>>, vector<8x128xf32>
    tpu.vector_store %arg2[%c0_1, %c0_2], %0 {strides = array<i32>} : memref<8x128xf32, #tpu.memory_space<vmem>>, vector<8x128xf32>,
    return
  }
  func.func @transform_0(%arg0: i32) -> (i32, i32) {
    %c0_i32 = arith.constant 0 : i32
    %c0_i32_0 = arith.constant 0 : i32
    %c0_i32_1 = arith.constant 0 : i32
    return %c0_i32, %c0_i32_0 : i32, i32
  }
  func.func @transform_1(%arg0: i32) -> (i32, i32) {
    %c0_i32 = arith.constant 0 : i32
    %c0_i32_0 = arith.constant 0 : i32
    %c0_i32_1 = arith.constant 0 : i32
    return %c0_i32, %c0_i32_0 : i32, i32
  }
}

module attributes {stable_mosaic.version = 11 : i64} {
  func.func @spatial_attn_kernel(%arg0: i32, %arg1: memref<2x1x32xbf16, #tpu.memory_space<vmem>>, %arg2: memref<2x4x32xbf16, #tpu.memory_space<vmem>>, %arg3: memref<32x96xbf16, #tpu.memory_space<vmem>>, %arg4: memref<1x96xf32, #tpu.memory_space<vmem>>, %arg5: memref<4x8x32xbf16, #tpu.memory_space<vmem>>, %arg6: memref<1x32xf32, #tpu.memory_space<vmem>>, %arg7: memref<2x5x32xbf16, #tpu.memory_space<vmem>>) attributes {dimension_semantics = [#tpu.dimension_semantics<parallel>], iteration_bounds = array<i64: 2>, scalar_prefetch = 0 : i64, scratch_operands = 0 : i64, tpu.core_type = #tpu.core_type<tc>, window_params = [{transform_indices = @transform_0, window_bounds = array<i64: 2, 1, 32>}, {transform_indices = @transform_1, window_bounds = array<i64: 2, 4, 32>}, {pipeline_mode = #tpu.pipeline_mode<synchronous>, transform_indices = @transform_2, window_bounds = array<i64: 32, 96>}, {pipeline_mode = #tpu.pipeline_mode<synchronous>, transform_indices = @transform_3, window_bounds = array<i64: 1, 96>}, {pipeline_mode = #tpu.pipeline_mode<synchronous>, transform_indices = @transform_4, window_bounds = array<i64: 4, 8, 32>}, {pipeline_mode = #tpu.pipeline_mode<synchronous>, transform_indices = @transform_5, window_bounds = array<i64: 1, 32>}, {transform_indices = @transform_6, window_bounds = array<i64: 2, 5, 32>}]} {
    %c0 = arith.constant 0 : index
    %c0_0 = arith.constant 0 : index
    %c0_1 = arith.constant 0 : index
    %0 = vector.load %arg1[%c0, %c0_0, %c0_1] : memref<2x1x32xbf16, #tpu.memory_space<vmem>>, vector<2x1x32xbf16>
    %c0_2 = arith.constant 0 : index
    %c0_3 = arith.constant 0 : index
    %c0_4 = arith.constant 0 : index
    %1 = vector.load %arg2[%c0_2, %c0_3, %c0_4] : memref<2x4x32xbf16, #tpu.memory_space<vmem>>, vector<2x4x32xbf16>
    %2 = tpu.concatenate %0, %1 in 1 : vector<2x1x32xbf16>, vector<2x4x32xbf16> -> vector<2x5x32xbf16>
    %3 = arith.extf %2 : vector<2x5x32xbf16> to vector<2x5x32xf32>
    %4 = vector.shape_cast %3 : vector<2x5x32xf32> to vector<10x32xf32>
    %cst = arith.constant dense<0.000000e+00> : vector<10xf32>
    %5 = vector.multi_reduction <add>, %4, %cst [1] : vector<10x32xf32> to vector<10xf32>
    %6 = vector.shape_cast %5 : vector<10xf32> to vector<10x1xf32>
    %cst_5 = arith.constant 3.200000e+01 : f32
    %7 = vector.broadcast %cst_5 : f32 to vector<10x1xf32>
    %8 = arith.divf %6, %7 : vector<10x1xf32>
    %9 = vector.broadcast %8 : vector<10x1xf32> to vector<10x32xf32>
    %10 = arith.subf %4, %9 : vector<10x32xf32>
    %11 = arith.mulf %10, %10 : vector<10x32xf32>
    %cst_6 = arith.constant dense<0.000000e+00> : vector<10xf32>
    %12 = vector.multi_reduction <add>, %11, %cst_6 [1] : vector<10x32xf32> to vector<10xf32>
    %13 = vector.shape_cast %12 : vector<10xf32> to vector<10x1xf32>
    %cst_7 = arith.constant 3.200000e+01 : f32
    %14 = vector.broadcast %cst_7 : f32 to vector<10x1xf32>
    %15 = arith.divf %13, %14 : vector<10x1xf32>
    %cst_8 = arith.constant 9.99999974E-6 : f32
    %16 = vector.broadcast %cst_8 : f32 to vector<10x1xf32>
    %17 = arith.addf %15, %16 : vector<10x1xf32>
    %18 = math.rsqrt %17 : vector<10x1xf32>
    %19 = vector.broadcast %18 : vector<10x1xf32> to vector<10x32xf32>
    %20 = arith.mulf %10, %19 : vector<10x32xf32>
    %21 = arith.truncf %20 : vector<10x32xf32> to vector<10x32xbf16>
    %c0_9 = arith.constant 0 : index
    %c0_10 = arith.constant 0 : index
    %22 = vector.load %arg3[%c0_9, %c0_10] : memref<32x96xbf16, #tpu.memory_space<vmem>>, vector<32x96xbf16>
    %cst_11 = arith.constant dense<0.000000e+00> : vector<10x96xf32>
    %23 = tpu.matmul %21, %22, %cst_11 {dimension_numbers = #tpu.dot_dimension_numbers<[1], [0], [0], [1], [0, 0, 1, 1], [], []>} : vector<10x32xbf16>, vector<32x96xbf16>, vector<10x96xf32> -> vector<10x96xf32>
    %c0_12 = arith.constant 0 : index
    %c0_13 = arith.constant 0 : index
    %24 = vector.load %arg4[%c0_12, %c0_13] : memref<1x96xf32, #tpu.memory_space<vmem>>, vector<1x96xf32>
    %25 = vector.broadcast %24 : vector<1x96xf32> to vector<10x96xf32>
    %26 = arith.addf %23, %25 : vector<10x96xf32>
    %27 = arith.truncf %26 : vector<10x96xf32> to vector<10x96xbf16>
    %cst_14 = arith.constant 0.000000e+00 : f32
    %28 = vector.broadcast %cst_14 : f32 to vector<10x32xf32>
    %c0_15 = arith.constant 0 : index
    %c0_16 = arith.constant 0 : index
    %29 = vector.load %arg6[%c0_15, %c0_16] : memref<1x32xf32, #tpu.memory_space<vmem>>, vector<1x32xf32>
    %30 = vector.broadcast %29 : vector<1x32xf32> to vector<10x32xf32>
    %31 = arith.addf %28, %30 : vector<10x32xf32>
    %32 = vector.extract_strided_slice %27 {offsets = [0, 0], sizes = [10, 8], strides = [1, 1]} : vector<10x96xbf16> to vector<10x8xbf16>
    %33 = vector.shape_cast %32 : vector<10x8xbf16> to vector<2x5x8xbf16>
    %34 = vector.extract_strided_slice %27 {offsets = [0, 32], sizes = [10, 8], strides = [1, 1]} : vector<10x96xbf16> to vector<10x8xbf16>
    %35 = vector.shape_cast %34 : vector<10x8xbf16> to vector<2x5x8xbf16>
    %36 = vector.extract_strided_slice %27 {offsets = [0, 64], sizes = [10, 8], strides = [1, 1]} : vector<10x96xbf16> to vector<10x8xbf16>
    %37 = vector.shape_cast %36 : vector<10x8xbf16> to vector<2x5x8xbf16>
    "tpu.trace_start"() <{level = 10 : i32, message = "bqc,bkc->bqk"}> : () -> ()
    %cst_17 = arith.constant dense<0.000000e+00> : vector<2x5x5xf32>
    %38 = tpu.matmul %33, %35, %cst_17 {dimension_numbers = #tpu.dot_dimension_numbers<[2], [2], [1], [1], [0, 0, 0, 1, 1, 1], [0], [0]>} : vector<2x5x8xbf16>, vector<2x5x8xbf16>, vector<2x5x5xf32> -> vector<2x5x5xf32>
    "tpu.trace_stop"() : () -> ()
    %cst_18 = arith.constant dense<0xFF800000> : vector<2x5xf32>
    %39 = vector.multi_reduction <maximumf>, %38, %cst_18 [2] : vector<2x5x5xf32> to vector<2x5xf32>
    %40 = vector.shape_cast %39 : vector<2x5xf32> to vector<2x5x1xf32>
    %41 = vector.broadcast %40 : vector<2x5x1xf32> to vector<2x5x5xf32>
    %42 = arith.subf %38, %41 : vector<2x5x5xf32>
    %43 = math.exp %42 : vector<2x5x5xf32>
    %cst_19 = arith.constant dense<0.000000e+00> : vector<2x5xf32>
    %44 = vector.multi_reduction <add>, %43, %cst_19 [2] : vector<2x5x5xf32> to vector<2x5xf32>
    %45 = vector.shape_cast %44 : vector<2x5xf32> to vector<2x5x1xf32>
    %46 = tpu.reciprocal %45 : vector<2x5x1xf32> -> vector<2x5x1xf32>
    %47 = vector.broadcast %46 : vector<2x5x1xf32> to vector<2x5x5xf32>
    %48 = arith.mulf %43, %47 : vector<2x5x5xf32>
    %49 = arith.truncf %48 : vector<2x5x5xf32> to vector<2x5x5xbf16>
    "tpu.trace_start"() <{level = 10 : i32, message = "bqk,bkc->bqc"}> : () -> ()
    %cst_20 = arith.constant dense<0.000000e+00> : vector<2x5x8xf32>
    %50 = tpu.matmul %49, %37, %cst_20 {dimension_numbers = #tpu.dot_dimension_numbers<[2], [1], [1], [2], [0, 0, 0, 1, 1, 2], [0], [0]>} : vector<2x5x5xbf16>, vector<2x5x8xbf16>, vector<2x5x8xf32> -> vector<2x5x8xf32>
    "tpu.trace_stop"() : () -> ()
    %51 = vector.shape_cast %50 : vector<2x5x8xf32> to vector<10x8xf32>
    %52 = arith.truncf %51 : vector<10x8xf32> to vector<10x8xbf16>
    %c0_21 = arith.constant 0 : index
    %c0_22 = arith.constant 0 : index
    %c0_23 = arith.constant 0 : index
    %53 = vector.load %arg5[%c0_21, %c0_22, %c0_23] : memref<4x8x32xbf16, #tpu.memory_space<vmem>>, vector<1x8x32xbf16>
    %54 = vector.shape_cast %53 : vector<1x8x32xbf16> to vector<8x32xbf16>
    %cst_24 = arith.constant dense<0.000000e+00> : vector<10x32xf32>
    %55 = tpu.matmul %52, %54, %cst_24 {dimension_numbers = #tpu.dot_dimension_numbers<[1], [0], [0], [1], [0, 0, 1, 1], [], []>} : vector<10x8xbf16>, vector<8x32xbf16>, vector<10x32xf32> -> vector<10x32xf32>
    %56 = arith.addf %31, %55 : vector<10x32xf32>
    %57 = vector.extract_strided_slice %27 {offsets = [0, 8], sizes = [10, 8], strides = [1, 1]} : vector<10x96xbf16> to vector<10x8xbf16>
    %58 = vector.shape_cast %57 : vector<10x8xbf16> to vector<2x5x8xbf16>
    %59 = vector.extract_strided_slice %27 {offsets = [0, 40], sizes = [10, 8], strides = [1, 1]} : vector<10x96xbf16> to vector<10x8xbf16>
    %60 = vector.shape_cast %59 : vector<10x8xbf16> to vector<2x5x8xbf16>
    %61 = vector.extract_strided_slice %27 {offsets = [0, 72], sizes = [10, 8], strides = [1, 1]} : vector<10x96xbf16> to vector<10x8xbf16>
    %62 = vector.shape_cast %61 : vector<10x8xbf16> to vector<2x5x8xbf16>
    "tpu.trace_start"() <{level = 10 : i32, message = "bqc,bkc->bqk"}> : () -> ()
    %cst_25 = arith.constant dense<0.000000e+00> : vector<2x5x5xf32>
    %63 = tpu.matmul %58, %60, %cst_25 {dimension_numbers = #tpu.dot_dimension_numbers<[2], [2], [1], [1], [0, 0, 0, 1, 1, 1], [0], [0]>} : vector<2x5x8xbf16>, vector<2x5x8xbf16>, vector<2x5x5xf32> -> vector<2x5x5xf32>
    "tpu.trace_stop"() : () -> ()
    %cst_26 = arith.constant dense<0xFF800000> : vector<2x5xf32>
    %64 = vector.multi_reduction <maximumf>, %63, %cst_26 [2] : vector<2x5x5xf32> to vector<2x5xf32>
    %65 = vector.shape_cast %64 : vector<2x5xf32> to vector<2x5x1xf32>
    %66 = vector.broadcast %65 : vector<2x5x1xf32> to vector<2x5x5xf32>
    %67 = arith.subf %63, %66 : vector<2x5x5xf32>
    %68 = math.exp %67 : vector<2x5x5xf32>
    %cst_27 = arith.constant dense<0.000000e+00> : vector<2x5xf32>
    %69 = vector.multi_reduction <add>, %68, %cst_27 [2] : vector<2x5x5xf32> to vector<2x5xf32>
    %70 = vector.shape_cast %69 : vector<2x5xf32> to vector<2x5x1xf32>
    %71 = tpu.reciprocal %70 : vector<2x5x1xf32> -> vector<2x5x1xf32>
    %72 = vector.broadcast %71 : vector<2x5x1xf32> to vector<2x5x5xf32>
    %73 = arith.mulf %68, %72 : vector<2x5x5xf32>
    %74 = arith.truncf %73 : vector<2x5x5xf32> to vector<2x5x5xbf16>
    "tpu.trace_start"() <{level = 10 : i32, message = "bqk,bkc->bqc"}> : () -> ()
    %cst_28 = arith.constant dense<0.000000e+00> : vector<2x5x8xf32>
    %75 = tpu.matmul %74, %62, %cst_28 {dimension_numbers = #tpu.dot_dimension_numbers<[2], [1], [1], [2], [0, 0, 0, 1, 1, 2], [0], [0]>} : vector<2x5x5xbf16>, vector<2x5x8xbf16>, vector<2x5x8xf32> -> vector<2x5x8xf32>
    "tpu.trace_stop"() : () -> ()
    %76 = vector.shape_cast %75 : vector<2x5x8xf32> to vector<10x8xf32>
    %77 = arith.truncf %76 : vector<10x8xf32> to vector<10x8xbf16>
    %c1 = arith.constant 1 : index
    %c0_29 = arith.constant 0 : index
    %c0_30 = arith.constant 0 : index
    %78 = vector.load %arg5[%c1, %c0_29, %c0_30] : memref<4x8x32xbf16, #tpu.memory_space<vmem>>, vector<1x8x32xbf16>
    %79 = vector.shape_cast %78 : vector<1x8x32xbf16> to vector<8x32xbf16>
    %cst_31 = arith.constant dense<0.000000e+00> : vector<10x32xf32>
    %80 = tpu.matmul %77, %79, %cst_31 {dimension_numbers = #tpu.dot_dimension_numbers<[1], [0], [0], [1], [0, 0, 1, 1], [], []>} : vector<10x8xbf16>, vector<8x32xbf16>, vector<10x32xf32> -> vector<10x32xf32>
    %81 = arith.addf %56, %80 : vector<10x32xf32>
    %82 = vector.extract_strided_slice %27 {offsets = [0, 16], sizes = [10, 8], strides = [1, 1]} : vector<10x96xbf16> to vector<10x8xbf16>
    %83 = vector.shape_cast %82 : vector<10x8xbf16> to vector<2x5x8xbf16>
    %84 = vector.extract_strided_slice %27 {offsets = [0, 48], sizes = [10, 8], strides = [1, 1]} : vector<10x96xbf16> to vector<10x8xbf16>
    %85 = vector.shape_cast %84 : vector<10x8xbf16> to vector<2x5x8xbf16>
    %86 = vector.extract_strided_slice %27 {offsets = [0, 80], sizes = [10, 8], strides = [1, 1]} : vector<10x96xbf16> to vector<10x8xbf16>
    %87 = vector.shape_cast %86 : vector<10x8xbf16> to vector<2x5x8xbf16>
    "tpu.trace_start"() <{level = 10 : i32, message = "bqc,bkc->bqk"}> : () -> ()
    %cst_32 = arith.constant dense<0.000000e+00> : vector<2x5x5xf32>
    %88 = tpu.matmul %83, %85, %cst_32 {dimension_numbers = #tpu.dot_dimension_numbers<[2], [2], [1], [1], [0, 0, 0, 1, 1, 1], [0], [0]>} : vector<2x5x8xbf16>, vector<2x5x8xbf16>, vector<2x5x5xf32> -> vector<2x5x5xf32>
    "tpu.trace_stop"() : () -> ()
    %cst_33 = arith.constant dense<0xFF800000> : vector<2x5xf32>
    %89 = vector.multi_reduction <maximumf>, %88, %cst_33 [2] : vector<2x5x5xf32> to vector<2x5xf32>
    %90 = vector.shape_cast %89 : vector<2x5xf32> to vector<2x5x1xf32>
    %91 = vector.broadcast %90 : vector<2x5x1xf32> to vector<2x5x5xf32>
    %92 = arith.subf %88, %91 : vector<2x5x5xf32>
    %93 = math.exp %92 : vector<2x5x5xf32>
    %cst_34 = arith.constant dense<0.000000e+00> : vector<2x5xf32>
    %94 = vector.multi_reduction <add>, %93, %cst_34 [2] : vector<2x5x5xf32> to vector<2x5xf32>
    %95 = vector.shape_cast %94 : vector<2x5xf32> to vector<2x5x1xf32>
    %96 = tpu.reciprocal %95 : vector<2x5x1xf32> -> vector<2x5x1xf32>
    %97 = vector.broadcast %96 : vector<2x5x1xf32> to vector<2x5x5xf32>
    %98 = arith.mulf %93, %97 : vector<2x5x5xf32>
    %99 = arith.truncf %98 : vector<2x5x5xf32> to vector<2x5x5xbf16>
    "tpu.trace_start"() <{level = 10 : i32, message = "bqk,bkc->bqc"}> : () -> ()
    %cst_35 = arith.constant dense<0.000000e+00> : vector<2x5x8xf32>
    %100 = tpu.matmul %99, %87, %cst_35 {dimension_numbers = #tpu.dot_dimension_numbers<[2], [1], [1], [2], [0, 0, 0, 1, 1, 2], [0], [0]>} : vector<2x5x5xbf16>, vector<2x5x8xbf16>, vector<2x5x8xf32> -> vector<2x5x8xf32>
    "tpu.trace_stop"() : () -> ()
    %101 = vector.shape_cast %100 : vector<2x5x8xf32> to vector<10x8xf32>
    %102 = arith.truncf %101 : vector<10x8xf32> to vector<10x8xbf16>
    %c2 = arith.constant 2 : index
    %c0_36 = arith.constant 0 : index
    %c0_37 = arith.constant 0 : index
    %103 = vector.load %arg5[%c2, %c0_36, %c0_37] : memref<4x8x32xbf16, #tpu.memory_space<vmem>>, vector<1x8x32xbf16>
    %104 = vector.shape_cast %103 : vector<1x8x32xbf16> to vector<8x32xbf16>
    %cst_38 = arith.constant dense<0.000000e+00> : vector<10x32xf32>
    %105 = tpu.matmul %102, %104, %cst_38 {dimension_numbers = #tpu.dot_dimension_numbers<[1], [0], [0], [1], [0, 0, 1, 1], [], []>} : vector<10x8xbf16>, vector<8x32xbf16>, vector<10x32xf32> -> vector<10x32xf32>
    %106 = arith.addf %81, %105 : vector<10x32xf32>
    %107 = vector.extract_strided_slice %27 {offsets = [0, 24], sizes = [10, 8], strides = [1, 1]} : vector<10x96xbf16> to vector<10x8xbf16>
    %108 = vector.shape_cast %107 : vector<10x8xbf16> to vector<2x5x8xbf16>
    %109 = vector.extract_strided_slice %27 {offsets = [0, 56], sizes = [10, 8], strides = [1, 1]} : vector<10x96xbf16> to vector<10x8xbf16>
    %110 = vector.shape_cast %109 : vector<10x8xbf16> to vector<2x5x8xbf16>
    %111 = vector.extract_strided_slice %27 {offsets = [0, 88], sizes = [10, 8], strides = [1, 1]} : vector<10x96xbf16> to vector<10x8xbf16>
    %112 = vector.shape_cast %111 : vector<10x8xbf16> to vector<2x5x8xbf16>
    "tpu.trace_start"() <{level = 10 : i32, message = "bqc,bkc->bqk"}> : () -> ()
    %cst_39 = arith.constant dense<0.000000e+00> : vector<2x5x5xf32>
    %113 = tpu.matmul %108, %110, %cst_39 {dimension_numbers = #tpu.dot_dimension_numbers<[2], [2], [1], [1], [0, 0, 0, 1, 1, 1], [0], [0]>} : vector<2x5x8xbf16>, vector<2x5x8xbf16>, vector<2x5x5xf32> -> vector<2x5x5xf32>
    "tpu.trace_stop"() : () -> ()
    %cst_40 = arith.constant dense<0xFF800000> : vector<2x5xf32>
    %114 = vector.multi_reduction <maximumf>, %113, %cst_40 [2] : vector<2x5x5xf32> to vector<2x5xf32>
    %115 = vector.shape_cast %114 : vector<2x5xf32> to vector<2x5x1xf32>
    %116 = vector.broadcast %115 : vector<2x5x1xf32> to vector<2x5x5xf32>
    %117 = arith.subf %113, %116 : vector<2x5x5xf32>
    %118 = math.exp %117 : vector<2x5x5xf32>
    %cst_41 = arith.constant dense<0.000000e+00> : vector<2x5xf32>
    %119 = vector.multi_reduction <add>, %118, %cst_41 [2] : vector<2x5x5xf32> to vector<2x5xf32>
    %120 = vector.shape_cast %119 : vector<2x5xf32> to vector<2x5x1xf32>
    %121 = tpu.reciprocal %120 : vector<2x5x1xf32> -> vector<2x5x1xf32>
    %122 = vector.broadcast %121 : vector<2x5x1xf32> to vector<2x5x5xf32>
    %123 = arith.mulf %118, %122 : vector<2x5x5xf32>
    %124 = arith.truncf %123 : vector<2x5x5xf32> to vector<2x5x5xbf16>
    "tpu.trace_start"() <{level = 10 : i32, message = "bqk,bkc->bqc"}> : () -> ()
    %cst_42 = arith.constant dense<0.000000e+00> : vector<2x5x8xf32>
    %125 = tpu.matmul %124, %112, %cst_42 {dimension_numbers = #tpu.dot_dimension_numbers<[2], [1], [1], [2], [0, 0, 0, 1, 1, 2], [0], [0]>} : vector<2x5x5xbf16>, vector<2x5x8xbf16>, vector<2x5x8xf32> -> vector<2x5x8xf32>
    "tpu.trace_stop"() : () -> ()
    %126 = vector.shape_cast %125 : vector<2x5x8xf32> to vector<10x8xf32>
    %127 = arith.truncf %126 : vector<10x8xf32> to vector<10x8xbf16>
    %c3 = arith.constant 3 : index
    %c0_43 = arith.constant 0 : index
    %c0_44 = arith.constant 0 : index
    %128 = vector.load %arg5[%c3, %c0_43, %c0_44] : memref<4x8x32xbf16, #tpu.memory_space<vmem>>, vector<1x8x32xbf16>
    %129 = vector.shape_cast %128 : vector<1x8x32xbf16> to vector<8x32xbf16>
    %cst_45 = arith.constant dense<0.000000e+00> : vector<10x32xf32>
    %130 = tpu.matmul %127, %129, %cst_45 {dimension_numbers = #tpu.dot_dimension_numbers<[1], [0], [0], [1], [0, 0, 1, 1], [], []>} : vector<10x8xbf16>, vector<8x32xbf16>, vector<10x32xf32> -> vector<10x32xf32>
    %131 = arith.addf %106, %130 : vector<10x32xf32>
    %132 = vector.shape_cast %131 : vector<10x32xf32> to vector<2x5x32xf32>
    %133 = arith.truncf %132 : vector<2x5x32xf32> to vector<2x5x32xbf16>
    %c0_46 = arith.constant 0 : index
    %c0_47 = arith.constant 0 : index
    %c0_48 = arith.constant 0 : index
    %134 = vector.load %arg7[%c0_46, %c0_47, %c0_48] : memref<2x5x32xbf16, #tpu.memory_space<vmem>>, vector<2x5x32xbf16>
    tpu.vector_store %arg7[%c0_46, %c0_47, %c0_48], %133 {strides = array<i32>} : memref<2x5x32xbf16, #tpu.memory_space<vmem>>, vector<2x5x32xbf16>,
    return
  }
  func.func @transform_0(%arg0: i32) -> (i32, i32, i32) {
    %c0_i32 = arith.constant 0 : i32
    %c0_i32_0 = arith.constant 0 : i32
    %c0_i32_1 = arith.constant 0 : i32
    return %arg0, %c0_i32, %c0_i32_0 : i32, i32, i32
  }
  func.func @transform_1(%arg0: i32) -> (i32, i32, i32) {
    %c0_i32 = arith.constant 0 : i32
    %c0_i32_0 = arith.constant 0 : i32
    %c0_i32_1 = arith.constant 0 : i32
    return %arg0, %c0_i32, %c0_i32_0 : i32, i32, i32
  }
  func.func @transform_2(%arg0: i32) -> (i32, i32) {
    %c0_i32 = arith.constant 0 : i32
    %c0_i32_0 = arith.constant 0 : i32
    %c0_i32_1 = arith.constant 0 : i32
    return %c0_i32, %c0_i32_0 : i32, i32
  }
  func.func @transform_3(%arg0: i32) -> (i32, i32) {
    %c0_i32 = arith.constant 0 : i32
    %c0_i32_0 = arith.constant 0 : i32
    %c0_i32_1 = arith.constant 0 : i32
    return %c0_i32, %c0_i32_0 : i32, i32
  }
  func.func @transform_4(%arg0: i32) -> (i32, i32, i32) {
    %c0_i32 = arith.constant 0 : i32
    %c0_i32_0 = arith.constant 0 : i32
    %c0_i32_1 = arith.constant 0 : i32
    %c0_i32_2 = arith.constant 0 : i32
    return %c0_i32, %c0_i32_0, %c0_i32_1 : i32, i32, i32
  }
  func.func @transform_5(%arg0: i32) -> (i32, i32) {
    %c0_i32 = arith.constant 0 : i32
    %c0_i32_0 = arith.constant 0 : i32
    %c0_i32_1 = arith.constant 0 : i32
    return %c0_i32, %c0_i32_0 : i32, i32
  }
  func.func @transform_6(%arg0: i32) -> (i32, i32, i32) {
    %c0_i32 = arith.constant 0 : i32
    %c0_i32_0 = arith.constant 0 : i32
    %c0_i32_1 = arith.constant 0 : i32
    return %arg0, %c0_i32, %c0_i32_0 : i32, i32, i32
  }
}

module attributes {stable_mosaic.version = 11 : i64} {
  func.func @temporal_attn_kernel(%arg0: i32, %arg1: memref<4x2x32xbf16, #tpu.memory_space<vmem>>, %arg2: memref<32x96xbf16, #tpu.memory_space<vmem>>, %arg3: memref<1x96xf32, #tpu.memory_space<vmem>>, %arg4: memref<4x8x32xbf16, #tpu.memory_space<vmem>>, %arg5: memref<1x32xf32, #tpu.memory_space<vmem>>, %arg6: memref<32x32xbf16, #tpu.memory_space<vmem>>, %arg7: memref<1x32xf32, #tpu.memory_space<vmem>>, %arg8: memref<4x2x32xbf16, #tpu.memory_space<vmem>>) attributes {dimension_semantics = [#tpu.dimension_semantics<parallel>], iteration_bounds = array<i64: 2>, scalar_prefetch = 0 : i64, scratch_operands = 0 : i64, tpu.core_type = #tpu.core_type<tc>, window_params = [{transform_indices = @transform_0, window_bounds = array<i64: 4, 2, 32>}, {pipeline_mode = #tpu.pipeline_mode<synchronous>, transform_indices = @transform_1, window_bounds = array<i64: 32, 96>}, {pipeline_mode = #tpu.pipeline_mode<synchronous>, transform_indices = @transform_2, window_bounds = array<i64: 1, 96>}, {pipeline_mode = #tpu.pipeline_mode<synchronous>, transform_indices = @transform_3, window_bounds = array<i64: 4, 8, 32>}, {pipeline_mode = #tpu.pipeline_mode<synchronous>, transform_indices = @transform_4, window_bounds = array<i64: 1, 32>}, {pipeline_mode = #tpu.pipeline_mode<synchronous>, transform_indices = @transform_5, window_bounds = array<i64: 32, 32>}, {pipeline_mode = #tpu.pipeline_mode<synchronous>, transform_indices = @transform_6, window_bounds = array<i64: 1, 32>}, {transform_indices = @transform_7, window_bounds = array<i64: 4, 2, 32>}]} {
    %c0 = arith.constant 0 : index
    %c0_0 = arith.constant 0 : index
    %c0_1 = arith.constant 0 : index
    %0 = vector.load %arg1[%c0, %c0_0, %c0_1] : memref<4x2x32xbf16, #tpu.memory_space<vmem>>, vector<4x2x32xbf16>
    %1 = arith.extf %0 : vector<4x2x32xbf16> to vector<4x2x32xf32>
    %2 = vector.shape_cast %1 : vector<4x2x32xf32> to vector<8x32xf32>
    %cst = arith.constant dense<0.000000e+00> : vector<8xf32>
    %3 = vector.multi_reduction <add>, %2, %cst [1] : vector<8x32xf32> to vector<8xf32>
    %4 = vector.shape_cast %3 : vector<8xf32> to vector<8x1xf32>
    %cst_2 = arith.constant 3.200000e+01 : f32
    %5 = vector.broadcast %cst_2 : f32 to vector<8x1xf32>
    %6 = arith.divf %4, %5 : vector<8x1xf32>
    %7 = vector.broadcast %6 : vector<8x1xf32> to vector<8x32xf32>
    %8 = arith.subf %2, %7 : vector<8x32xf32>
    %9 = arith.mulf %8, %8 : vector<8x32xf32>
    %cst_3 = arith.constant dense<0.000000e+00> : vector<8xf32>
    %10 = vector.multi_reduction <add>, %9, %cst_3 [1] : vector<8x32xf32> to vector<8xf32>
    %11 = vector.shape_cast %10 : vector<8xf32> to vector<8x1xf32>
    %cst_4 = arith.constant 3.200000e+01 : f32
    %12 = vector.broadcast %cst_4 : f32 to vector<8x1xf32>
    %13 = arith.divf %11, %12 : vector<8x1xf32>
    %cst_5 = arith.constant 9.99999974E-6 : f32
    %14 = vector.broadcast %cst_5 : f32 to vector<8x1xf32>
    %15 = arith.addf %13, %14 : vector<8x1xf32>
    %16 = math.rsqrt %15 : vector<8x1xf32>
    %17 = vector.broadcast %16 : vector<8x1xf32> to vector<8x32xf32>
    %18 = arith.mulf %8, %17 : vector<8x32xf32>
    %19 = arith.truncf %18 : vector<8x32xf32> to vector<8x32xbf16>
    %c0_6 = arith.constant 0 : index
    %c0_7 = arith.constant 0 : index
    %20 = vector.load %arg2[%c0_6, %c0_7] : memref<32x96xbf16, #tpu.memory_space<vmem>>, vector<32x96xbf16>
    %cst_8 = arith.constant dense<0.000000e+00> : vector<8x96xf32>
    %21 = tpu.matmul %19, %20, %cst_8 {dimension_numbers = #tpu.dot_dimension_numbers<[1], [0], [0], [1], [0, 0, 1, 1], [], []>} : vector<8x32xbf16>, vector<32x96xbf16>, vector<8x96xf32> -> vector<8x96xf32>
    %c0_9 = arith.constant 0 : index
    %c0_10 = arith.constant 0 : index
    %22 = vector.load %arg3[%c0_9, %c0_10] : memref<1x96xf32, #tpu.memory_space<vmem>>, vector<1x96xf32>
    %23 = vector.broadcast %22 : vector<1x96xf32> to vector<8x96xf32>
    %24 = arith.addf %21, %23 : vector<8x96xf32>
    %25 = arith.truncf %24 : vector<8x96xf32> to vector<8x96xbf16>
    %cst_11 = arith.constant 0.000000e+00 : f32
    %26 = vector.broadcast %cst_11 : f32 to vector<8x32xf32>
    %c0_12 = arith.constant 0 : index
    %c0_13 = arith.constant 0 : index
    %27 = vector.load %arg5[%c0_12, %c0_13] : memref<1x32xf32, #tpu.memory_space<vmem>>, vector<1x32xf32>
    %28 = vector.broadcast %27 : vector<1x32xf32> to vector<8x32xf32>
    %29 = arith.addf %26, %28 : vector<8x32xf32>
    %30 = vector.extract_strided_slice %25 {offsets = [0, 0], sizes = [8, 8], strides = [1, 1]} : vector<8x96xbf16> to vector<8x8xbf16>
    %31 = vector.shape_cast %30 : vector<8x8xbf16> to vector<4x2x8xbf16>
    %32 = vector.extract_strided_slice %25 {offsets = [0, 32], sizes = [8, 8], strides = [1, 1]} : vector<8x96xbf16> to vector<8x8xbf16>
    %33 = vector.shape_cast %32 : vector<8x8xbf16> to vector<4x2x8xbf16>
    %34 = vector.extract_strided_slice %25 {offsets = [0, 64], sizes = [8, 8], strides = [1, 1]} : vector<8x96xbf16> to vector<8x8xbf16>
    %35 = vector.shape_cast %34 : vector<8x8xbf16> to vector<4x2x8xbf16>
    "tpu.trace_start"() <{level = 10 : i32, message = "bqc,bkc->bqk"}> : () -> ()
    %cst_14 = arith.constant dense<0.000000e+00> : vector<4x2x2xf32>
    %36 = tpu.matmul %31, %33, %cst_14 {dimension_numbers = #tpu.dot_dimension_numbers<[2], [2], [1], [1], [0, 0, 0, 1, 1, 1], [0], [0]>} : vector<4x2x8xbf16>, vector<4x2x8xbf16>, vector<4x2x2xf32> -> vector<4x2x2xf32>
    "tpu.trace_stop"() : () -> ()
    %cst_15 = arith.constant dense<0xFF800000> : vector<4x2xf32>
    %37 = vector.multi_reduction <maximumf>, %36, %cst_15 [2] : vector<4x2x2xf32> to vector<4x2xf32>
    %38 = vector.shape_cast %37 : vector<4x2xf32> to vector<4x2x1xf32>
    %39 = vector.broadcast %38 : vector<4x2x1xf32> to vector<4x2x2xf32>
    %40 = arith.subf %36, %39 : vector<4x2x2xf32>
    %41 = math.exp %40 : vector<4x2x2xf32>
    %cst_16 = arith.constant dense<0.000000e+00> : vector<4x2xf32>
    %42 = vector.multi_reduction <add>, %41, %cst_16 [2] : vector<4x2x2xf32> to vector<4x2xf32>
    %43 = vector.shape_cast %42 : vector<4x2xf32> to vector<4x2x1xf32>
    %44 = tpu.reciprocal %43 : vector<4x2x1xf32> -> vector<4x2x1xf32>
    %45 = vector.broadcast %44 : vector<4x2x1xf32> to vector<4x2x2xf32>
    %46 = arith.mulf %41, %45 : vector<4x2x2xf32>
    %47 = arith.truncf %46 : vector<4x2x2xf32> to vector<4x2x2xbf16>
    "tpu.trace_start"() <{level = 10 : i32, message = "bqk,bkc->bqc"}> : () -> ()
    %cst_17 = arith.constant dense<0.000000e+00> : vector<4x2x8xf32>
    %48 = tpu.matmul %47, %35, %cst_17 {dimension_numbers = #tpu.dot_dimension_numbers<[2], [1], [1], [2], [0, 0, 0, 1, 1, 2], [0], [0]>} : vector<4x2x2xbf16>, vector<4x2x8xbf16>, vector<4x2x8xf32> -> vector<4x2x8xf32>
    "tpu.trace_stop"() : () -> ()
    %49 = vector.shape_cast %48 : vector<4x2x8xf32> to vector<8x8xf32>
    %50 = arith.truncf %49 : vector<8x8xf32> to vector<8x8xbf16>
    %c0_18 = arith.constant 0 : index
    %c0_19 = arith.constant 0 : index
    %c0_20 = arith.constant 0 : index
    %51 = vector.load %arg4[%c0_18, %c0_19, %c0_20] : memref<4x8x32xbf16, #tpu.memory_space<vmem>>, vector<1x8x32xbf16>
    %52 = vector.shape_cast %51 : vector<1x8x32xbf16> to vector<8x32xbf16>
    %cst_21 = arith.constant dense<0.000000e+00> : vector<8x32xf32>
    %53 = tpu.matmul %50, %52, %cst_21 {dimension_numbers = #tpu.dot_dimension_numbers<[1], [0], [0], [1], [0, 0, 1, 1], [], []>} : vector<8x8xbf16>, vector<8x32xbf16>, vector<8x32xf32> -> vector<8x32xf32>
    %54 = arith.addf %29, %53 : vector<8x32xf32>
    %55 = vector.extract_strided_slice %25 {offsets = [0, 8], sizes = [8, 8], strides = [1, 1]} : vector<8x96xbf16> to vector<8x8xbf16>
    %56 = vector.shape_cast %55 : vector<8x8xbf16> to vector<4x2x8xbf16>
    %57 = vector.extract_strided_slice %25 {offsets = [0, 40], sizes = [8, 8], strides = [1, 1]} : vector<8x96xbf16> to vector<8x8xbf16>
    %58 = vector.shape_cast %57 : vector<8x8xbf16> to vector<4x2x8xbf16>
    %59 = vector.extract_strided_slice %25 {offsets = [0, 72], sizes = [8, 8], strides = [1, 1]} : vector<8x96xbf16> to vector<8x8xbf16>
    %60 = vector.shape_cast %59 : vector<8x8xbf16> to vector<4x2x8xbf16>
    "tpu.trace_start"() <{level = 10 : i32, message = "bqc,bkc->bqk"}> : () -> ()
    %cst_22 = arith.constant dense<0.000000e+00> : vector<4x2x2xf32>
    %61 = tpu.matmul %56, %58, %cst_22 {dimension_numbers = #tpu.dot_dimension_numbers<[2], [2], [1], [1], [0, 0, 0, 1, 1, 1], [0], [0]>} : vector<4x2x8xbf16>, vector<4x2x8xbf16>, vector<4x2x2xf32> -> vector<4x2x2xf32>
    "tpu.trace_stop"() : () -> ()
    %cst_23 = arith.constant dense<0xFF800000> : vector<4x2xf32>
    %62 = vector.multi_reduction <maximumf>, %61, %cst_23 [2] : vector<4x2x2xf32> to vector<4x2xf32>
    %63 = vector.shape_cast %62 : vector<4x2xf32> to vector<4x2x1xf32>
    %64 = vector.broadcast %63 : vector<4x2x1xf32> to vector<4x2x2xf32>
    %65 = arith.subf %61, %64 : vector<4x2x2xf32>
    %66 = math.exp %65 : vector<4x2x2xf32>
    %cst_24 = arith.constant dense<0.000000e+00> : vector<4x2xf32>
    %67 = vector.multi_reduction <add>, %66, %cst_24 [2] : vector<4x2x2xf32> to vector<4x2xf32>
    %68 = vector.shape_cast %67 : vector<4x2xf32> to vector<4x2x1xf32>
    %69 = tpu.reciprocal %68 : vector<4x2x1xf32> -> vector<4x2x1xf32>
    %70 = vector.broadcast %69 : vector<4x2x1xf32> to vector<4x2x2xf32>
    %71 = arith.mulf %66, %70 : vector<4x2x2xf32>
    %72 = arith.truncf %71 : vector<4x2x2xf32> to vector<4x2x2xbf16>
    "tpu.trace_start"() <{level = 10 : i32, message = "bqk,bkc->bqc"}> : () -> ()
    %cst_25 = arith.constant dense<0.000000e+00> : vector<4x2x8xf32>
    %73 = tpu.matmul %72, %60, %cst_25 {dimension_numbers = #tpu.dot_dimension_numbers<[2], [1], [1], [2], [0, 0, 0, 1, 1, 2], [0], [0]>} : vector<4x2x2xbf16>, vector<4x2x8xbf16>, vector<4x2x8xf32> -> vector<4x2x8xf32>
    "tpu.trace_stop"() : () -> ()
    %74 = vector.shape_cast %73 : vector<4x2x8xf32> to vector<8x8xf32>
    %75 = arith.truncf %74 : vector<8x8xf32> to vector<8x8xbf16>
    %c1 = arith.constant 1 : index
    %c0_26 = arith.constant 0 : index
    %c0_27 = arith.constant 0 : index
    %76 = vector.load %arg4[%c1, %c0_26, %c0_27] : memref<4x8x32xbf16, #tpu.memory_space<vmem>>, vector<1x8x32xbf16>
    %77 = vector.shape_cast %76 : vector<1x8x32xbf16> to vector<8x32xbf16>
    %cst_28 = arith.constant dense<0.000000e+00> : vector<8x32xf32>
    %78 = tpu.matmul %75, %77, %cst_28 {dimension_numbers = #tpu.dot_dimension_numbers<[1], [0], [0], [1], [0, 0, 1, 1], [], []>} : vector<8x8xbf16>, vector<8x32xbf16>, vector<8x32xf32> -> vector<8x32xf32>
    %79 = arith.addf %54, %78 : vector<8x32xf32>
    %80 = vector.extract_strided_slice %25 {offsets = [0, 16], sizes = [8, 8], strides = [1, 1]} : vector<8x96xbf16> to vector<8x8xbf16>
    %81 = vector.shape_cast %80 : vector<8x8xbf16> to vector<4x2x8xbf16>
    %82 = vector.extract_strided_slice %25 {offsets = [0, 48], sizes = [8, 8], strides = [1, 1]} : vector<8x96xbf16> to vector<8x8xbf16>
    %83 = vector.shape_cast %82 : vector<8x8xbf16> to vector<4x2x8xbf16>
    %84 = vector.extract_strided_slice %25 {offsets = [0, 80], sizes = [8, 8], strides = [1, 1]} : vector<8x96xbf16> to vector<8x8xbf16>
    %85 = vector.shape_cast %84 : vector<8x8xbf16> to vector<4x2x8xbf16>
    "tpu.trace_start"() <{level = 10 : i32, message = "bqc,bkc->bqk"}> : () -> ()
    %cst_29 = arith.constant dense<0.000000e+00> : vector<4x2x2xf32>
    %86 = tpu.matmul %81, %83, %cst_29 {dimension_numbers = #tpu.dot_dimension_numbers<[2], [2], [1], [1], [0, 0, 0, 1, 1, 1], [0], [0]>} : vector<4x2x8xbf16>, vector<4x2x8xbf16>, vector<4x2x2xf32> -> vector<4x2x2xf32>
    "tpu.trace_stop"() : () -> ()
    %cst_30 = arith.constant dense<0xFF800000> : vector<4x2xf32>
    %87 = vector.multi_reduction <maximumf>, %86, %cst_30 [2] : vector<4x2x2xf32> to vector<4x2xf32>
    %88 = vector.shape_cast %87 : vector<4x2xf32> to vector<4x2x1xf32>
    %89 = vector.broadcast %88 : vector<4x2x1xf32> to vector<4x2x2xf32>
    %90 = arith.subf %86, %89 : vector<4x2x2xf32>
    %91 = math.exp %90 : vector<4x2x2xf32>
    %cst_31 = arith.constant dense<0.000000e+00> : vector<4x2xf32>
    %92 = vector.multi_reduction <add>, %91, %cst_31 [2] : vector<4x2x2xf32> to vector<4x2xf32>
    %93 = vector.shape_cast %92 : vector<4x2xf32> to vector<4x2x1xf32>
    %94 = tpu.reciprocal %93 : vector<4x2x1xf32> -> vector<4x2x1xf32>
    %95 = vector.broadcast %94 : vector<4x2x1xf32> to vector<4x2x2xf32>
    %96 = arith.mulf %91, %95 : vector<4x2x2xf32>
    %97 = arith.truncf %96 : vector<4x2x2xf32> to vector<4x2x2xbf16>
    "tpu.trace_start"() <{level = 10 : i32, message = "bqk,bkc->bqc"}> : () -> ()
    %cst_32 = arith.constant dense<0.000000e+00> : vector<4x2x8xf32>
    %98 = tpu.matmul %97, %85, %cst_32 {dimension_numbers = #tpu.dot_dimension_numbers<[2], [1], [1], [2], [0, 0, 0, 1, 1, 2], [0], [0]>} : vector<4x2x2xbf16>, vector<4x2x8xbf16>, vector<4x2x8xf32> -> vector<4x2x8xf32>
    "tpu.trace_stop"() : () -> ()
    %99 = vector.shape_cast %98 : vector<4x2x8xf32> to vector<8x8xf32>
    %100 = arith.truncf %99 : vector<8x8xf32> to vector<8x8xbf16>
    %c2 = arith.constant 2 : index
    %c0_33 = arith.constant 0 : index
    %c0_34 = arith.constant 0 : index
    %101 = vector.load %arg4[%c2, %c0_33, %c0_34] : memref<4x8x32xbf16, #tpu.memory_space<vmem>>, vector<1x8x32xbf16>
    %102 = vector.shape_cast %101 : vector<1x8x32xbf16> to vector<8x32xbf16>
    %cst_35 = arith.constant dense<0.000000e+00> : vector<8x32xf32>
    %103 = tpu.matmul %100, %102, %cst_35 {dimension_numbers = #tpu.dot_dimension_numbers<[1], [0], [0], [1], [0, 0, 1, 1], [], []>} : vector<8x8xbf16>, vector<8x32xbf16>, vector<8x32xf32> -> vector<8x32xf32>
    %104 = arith.addf %79, %103 : vector<8x32xf32>
    %105 = vector.extract_strided_slice %25 {offsets = [0, 24], sizes = [8, 8], strides = [1, 1]} : vector<8x96xbf16> to vector<8x8xbf16>
    %106 = vector.shape_cast %105 : vector<8x8xbf16> to vector<4x2x8xbf16>
    %107 = vector.extract_strided_slice %25 {offsets = [0, 56], sizes = [8, 8], strides = [1, 1]} : vector<8x96xbf16> to vector<8x8xbf16>
    %108 = vector.shape_cast %107 : vector<8x8xbf16> to vector<4x2x8xbf16>
    %109 = vector.extract_strided_slice %25 {offsets = [0, 88], sizes = [8, 8], strides = [1, 1]} : vector<8x96xbf16> to vector<8x8xbf16>
    %110 = vector.shape_cast %109 : vector<8x8xbf16> to vector<4x2x8xbf16>
    "tpu.trace_start"() <{level = 10 : i32, message = "bqc,bkc->bqk"}> : () -> ()
    %cst_36 = arith.constant dense<0.000000e+00> : vector<4x2x2xf32>
    %111 = tpu.matmul %106, %108, %cst_36 {dimension_numbers = #tpu.dot_dimension_numbers<[2], [2], [1], [1], [0, 0, 0, 1, 1, 1], [0], [0]>} : vector<4x2x8xbf16>, vector<4x2x8xbf16>, vector<4x2x2xf32> -> vector<4x2x2xf32>
    "tpu.trace_stop"() : () -> ()
    %cst_37 = arith.constant dense<0xFF800000> : vector<4x2xf32>
    %112 = vector.multi_reduction <maximumf>, %111, %cst_37 [2] : vector<4x2x2xf32> to vector<4x2xf32>
    %113 = vector.shape_cast %112 : vector<4x2xf32> to vector<4x2x1xf32>
    %114 = vector.broadcast %113 : vector<4x2x1xf32> to vector<4x2x2xf32>
    %115 = arith.subf %111, %114 : vector<4x2x2xf32>
    %116 = math.exp %115 : vector<4x2x2xf32>
    %cst_38 = arith.constant dense<0.000000e+00> : vector<4x2xf32>
    %117 = vector.multi_reduction <add>, %116, %cst_38 [2] : vector<4x2x2xf32> to vector<4x2xf32>
    %118 = vector.shape_cast %117 : vector<4x2xf32> to vector<4x2x1xf32>
    %119 = tpu.reciprocal %118 : vector<4x2x1xf32> -> vector<4x2x1xf32>
    %120 = vector.broadcast %119 : vector<4x2x1xf32> to vector<4x2x2xf32>
    %121 = arith.mulf %116, %120 : vector<4x2x2xf32>
    %122 = arith.truncf %121 : vector<4x2x2xf32> to vector<4x2x2xbf16>
    "tpu.trace_start"() <{level = 10 : i32, message = "bqk,bkc->bqc"}> : () -> ()
    %cst_39 = arith.constant dense<0.000000e+00> : vector<4x2x8xf32>
    %123 = tpu.matmul %122, %110, %cst_39 {dimension_numbers = #tpu.dot_dimension_numbers<[2], [1], [1], [2], [0, 0, 0, 1, 1, 2], [0], [0]>} : vector<4x2x2xbf16>, vector<4x2x8xbf16>, vector<4x2x8xf32> -> vector<4x2x8xf32>
    "tpu.trace_stop"() : () -> ()
    %124 = vector.shape_cast %123 : vector<4x2x8xf32> to vector<8x8xf32>
    %125 = arith.truncf %124 : vector<8x8xf32> to vector<8x8xbf16>
    %c3 = arith.constant 3 : index
    %c0_40 = arith.constant 0 : index
    %c0_41 = arith.constant 0 : index
    %126 = vector.load %arg4[%c3, %c0_40, %c0_41] : memref<4x8x32xbf16, #tpu.memory_space<vmem>>, vector<1x8x32xbf16>
    %127 = vector.shape_cast %126 : vector<1x8x32xbf16> to vector<8x32xbf16>
    %cst_42 = arith.constant dense<0.000000e+00> : vector<8x32xf32>
    %128 = tpu.matmul %125, %127, %cst_42 {dimension_numbers = #tpu.dot_dimension_numbers<[1], [0], [0], [1], [0, 0, 1, 1], [], []>} : vector<8x8xbf16>, vector<8x32xbf16>, vector<8x32xf32> -> vector<8x32xf32>
    %129 = arith.addf %104, %128 : vector<8x32xf32>
    %130 = arith.truncf %129 : vector<8x32xf32> to vector<8x32xbf16>
    %c0_43 = arith.constant 0 : index
    %c0_44 = arith.constant 0 : index
    %131 = vector.load %arg6[%c0_43, %c0_44] : memref<32x32xbf16, #tpu.memory_space<vmem>>, vector<32x32xbf16>
    %cst_45 = arith.constant dense<0.000000e+00> : vector<8x32xf32>
    %132 = tpu.matmul %130, %131, %cst_45 {dimension_numbers = #tpu.dot_dimension_numbers<[1], [0], [0], [1], [0, 0, 1, 1], [], []>} : vector<8x32xbf16>, vector<32x32xbf16>, vector<8x32xf32> -> vector<8x32xf32>
    %c0_46 = arith.constant 0 : index
    %c0_47 = arith.constant 0 : index
    %133 = vector.load %arg7[%c0_46, %c0_47] : memref<1x32xf32, #tpu.memory_space<vmem>>, vector<1x32xf32>
    %134 = vector.broadcast %133 : vector<1x32xf32> to vector<8x32xf32>
    %135 = arith.addf %132, %134 : vector<8x32xf32>
    %136 = arith.addf %2, %135 : vector<8x32xf32>
    %137 = vector.shape_cast %136 : vector<8x32xf32> to vector<4x2x32xf32>
    %138 = arith.truncf %137 : vector<4x2x32xf32> to vector<4x2x32xbf16>
    %c0_48 = arith.constant 0 : index
    %c0_49 = arith.constant 0 : index
    %c0_50 = arith.constant 0 : index
    %139 = vector.load %arg8[%c0_48, %c0_49, %c0_50] : memref<4x2x32xbf16, #tpu.memory_space<vmem>>, vector<4x2x32xbf16>
    tpu.vector_store %arg8[%c0_48, %c0_49, %c0_50], %138 {strides = array<i32>} : memref<4x2x32xbf16, #tpu.memory_space<vmem>>, vector<4x2x32xbf16>,
    return
  }
  func.func @transform_0(%arg0: i32) -> (i32, i32, i32) {
    %c0_i32 = arith.constant 0 : i32
    %c0_i32_0 = arith.constant 0 : i32
    %c0_i32_1 = arith.constant 0 : i32
    return %arg0, %c0_i32, %c0_i32_0 : i32, i32, i32
  }
  func.func @transform_1(%arg0: i32) -> (i32, i32) {
    %c0_i32 = arith.constant 0 : i32
    %c0_i32_0 = arith.constant 0 : i32
    %c0_i32_1 = arith.constant 0 : i32
    return %c0_i32, %c0_i32_0 : i32, i32
  }
  func.func @transform_2(%arg0: i32) -> (i32, i32) {
    %c0_i32 = arith.constant 0 : i32
    %c0_i32_0 = arith.constant 0 : i32
    %c0_i32_1 = arith.constant 0 : i32
    return %c0_i32, %c0_i32_0 : i32, i32
  }
  func.func @transform_3(%arg0: i32) -> (i32, i32, i32) {
    %c0_i32 = arith.constant 0 : i32
    %c0_i32_0 = arith.constant 0 : i32
    %c0_i32_1 = arith.constant 0 : i32
    %c0_i32_2 = arith.constant 0 : i32
    return %c0_i32, %c0_i32_0, %c0_i32_1 : i32, i32, i32
  }
  func.func @transform_4(%arg0: i32) -> (i32, i32) {
    %c0_i32 = arith.constant 0 : i32
    %c0_i32_0 = arith.constant 0 : i32
    %c0_i32_1 = arith.constant 0 : i32
    return %c0_i32, %c0_i32_0 : i32, i32
  }
  func.func @transform_5(%arg0: i32) -> (i32, i32) {
    %c0_i32 = arith.constant 0 : i32
    %c0_i32_0 = arith.constant 0 : i32
    %c0_i32_1 = arith.constant 0 : i32
    return %c0_i32, %c0_i32_0 : i32, i32
  }
  func.func @transform_6(%arg0: i32) -> (i32, i32) {
    %c0_i32 = arith.constant 0 : i32
    %c0_i32_0 = arith.constant 0 : i32
    %c0_i32_1 = arith.constant 0 : i32
    return %c0_i32, %c0_i32_0 : i32, i32
  }
  func.func @transform_7(%arg0: i32) -> (i32, i32, i32) {
    %c0_i32 = arith.constant 0 : i32
    %c0_i32_0 = arith.constant 0 : i32
    %c0_i32_1 = arith.constant 0 : i32
    return %arg0, %c0_i32, %c0_i32_0 : i32, i32, i32
  }
}

module attributes {stable_mosaic.version = 11 : i64} {
  func.func @add_ln_mlp_kernel(%arg0: i32, %arg1: i32, %arg2: memref<1x1x32xbf16, #tpu.memory_space<vmem>>, %arg3: memref<1x1x32xbf16, #tpu.memory_space<vmem>>, %arg4: memref<1x8x32xbf16, #tpu.memory_space<vmem>>, %arg5: memref<1x8x32xbf16, #tpu.memory_space<vmem>>, %arg6: memref<32x128xbf16, #tpu.memory_space<vmem>>, %arg7: memref<1x128xf32, #tpu.memory_space<vmem>>, %arg8: memref<128x32xbf16, #tpu.memory_space<vmem>>, %arg9: memref<1x32xf32, #tpu.memory_space<vmem>>, %arg10: memref<1x9x32xf32, #tpu.memory_space<vmem>>, %arg11: memref<9x32xbf16, #tpu.memory_space<vmem>>, %arg12: memref<9x32xf32, #tpu.memory_space<vmem>>) attributes {dimension_semantics = [#tpu.dimension_semantics<parallel>, #tpu.dimension_semantics<arbitrary>], iteration_bounds = array<i64: 2, 1>, scalar_prefetch = 0 : i64, scratch_operands = 2 : i64, tpu.core_type = #tpu.core_type<tc>, window_params = [{transform_indices = @transform_0, window_bounds = array<i64: 1, 1, 32>}, {transform_indices = @transform_1, window_bounds = array<i64: 1, 1, 32>}, {transform_indices = @transform_2, window_bounds = array<i64: 1, 8, 32>}, {transform_indices = @transform_3, window_bounds = array<i64: 1, 8, 32>}, {transform_indices = @transform_4, window_bounds = array<i64: 32, 128>}, {transform_indices = @transform_5, window_bounds = array<i64: 1, 128>}, {transform_indices = @transform_6, window_bounds = array<i64: 128, 32>}, {pipeline_mode = #tpu.pipeline_mode<synchronous>, transform_indices = @transform_7, window_bounds = array<i64: 1, 32>}, {transform_indices = @transform_8, window_bounds = array<i64: 1, 9, 32>}]} {
    %c0_i32 = arith.constant 0 : i32
    %0 = arith.cmpi eq, %arg1, %c0_i32 : i32
    %1 = arith.extui %0 : i1 to i32
    %c0_i32_0 = arith.constant 0 : i32
    %2 = arith.cmpi ne, %1, %c0_i32_0 : i32
    scf.if %2 {
      %c0_17 = arith.constant 0 : index
      %c0_18 = arith.constant 0 : index
      %c0_19 = arith.constant 0 : index
      %25 = vector.load %arg2[%c0_17, %c0_18, %c0_19] : memref<1x1x32xbf16, #tpu.memory_space<vmem>>, vector<1x1x32xbf16>
      %26 = arith.extf %25 : vector<1x1x32xbf16> to vector<1x1x32xf32>
      %c0_20 = arith.constant 0 : index
      %c0_21 = arith.constant 0 : index
      %c0_22 = arith.constant 0 : index
      %27 = vector.load %arg3[%c0_20, %c0_21, %c0_22] : memref<1x1x32xbf16, #tpu.memory_space<vmem>>, vector<1x1x32xbf16>
      %28 = arith.extf %27 : vector<1x1x32xbf16> to vector<1x1x32xf32>
      %29 = arith.addf %26, %28 : vector<1x1x32xf32>
      %c0_23 = arith.constant 0 : index
      %c0_24 = arith.constant 0 : index
      %c0_25 = arith.constant 0 : index
      %30 = vector.load %arg4[%c0_23, %c0_24, %c0_25] : memref<1x8x32xbf16, #tpu.memory_space<vmem>>, vector<1x8x32xbf16>
      %31 = arith.extf %30 : vector<1x8x32xbf16> to vector<1x8x32xf32>
      %c0_26 = arith.constant 0 : index
      %c0_27 = arith.constant 0 : index
      %c0_28 = arith.constant 0 : index
      %32 = vector.load %arg5[%c0_26, %c0_27, %c0_28] : memref<1x8x32xbf16, #tpu.memory_space<vmem>>, vector<1x8x32xbf16>
      %33 = arith.extf %32 : vector<1x8x32xbf16> to vector<1x8x32xf32>
      %34 = arith.addf %31, %33 : vector<1x8x32xf32>
      %35 = tpu.concatenate %29, %34 in 1 : vector<1x1x32xf32>, vector<1x8x32xf32> -> vector<1x9x32xf32>
      %36 = vector.shape_cast %35 : vector<1x9x32xf32> to vector<9x32xf32>
      %cst_29 = arith.constant dense<0.000000e+00> : vector<9xf32>
      %37 = vector.multi_reduction <add>, %36, %cst_29 [1] : vector<9x32xf32> to vector<9xf32>
      %38 = vector.shape_cast %37 : vector<9xf32> to vector<9x1xf32>
      %cst_30 = arith.constant 3.200000e+01 : f32
      %39 = vector.broadcast %cst_30 : f32 to vector<9x1xf32>
      %40 = arith.divf %38, %39 : vector<9x1xf32>
      %41 = vector.broadcast %40 : vector<9x1xf32> to vector<9x32xf32>
      %42 = arith.subf %36, %41 : vector<9x32xf32>
      %43 = arith.mulf %42, %42 : vector<9x32xf32>
      %cst_31 = arith.constant dense<0.000000e+00> : vector<9xf32>
      %44 = vector.multi_reduction <add>, %43, %cst_31 [1] : vector<9x32xf32> to vector<9xf32>
      %45 = vector.shape_cast %44 : vector<9xf32> to vector<9x1xf32>
      %cst_32 = arith.constant 3.200000e+01 : f32
      %46 = vector.broadcast %cst_32 : f32 to vector<9x1xf32>
      %47 = arith.divf %45, %46 : vector<9x1xf32>
      %cst_33 = arith.constant 9.99999974E-6 : f32
      %48 = vector.broadcast %cst_33 : f32 to vector<9x1xf32>
      %49 = arith.addf %47, %48 : vector<9x1xf32>
      %50 = math.rsqrt %49 : vector<9x1xf32>
      %51 = vector.broadcast %50 : vector<9x1xf32> to vector<9x32xf32>
      %52 = arith.mulf %42, %51 : vector<9x32xf32>
      %53 = arith.truncf %52 : vector<9x32xf32> to vector<9x32xbf16>
      %c0_34 = arith.constant 0 : index
      %c0_35 = arith.constant 0 : index
      %54 = vector.load %arg11[%c0_34, %c0_35] : memref<9x32xbf16, #tpu.memory_space<vmem>>, vector<9x32xbf16>
      tpu.vector_store %arg11[%c0_34, %c0_35], %53 {strides = array<i32>} : memref<9x32xbf16, #tpu.memory_space<vmem>>, vector<9x32xbf16>,
      %c0_36 = arith.constant 0 : index
      %c0_37 = arith.constant 0 : index
      %55 = vector.load %arg9[%c0_36, %c0_37] : memref<1x32xf32, #tpu.memory_space<vmem>>, vector<1x32xf32>
      %56 = vector.broadcast %55 : vector<1x32xf32> to vector<9x32xf32>
      %57 = arith.addf %36, %56 : vector<9x32xf32>
      %c0_38 = arith.constant 0 : index
      %c0_39 = arith.constant 0 : index
      %58 = vector.load %arg12[%c0_38, %c0_39] : memref<9x32xf32, #tpu.memory_space<vmem>>, vector<9x32xf32>
      tpu.vector_store %arg12[%c0_38, %c0_39], %57 {strides = array<i32>} : memref<9x32xf32, #tpu.memory_space<vmem>>, vector<9x32xf32>,
    } else {
    }
    %c0 = arith.constant 0 : index
    %c0_1 = arith.constant 0 : index
    %3 = vector.load %arg11[%c0, %c0_1] : memref<9x32xbf16, #tpu.memory_space<vmem>>, vector<9x32xbf16>
    %c0_2 = arith.constant 0 : index
    %c0_3 = arith.constant 0 : index
    %4 = vector.load %arg6[%c0_2, %c0_3] : memref<32x128xbf16, #tpu.memory_space<vmem>>, vector<32x128xbf16>
    %cst = arith.constant dense<0.000000e+00> : vector<9x128xf32>
    %5 = tpu.matmul %3, %4, %cst {dimension_numbers = #tpu.dot_dimension_numbers<[1], [0], [0], [1], [0, 0, 1, 1], [], []>} : vector<9x32xbf16>, vector<32x128xbf16>, vector<9x128xf32> -> vector<9x128xf32>
    %c0_4 = arith.constant 0 : index
    %c0_5 = arith.constant 0 : index
    %6 = vector.load %arg7[%c0_4, %c0_5] : memref<1x128xf32, #tpu.memory_space<vmem>>, vector<1x128xf32>
    %7 = vector.broadcast %6 : vector<1x128xf32> to vector<9x128xf32>
    %8 = arith.addf %5, %7 : vector<9x128xf32>
    %cst_6 = arith.constant -1.702000e+00 : f32
    %9 = vector.broadcast %cst_6 : f32 to vector<9x128xf32>
    %10 = arith.mulf %9, %8 : vector<9x128xf32>
    %11 = math.exp %10 : vector<9x128xf32>
    %cst_7 = arith.constant 1.000000e+00 : f32
    %12 = vector.broadcast %cst_7 : f32 to vector<9x128xf32>
    %13 = arith.addf %12, %11 : vector<9x128xf32>
    %14 = tpu.reciprocal %13 {approx = true} : vector<9x128xf32> -> vector<9x128xf32>
    %15 = arith.mulf %8, %14 : vector<9x128xf32>
    %c0_8 = arith.constant 0 : index
    %c0_9 = arith.constant 0 : index
    %16 = vector.load %arg12[%c0_8, %c0_9] : memref<9x32xf32, #tpu.memory_space<vmem>>, vector<9x32xf32>
    %17 = arith.truncf %15 : vector<9x128xf32> to vector<9x128xbf16>
    %c0_10 = arith.constant 0 : index
    %c0_11 = arith.constant 0 : index
    %18 = vector.load %arg8[%c0_10, %c0_11] : memref<128x32xbf16, #tpu.memory_space<vmem>>, vector<128x32xbf16>
    %cst_12 = arith.constant dense<0.000000e+00> : vector<9x32xf32>
    %19 = tpu.matmul %17, %18, %cst_12 {dimension_numbers = #tpu.dot_dimension_numbers<[1], [0], [0], [1], [0, 0, 1, 1], [], []>} : vector<9x128xbf16>, vector<128x32xbf16>, vector<9x32xf32> -> vector<9x32xf32>
    %20 = arith.addf %16, %19 : vector<9x32xf32>
    %c0_13 = arith.constant 0 : index
    %c0_14 = arith.constant 0 : index
    %21 = vector.load %arg12[%c0_13, %c0_14] : memref<9x32xf32, #tpu.memory_space<vmem>>, vector<9x32xf32>
    tpu.vector_store %arg12[%c0_13, %c0_14], %20 {strides = array<i32>} : memref<9x32xf32, #tpu.memory_space<vmem>>, vector<9x32xf32>,
    %c0_i32_15 = arith.constant 0 : i32
    %22 = arith.cmpi eq, %arg1, %c0_i32_15 : i32
    %23 = arith.extui %22 : i1 to i32
    %c0_i32_16 = arith.constant 0 : i32
    %24 = arith.cmpi ne, %23, %c0_i32_16 : i32
    scf.if %24 {
      %c0_17 = arith.constant 0 : index
      %c0_18 = arith.constant 0 : index
      %25 = vector.load %arg12[%c0_17, %c0_18] : memref<9x32xf32, #tpu.memory_space<vmem>>, vector<9x32xf32>
      %26 = vector.shape_cast %25 : vector<9x32xf32> to vector<1x9x32xf32>
      %c0_19 = arith.constant 0 : index
      %c0_20 = arith.constant 0 : index
      %c0_21 = arith.constant 0 : index
      %27 = vector.load %arg10[%c0_19, %c0_20, %c0_21] : memref<1x9x32xf32, #tpu.memory_space<vmem>>, vector<1x9x32xf32>
      tpu.vector_store %arg10[%c0_19, %c0_20, %c0_21], %26 {strides = array<i32>} : memref<1x9x32xf32, #tpu.memory_space<vmem>>, vector<1x9x32xf32>,
    } else {
    }
    return
  }
  func.func @transform_0(%arg0: i32, %arg1: i32) -> (i32, i32, i32) {
    %c0_i32 = arith.constant 0 : i32
    %c0_i32_0 = arith.constant 0 : i32
    %c0_i32_1 = arith.constant 0 : i32
    return %arg0, %c0_i32, %c0_i32_0 : i32, i32, i32
  }
  func.func @transform_1(%arg0: i32, %arg1: i32) -> (i32, i32, i32) {
    %c0_i32 = arith.constant 0 : i32
    %c0_i32_0 = arith.constant 0 : i32
    %c0_i32_1 = arith.constant 0 : i32
    return %arg0, %c0_i32, %c0_i32_0 : i32, i32, i32
  }
  func.func @transform_2(%arg0: i32, %arg1: i32) -> (i32, i32, i32) {
    %c0_i32 = arith.constant 0 : i32
    %c0_i32_0 = arith.constant 0 : i32
    %c0_i32_1 = arith.constant 0 : i32
    return %arg0, %c0_i32, %c0_i32_0 : i32, i32, i32
  }
  func.func @transform_3(%arg0: i32, %arg1: i32) -> (i32, i32, i32) {
    %c0_i32 = arith.constant 0 : i32
    %c0_i32_0 = arith.constant 0 : i32
    %c0_i32_1 = arith.constant 0 : i32
    return %arg0, %c0_i32, %c0_i32_0 : i32, i32, i32
  }
  func.func @transform_4(%arg0: i32, %arg1: i32) -> (i32, i32) {
    %c0_i32 = arith.constant 0 : i32
    %c0_i32_0 = arith.constant 0 : i32
    return %c0_i32, %arg1 : i32, i32
  }
  func.func @transform_5(%arg0: i32, %arg1: i32) -> (i32, i32) {
    %c0_i32 = arith.constant 0 : i32
    %c0_i32_0 = arith.constant 0 : i32
    return %c0_i32, %arg1 : i32, i32
  }
  func.func @transform_6(%arg0: i32, %arg1: i32) -> (i32, i32) {
    %c0_i32 = arith.constant 0 : i32
    %c0_i32_0 = arith.constant 0 : i32
    return %arg1, %c0_i32 : i32, i32
  }
  func.func @transform_7(%arg0: i32, %arg1: i32) -> (i32, i32) {
    %c0_i32 = arith.constant 0 : i32
    %c0_i32_0 = arith.constant 0 : i32
    %c0_i32_1 = arith.constant 0 : i32
    return %c0_i32, %c0_i32_0 : i32, i32
  }
  func.func @transform_8(%arg0: i32, %arg1: i32) -> (i32, i32, i32) {
    %c0_i32 = arith.constant 0 : i32
    %c0_i32_0 = arith.constant 0 : i32
    %c0_i32_1 = arith.constant 0 : i32
    return %arg0, %c0_i32, %c0_i32_0 : i32, i32, i32
  }
}

</mosaic_0001>

<bundles_post_ra>
// kernel: tpu_custom_call.1
= control target key start
LH: loop header
LB: loop body
LE: loop exit
PB: predicated region body
PF: predicated region fallthrough
CT: control target
= control target key end

     0   :  { %6 = vsyncpa [#allocation3], 0  ;;  %s340_s0 = inlined_call_operand.hbm [shape: f32[8,128], index: 0, kind: input, shape index: {}]   ;;  %s341_s1 = inlined_call_operand.hbm [shape: f32[8,128], index: 1, kind: output, shape index: {}]  }
   0x1   :  { %7 = vsyncpa [#allocation4], 0  ;;  %s261_s6 = smov 0  }
   0x2 LB: > { %s144_s7 = sadd.s32 4294967295, %s247_s6   ;;  %p145_p0 = scmp.ge.s32.totalorder %s247_s6, 1  ;;  %s247_s6 = sphi %s261_s6, %s13_s6  }
   0x3   : > { %p60_p1 = scmp.lt.s32.totalorder %s247_s6, 3  ;;  %p275_p3 = scmp.eq.s32.totalorder %s144_s7, 0 }
   0x4   : > { %s249_s10 = smov [#allocation2]   ;;  %s179_s15 = scalar_lea.hbm %s340_s0, 128 }
   0x5   : > { %p269_p2 = pnand %p145_p0, %p60_p1  ;;  %s73_s11 = sshll.u32 %s249_s10, 4  ;;  %s74_s11 = int_to_ptr.vmem [resolvable:$true] %s73_s11 }
   0x6   : > { %s346_s9 = scalar_select %p275_p3, 1, 0 }
   0x7   : > { %s345_s8 = scalar_select %p269_p2, 1, 0 }
   0x8   : > { %p161_p4 = pneg %p269_p2  ;;  %p180_p6 = scmp.ne.s32.totalorder %s340_s0, %s179_s15 }
   0x9   : > { %p186_p10 = scmp.lt.u32.totalorder %s179_s15, %s340_s0 }
   0xa   : > { %p283_p5 = pnand %p275_p3, %p161_p4 }
   0xc   : > { %p181_p7 = pneg %p283_p5 }
   0xe   : > { %p182_p8 = pnand %p181_p7, %p180_p6 }
  0x10   : > { %p183_p9 = pneg %p182_p8 }
  0x12   : > { %p188_p11 = pnand %p186_p10, %p183_p9 }
  0x14   : > { %191 = shalt.err (!%p188_p11)
}
  0x15   : > { %s192_s20 = scalar_lea.vmem %s74_s11, 128  ;;  %p200_p1 = scmp.lt.s32.totalorder %s74_s11, %s74_s11 }
  0x16   : > { %p193_p12 = scmp.ne.s32.totalorder %s74_s11, %s192_s20  ;;  %p201_p4 = scmp.lt.s32.totalorder %s192_s20, %s192_s20 }
  0x18   : > { %p195_p13 = pnand %p193_p12, %p181_p7  ;;  %p202_p3 = por %p201_p4, %p200_p1 }
  0x1a   : > { %p196_p0 = pneg %p195_p13 }
  0x1c   : > { %p203_p2 = pnand %p202_p3, %p196_p0 }
  0x1e   : > { %206 = shalt.err (!%p203_p2)
}
  0x1f   : > { %164 = dma.hbm_to_vmem [thread:$0]  (!%p283_p5), %s340_s0, 128, %s74_s11, [#allocation3]  }
  0x20   : > { %p348_p6 = scmp.ne.s32.totalorder %s345_s8, 0 }
  0x21   : > { %p349_p8 = scmp.ne.s32.totalorder (!%p348_p6), %s346_s9, 0 }
  0x22   : > { %86 = sbr.rel (%p348_p6) target bundleno = 67 (0x43), region = 24 }
  0x29   : > { %238 = dma.done.wait (%p349_p8), [#allocation3], 128  }
  0x2a   : > { %240 = vsyncadd (%p349_p8), [#allocation3], 4294967168  ;;  %s250_s23 = smov [#allocation5]   ;;  %p311_p2 = scmp.eq.s32.totalorder %s144_s7, 1  ;;  %v96_v0 = vld [vmem:[#allocation2] sm:$0xff] }
  0x2b   : > { %s105_s24 = sshll.u32 %s250_s23, 4  ;;  %97 = vst [vmem:[#allocation5] sm:$0xff] %v96_v0  ;;  %s106_s24 = int_to_ptr.vmem [resolvable:$true] %s105_s24 }
  0x2c   : > { %s207_s26 = scalar_lea.vmem %s106_s24, 128  ;;  %p214_p9 = scmp.lt.s32.totalorder %s106_s24, %s106_s24 }
  0x2d   : > { %p208_p3 = scmp.ne.s32.totalorder %s106_s24, %s207_s26  ;;  %p215_p10 = scmp.lt.s32.totalorder %s207_s26, %s207_s26 }
  0x2f   : > { %p209_p5 = pnand %p208_p3, %p311_p2  ;;  %p216_p11 = por %p215_p10, %p214_p9 }
  0x31   : > { %p210_p7 = pneg %p209_p5 }
  0x33   : > { %p217_p12 = pnand %p216_p11, %p210_p7 }
  0x35   : > { %220 = shalt.err (!%p217_p12)
}
  0x36   : > { %s221_s29 = scalar_lea.hbm %s341_s1, 128 }
  0x37   : > { %p222_p13 = scmp.ne.s32.totalorder %s341_s1, %s221_s29  ;;  %p227_p4 = scmp.lt.u32.totalorder %s221_s29, %s341_s1 }
  0x39   : > { %p223_p0 = pnand %p222_p13, %p311_p2 }
  0x3b   : > { %p224_p1 = pneg %p223_p0 }
  0x3d   : > { %p229_p6 = pnand %p227_p4, %p224_p1 }
  0x3f   : > { %232 = shalt.err (!%p229_p6)
}
  0x40   : > { %158 = dma.vmem_to_hbm [thread:$0]  (%p311_p2), %s106_s24, 128, %s341_s1, [#allocation4]  }
  0x41   : > { %242 = dma.done.wait (%p311_p2), [#allocation4], 128  }
  0x42   : > { %244 = vsyncadd (%p311_p2), [#allocation4], 4294967168 }
  0x43 PF: > { %s13_s6 = sadd.s32 1, %s247_s6  }
  0x44   : > { %p10_p8 = scmp.ge.s32.totalorder %s13_s6, 4  }
  0x46   :  { %12 = sbr.rel (!%p10_p8) target bundleno = 2 (0x2), region = 53 }
  0x4d   :  { %118 = vsyncpa [#allocation3], 1 }
  0x4e   :  { %120 = vsyncpa [#allocation3 + $0x1], 1 }
  0x4f   :  { %121 = vsyncpa [#allocation4], 1 }
  0x50   :  { %123 = vsyncpa [#allocation4 + $0x1], 1 }

// kernel: residual_attention_block_forward.5
= control target key start
LH: loop header
LB: loop body
LE: loop exit
PB: predicated region body
PF: predicated region fallthrough
CT: control target
= control target key end

     0   :  { %s1025_s27 = smov 0   ;;  %s1027_s28 = smov 0   ;;  %s1121_s0 = inlined_call_operand.vmem [shape: bf16[2,1,32], index: 0, kind: input, shape index: {}]   ;;  %s1122_s1 = inlined_call_operand.vmem [shape: bf16[2,1,32], index: 1, kind: input, shape index: {}]   ;;  %s1123_s2 = inlined_call_operand.vmem [shape: bf16[2,8,32], index: 2, kind: input, shape index: {}]   ;;  %s1124_s3 = inlined_call_operand.vmem [shape: bf16[2,8,32], index: 3, kind: input, shape index: {}]   ;;  %s1125_s4 = inlined_call_operand.vmem [shape: bf16[32,128], index: 4, kind: input, shape index: {}]   ;;  %s1126_s5 = inlined_call_operand.vmem [shape: f32[1,128], index: 5, kind: input, shape index: {}]   ;;  %s1127_s6 = inlined_call_operand.vmem [shape: bf16[128,32], index: 6, kind: input, shape index: {}]   ;;  %s1128_s7 = inlined_call_operand.vmem [shape: f32[1,32], index: 7, kind: input, shape index: {}]   ;;  %s1129_s8 = inlined_call_operand.vmem [shape: f32[2,9,32], index: 8, kind: output, shape index: {}]  }
   0x1   :  { %s1029_s29 = smov 0  }
   0x2 LB: > { %s30_s30 = sadd.s32 1, %s972_s28  ;;  %p839_p0 = scmp.ge.s32.totalorder %s976_s29, 1  ;;  %s976_s29 = sphi %s1029_s29, %s18_s29   ;;  %s972_s28 = sphi %s1027_s28, %s1131_s28   ;;  %s968_s27 = sphi %s1025_s27, %s1130_s27  }
   0x3   : > { %p32_p1 = scmp.ge.s32.totalorder %s30_s30, 2  ;;  %p326_p2 = scmp.lt.s32.totalorder %s976_s29, 3 }
   0x5   : > { %s1133_s30 = smov (%p32_p1, %s30_s30), 0  ;;  %p327_p3 = pnand %p839_p0, %p326_p2 }
   0x6   : > { %p381_p4 = scmp.lt.s32.totalorder (!%p327_p3), %s968_s27, 1  ;;  %vm437_vm0 = vcmask (!%p327_p3), 253952   ;;  %vm431_vm1 = vcmask (!%p327_p3), 1040384   ;;  %v846_v11 = vld [vmem:[%s1128_s7] ss:$0 sm:$0xff] (!%p327_p3)  ;;  %vm433_vm2 = vcmask (!%p327_p3), 261120  }
   0x7   : > { %330 = sbr.rel (%p327_p3) target bundleno = 821 (0x335), region = 52  ;;  %v931_v27 = vld [vmem:[%s1125_s4] sm:$0xff] (!%p327_p3)   ;;  %v978_v28 = vmov (!%p327_p3), 0.0   ;;  %vm979_vm3 = vmmov (!%p327_p3), 0   ;;  %v932_v29 = vld [vmem:[%s1125_s4 + $0x8] sm:$0xff] (!%p327_p3)   ;;  %vm470_vm6 = vcmask (!%p327_p3), 257024  }
   0x8   : > { %877 = vmatprep.subr.bf16.mxu0 (!%p327_p3), %v978_v28  ;;  %881 = vmatprep.mubr.msk.bf16.mxu0 (!%p327_p3), %vm979_vm3, %v978_v28  ;;  %vm473_vm4 = vsmask.f32 (!%p327_p3), 256  ;;  %v475_v38 = vld [vmem:[#allocation2 + $0x4] sm:$0x1] (!%p327_p3)  ;;  %v935_v46 = vld [vmem:[%s1127_s6 + $0x8] sm:$0xff] (!%p327_p3)   ;;  %v936_v47 = vld [vmem:[%s1127_s6 + $0x10] sm:$0xff] (!%p327_p3)  }
   0x9   : > { %878 = vmatpush3.bf16.msra.mxu0 (!%p327_p3), %v931_v27  ;;  %885 = vmatprep.subr.bf16.mxu1 (!%p327_p3), %v978_v28  ;;  %vm474_vm5 = vmand (!%p327_p3), %vm437_vm0, %vm473_vm4  ;;  %v934_v45 = vld [vmem:[%s1127_s6] sm:$0xff] (!%p327_p3)   ;;  %v937_v48 = vld [vmem:[%s1127_s6 + $0x18] sm:$0xff] (!%p327_p3)  }
   0xa   : > { %879 = vmatprep.subr.bf16.mxu0 (!%p327_p3), %v978_v28  ;;  %901 = vmatprep.mubr.msk.bf16.mxu1 (!%p327_p3), %vm979_vm3, %v978_v28  ;;  %v938_v49 = vld [vmem:[%s1127_s6 + $0x20] sm:$0xff] (!%p327_p3)   ;;  %v939_v50 = vld [vmem:[%s1127_s6 + $0x28] sm:$0xff] (!%p327_p3)   ;;  %v940_v51 = vld [vmem:[%s1127_s6 + $0x30] sm:$0xff] (!%p327_p3)  }
   0xb   : > { %886 = vmatpush3.bf16.msra.mxu1 (!%p327_p3), %v934_v45  ;;  %v941_v52 = vld [vmem:[%s1127_s6 + $0x38] sm:$0xff] (!%p327_p3)   ;;  %v847_v53 = vld [vmem:[%s1126_s5] ss:$0 sm:$0xff] (!%p327_p3) }
   0xc   : > { %887 = vmatprep.subr.bf16.mxu1 (!%p327_p3), %v978_v28 }
   0xd   : > { %880 = vmatpush3.bf16.msra.mxu0 (!%p327_p3), %v932_v29 }
   0xe   : > { %s1135_s27 = smov (!%p381_p4, %s968_s27), 1 }
   0xf   : > { %s840_s9 = sshll.u32 %s1135_s27, 2  ;;  %s383_s18 = scalar_lea.vmem %s1121_s0, %s1135_s27  ;;  %888 = vmatpush3.bf16.msra.mxu1 %v935_v46 }
  0x10   : > { %s390_s12 = scalar_lea.vmem %s1123_s2, %s840_s9  ;;  %s394_s15 = scalar_lea.vmem %s1124_s3, %s840_s9  ;;  %v418_v4 = vld [vmem:[%s383_s18] sm:$0x1]  ;;  %889 = vmatprep.subr.bf16.mxu1 %v978_v28 }
  0x11   : > { %v423_v0 = vld [vmem:[%s390_s12] sm:$0xf]  ;;  %s386_s21 = scalar_lea.vmem %s1122_s1, %s1135_s27  ;;  %v419_v5 = vunpack.c.l.bf16 %v418_v4  ;;  %s862_s10 = sshll.u32 %s1135_s27, 4 }
  0x12   : > { %v425_v1 = vld [vmem:[%s394_s15] sm:$0xf]  ;;  %v424_v2 = vunpack.c.l.bf16 %v423_v0  ;;  %s412_s13 = scalar_lea.vmem %s1129_s8, %s862_s10 }
  0x13   : > { %v426_v3 = vunpack.c.l.bf16 %v425_v1  ;;  %v420_v6 = vld [vmem:[%s386_s21] sm:$0x1]  ;;  %890 = vmatpush3.bf16.msra.mxu1 %v936_v47 }
  0x14   : > { %v421_v8 = vunpack.c.l.bf16 %v420_v6  ;;  %891 = vmatprep.subr.bf16.mxu1 %v978_v28 }
  0x15   : > { %v427_v7 = vadd.f32 %v426_v3, %v424_v2 }
  0x16   : > { %v422_v10 = vadd.f32 %v421_v8, %v419_v5 }
  0x17   : > { %v429_v9 = vrot.slane %v427_v7, 7  ;;  %892 = vmatpush3.bf16.msra.mxu1 %v937_v48 }
  0x18   : > { %893 = vmatprep.subr.bf16.mxu1 %v978_v28 }
  0x19   : > { %v438_v12 = vsel %vm437_vm0, %v429_v9, 0.0  ;;  %v432_v13 = vsel %vm431_vm1, %v422_v10, %v429_v9  ;;  %v486_v14 = vadd.f32 %v846_v11, %v429_v9 }
  0x1a   : > { %439 = vadd.xlane.f32.xlu0 %v438_v12  ;;  %v485_v15 = vadd.f32 %v846_v11, %v432_v13  ;;  %v434_v16 = vsel %vm433_vm2, %v432_v13, 0.0 }
  0x1b   : > { %488 = vst.msk [vmem:[#allocation3 + $0x8] sm:$0x1] %vm437_vm0, %v486_v14  ;;  %894 = vmatpush3.bf16.msra.mxu1 %v938_v49 }
  0x1c   : > { %487 = vst.msk [vmem:[#allocation3] sm:$0xff] %vm433_vm2, %v485_v15  ;;  %895 = vmatprep.subr.bf16.mxu1 %v978_v28 }
  0x1e   : > { %435 = vadd.xlane.f32.xlu0 %v434_v16 }
  0x1f   : > { %896 = vmatpush3.bf16.msra.mxu1 %v939_v50 }
  0x20   : > { %897 = vmatprep.subr.bf16.mxu1 %v978_v28 }
  0x22   : > { %v577_v11 = vld [vmem:[#allocation3 + $0x8] sm:$0x1] }
  0x23   : > { %898 = vmatpush3.bf16.msra.mxu1 %v940_v51 }
  0x24   : > { %899 = vmatprep.subr.bf16.mxu1 %v978_v28 }
  0x27   : > { %900 = vmatpush3.bf16.msra.mxu1 %v941_v52 }
  0xa7   : > { %v440_v17 = vpop.xlane.xlu0 %439 }
  0xa8   : > { %v443_v18 = vmul.f32 0.03125, %v440_v17 }
  0xaa   : > { %v445_v19 = vsub.f32 %v429_v9, %v443_v18  ;;  %v576_v9 = vld [vmem:[#allocation3] sm:$0xff] }
  0xab   : > { %v436_v20 = vpop.xlane.xlu0 %435 }
  0xac   : > { %v442_v21 = vmul.f32 0.03125, %v436_v20  ;;  %v447_v22 = vmul.f32 %v445_v19, %v445_v19 }
  0xae   : > { %v444_v23 = vsub.f32 %v432_v13, %v442_v21  ;;  %v451_v24 = vsel %vm437_vm0, %v447_v22, 0.0 }
  0xaf   : > { %452 = vadd.xlane.f32.xlu1 %v451_v24 }
  0xb0   : > { %v446_v25 = vmul.f32 %v444_v23, %v444_v23 }
  0xb2   : > { %v448_v26 = vsel %vm433_vm2, %v446_v25, 0.0 }
  0xb3   : > { %449 = vadd.xlane.f32.xlu1 %v448_v26 }
 0x13c   : > { %v453_v30 = vpop.xlane.xlu1 %452 }
 0x13d   : > { %v455_v31 = vmul.f32 0.03125, %v453_v30 }
 0x13f   : > { %v457_v32 = vadd.f32 1e-05, %v455_v31 }
 0x140   : > { %v450_v33 = vpop.xlane.xlu1 %449 }
 0x141   : > { %942 = vrsqrt.f32 %v457_v32  ;;  %v454_v34 = vmul.f32 0.03125, %v450_v33 }
 0x143   : > { %v456_v35 = vadd.f32 1e-05, %v454_v34 }
 0x145   : > { %944 = vrsqrt.f32 %v456_v35 }
 0x14b   : > { %v943_v36 = vpop.eup %942 }
 0x14c   : > { %v461_v37 = vmul.f32 %v943_v36, %v445_v19 }
 0x14e   : > { %v864_v39 = vpack.c.bf16 %v461_v37, %v461_v37 }
 0x14f   : > { %v945_v40 = vpop.eup %944 }
 0x150   : > { %v476_v41 = vsel %vm474_vm5, %v864_v39, %v475_v38  ;;  %v460_v42 = vmul.f32 %v945_v40, %v444_v23 }
 0x151   : > { %477 = vst [vmem:[#allocation2 + $0x4] sm:$0x1] %v476_v41 }
 0x152   : > { %v863_v43 = vpack.c.bf16 %v460_v42, %v460_v42 }
 0x154   : > { %471 = vst.msk [vmem:[#allocation2] sm:$0xf] %vm470_vm6, %v863_v43 }
 0x15b   : > { %v933_v44 = vld [vmem:[#allocation2] sm:$0x1f]  }
 0x15c   : > { %882 = vmatmul.mubr.msk.bf16.vlgmr.msra.gmra.mrb[0].mxu0 %vm433_vm2, %v933_v44 }
 0x22f   : > { %v557_v54 = vpop.f32.mrb[0].mxu0 }
 0x230   : > { %v558_v55 = vadd.f32 %v847_v53, %v557_v54  ;;  %v883_v56 = vpop.f32.mrb[1].mxu0 }
 0x231   : > { %v560_v57 = vpop.f32.mrb[2].mxu0 }
 0x232   : > { %v564_v58 = vmul.f32 -1.702, %v558_v55  ;;  %v561_v59 = vadd.f32 %v847_v53, %v560_v57  ;;  %v884_v60 = vpop.f32.mrb[3].mxu0 }
 0x234   : > { %v566_v61 = vmul.f32 1.442695, %v564_v58  ;;  %v565_v62 = vmul.f32 -1.702, %v561_v59 }
 0x236   : > { %946 = vpow2.f32 %v566_v61  ;;  %v568_v63 = vmul.f32 1.442695, %v565_v62 }
 0x238   : > { %948 = vpow2.f32 %v568_v63 }
 0x240   : > { %v947_v0 = vpop.eup %946 }
 0x241   : > { %v570_v1 = vadd.f32 1.0, %v947_v0 }
 0x242   : > { %v949_v2 = vpop.eup %948 }
 0x243   : > { %950 = vrcp.f32 %v570_v1  ;;  %v571_v3 = vadd.f32 1.0, %v949_v2 }
 0x245   : > { %952 = vrcp.f32 %v571_v3 }
 0x24d   : > { %v951_v4 = vpop.eup %950 }
 0x24e   : > { %v574_v6 = vmul.f32 %v951_v4, %v558_v55 }
 0x24f   : > { %v953_v5 = vpop.eup %952 }
 0x250   : > { %v575_v7 = vmul.f32 %v953_v5, %v561_v59 }
 0x252   : > { %v578_v8 = vpack.c.bf16 %v575_v7, %v574_v6 }
 0x254   : > { %902 = vmatmul.mubr.bf16.vlgmr.msra.gmra.mrb[0].mxu1 %v578_v8 }
 0x327   : > { %v677_v10 = vpop.f32.mrb[0].mxu1 }
 0x328   : > { %v684_v12 = vadd.f32 %v677_v10, %v576_v9  ;;  %v903_v13 = vpop.f32.mrb[1].mxu1 }
 0x329   : > { %v680_v14 = vpop.f32.mrb[2].mxu1 }
 0x32a   : > { %686 = vst.msk [vmem:[#allocation3] sm:$0xff] %vm433_vm2, %v684_v12  ;;  %v685_v15 = vadd.f32 %v680_v14, %v577_v11  ;;  %v904_v16 = vpop.f32.mrb[3].mxu1 }
 0x32c   : > { %688 = vst.msk [vmem:[#allocation3 + $0x8] sm:$0x1] %vm437_vm0, %v685_v15 }
 0x331   : > { %v692_v17 = vld [vmem:[#allocation3] sm:$0xff] }
 0x332   : > { %694 = vst.msk [vmem:[%s412_s13] sm:$0xff] %vm433_vm2, %v692_v17 }
 0x333   : > { %v693_v18 = vld [vmem:[#allocation3 + $0x8] sm:$0x1] }
 0x334   : > { %695 = vst.msk [vmem:[%s412_s13 + $0x8] sm:$0x1] %vm437_vm0, %v693_v18 }
 0x335 PF: > { %s18_s29 = sadd.s32 1, %s976_s29   ;;  %s1130_s27 = smov %s972_s28 }
 0x336   : > { %p15_p5 = scmp.ge.s32.totalorder %s18_s29, 4   ;;  %s1131_s28 = smov %s1133_s30 }
 0x338   :  { %17 = sbr.rel (!%p15_p5) target bundleno = 2 (0x2), region = 108 }

// kernel: residual_attention_block_forward.4
= control target key start
LH: loop header
LB: loop body
LE: loop exit
PB: predicated region body
PF: predicated region fallthrough
CT: control target
= control target key end

     0   :  { %s3221_s21 = smov 0   ;;  %s3666_s0 = inlined_call_operand.vmem [shape: bf16[4,1,32], index: 0, kind: input, shape index: {}]   ;;  %s3667_s1 = inlined_call_operand.vmem [shape: bf16[4,4,32], index: 1, kind: input, shape index: {}]   ;;  %s3668_s2 = inlined_call_operand.vmem [shape: bf16[32,96], index: 2, kind: input, shape index: {}]   ;;  %s3669_s3 = inlined_call_operand.vmem [shape: f32[1,96], index: 3, kind: input, shape index: {}]   ;;  %s3670_s4 = inlined_call_operand.vmem [shape: bf16[4,8,32], index: 4, kind: input, shape index: {}]   ;;  %s3671_s5 = inlined_call_operand.vmem [shape: f32[1,32], index: 5, kind: input, shape index: {}]   ;;  %s3672_s6 = inlined_call_operand.vmem [shape: bf16[4,5,32], index: 6, kind: output, shape index: {}]  }
   0x1 LB: > { %s2866_s22 = sadd.s32 4294967295, %s3169_s21   ;;  %p2870_p0 = scmp.ge.s32.totalorder %s3169_s21, 1  ;;  %s3169_s21 = sphi %s3221_s21, %s16_s21  }
   0x2   : > { %p223_p1 = scmp.lt.s32.totalorder %s3169_s21, 3 }
   0x4   : > { %p224_p2 = pnand %p2870_p0, %p223_p1 }
   0x5   : > { %s2871_s23 = sshll.u32 (!%p224_p2), %s2866_s22, 1  ;;  %v3171_v0 = vmov (!%p224_p2), 1966171168   ;;  %v324_v2 = vlaneseq (!%p224_p2)  ;;  %vm311_vm0 = vcmask (!%p224_p2), 1040384   ;;  %vm312_vm1 = vsmask.f32 (!%p224_p2), 256 }
   0x6   : > { %227 = sbr.rel (%p224_p2) target bundleno = 3585 (0xe01), region = 44  ;;  %p258_p3 = scmp.lt.s32.totalorder (!%p224_p2), %s2871_s23, 3  ;;  %v322_v1 = vunpack.c.l.s4 (!%p224_p2), %v3171_v0  ;;  %vm313_vm2 = vmand (!%p224_p2), %vm311_vm0, %vm312_vm1  ;;  %vm474_vm3 = vcmask (!%p224_p2), 261120   ;;  %vm478_vm4 = vcmask (!%p224_p2), 254976   ;;  %vm3173_vm5 = vmmov (!%p224_p2), 0  }
   0x7   : > { %v3239_v10 = vshrl.u32 (!%p224_p2), %v324_v2, 7  ;;  %s3174_s13 = smov (!%p224_p2), 96   ;;  %vm938_vm6 = vcmask (!%p224_p2), 64512   ;;  %vm1059_vm7 = vcmask (!%p224_p2), 36864   ;;  %s3175_s14 = smov (!%p224_p2), 64   ;;  %vm1090_vm8 = vcmask (!%p224_p2), 1041408  }
   0x8   : > { %v323_v9 = vunpack.c.0.s8 (!%p224_p2), %v322_v1  ;;  %s3176_s15 = smov (!%p224_p2), 88   ;;  %s3177_s16 = smov (!%p224_p2), 120   ;;  %vm1091_vm9 = vcmask (!%p224_p2), 1042432   ;;  %vm1086_vm10 = vcmask (!%p224_p2), 39936   ;;  %vm1336_vm11 = vcmask (!%p224_p2), 1043456  }
   0x9   : > { %v3265_v56 = vsub.s32 (!%p224_p2), 0, %v3239_v10  ;;  %v3268_v57 = vsub.s32 (!%p224_p2), 1, %v3239_v10  ;;  %v497_v58 = vsub.s32 (!%p224_p2), 2, %v3239_v10  ;;  %v501_v59 = vsub.s32 (!%p224_p2), 3, %v3239_v10  ;;  %s3179_s19 = smov (!%p224_p2), 56   ;;  %s3180_s20 = smov (!%p224_p2), 112  }
   0xa   : > { %v3242_v17 = vsub.s32 (!%p224_p2), %v323_v9, %v3239_v10  ;;  %v505_v61 = vsub.s32 (!%p224_p2), 4, %v3239_v10  ;;  %v509_v62 = vsub.s32 (!%p224_p2), 5, %v3239_v10  ;;  %v513_v63 = vsub.s32 (!%p224_p2), 6, %v3239_v10  ;;  %s3181_s22 = smov (!%p224_p2), 80   ;;  %s3183_s25 = smov (!%p224_p2), 72  }
   0xb   : > { %v517_v0 = vsub.s32 (!%p224_p2), 7, %v3239_v10  ;;  %s3184_s26 = smov (!%p224_p2), 104   ;;  %s3185_s7 = smov (!%p224_p2), 40   ;;  %vm2792_vm12 = vcmask (!%p224_p2), 256000   ;;  %vm2793_vm13 = vsmask.f32 (!%p224_p2), 2304 }
   0xc   : > { %vm2794_vm14 = vmand (!%p224_p2), %vm2792_vm12, %vm2793_vm13 }
   0xd   : > { %s3674_s23 = smov (!%p258_p3, %s2871_s23), 3 }
   0xe   : > { %s2873_s24 = sshll.u32 %s3674_s23, 1  ;;  %s260_s30 = scalar_lea.vmem %s3666_s0, %s3674_s23 }
   0xf   : > { %s266_s27 = scalar_lea.vmem %s3667_s1, %s2873_s24  ;;  %v275_v12 = vld [vmem:[%s260_s30] sm:$0x1]  ;;  %v276_v14 = vld [vmem:[%s260_s30 + $0x1] sm:$0x1]  ;;  %s3182_s24 = smov 48  }
  0x10   : > { %v2876_v3 = vld.sshfl [vmem:[%s266_s27] sm:$0x3 pattern:$0x76325410]  ;;  %s2875_s12 = sshll.u32 %s3674_s23, 2 }
  0x11   : > { %v2877_v4 = vld.sshfl [vmem:[%s266_s27 + $0x2] sm:$0x3 pattern:$0x76325410]  ;;  %v296_v5 = vshrl.u32 %v2876_v3, 16  ;;  %v299_v6 = vshll.u32 %v2876_v3, 16 }
  0x12   : > { %v303_v7 = vshrl.u32 %v2877_v4, 16  ;;  %v306_v8 = vshll.u32 %v2877_v4, 16 }
  0x13   : > { %v298_v11 = vrot.slane %v296_v5, 7 }
  0x14   : > { %v305_v13 = vrot.slane %v303_v7, 7 }
  0x15   : > { %v301_v15 = vor.u32 %v299_v6, %v298_v11 }
  0x16   : > { %v308_v16 = vor.u32 %v306_v8, %v305_v13 }
  0x17   : > { %v314_v18 = vsel %vm313_vm2, %v275_v12, %v301_v15 }
  0x18   : > { %v315_v19 = vsel %vm313_vm2, %v276_v14, %v308_v16  ;;  %v316_v20 = vunpack.c.l.bf16 %v314_v18 }
  0x19   : > { %v317_v21 = vunpack.c.l.bf16 %v315_v19 }
  0x1a   : > { %v320_v22 = vcombine.high %v316_v20, %v316_v20  ;;  %v327_v23 = vrot.slane %v316_v20, %v3242_v17 }
  0x1b   : > { %v366_v24 = vrot.slane %v317_v21, %v3242_v17  ;;  %v359_v25 = vcombine.high %v317_v21, %v317_v21 }
  0x1c   : > { %v334_v26 = vrot.slane %v320_v22, %v3242_v17  ;;  %v335_v27 = vcombine.high %v327_v23, %v327_v23  ;;  %v342_v28 = vrot.slane %v327_v23, %v3242_v17 }
  0x1d   : > { %v374_v29 = vcombine.high %v366_v24, %v366_v24  ;;  %v381_v30 = vrot.slane %v366_v24, %v3242_v17  ;;  %v373_v31 = vrot.slane %v359_v25, %v3242_v17 }
  0x1e   : > { %v349_v32 = vrot.slane %v334_v26, %v3242_v17  ;;  %v356_v33 = vrot.slane %v335_v27, %v3242_v17  ;;  %v357_v2 = vcombine.high %v342_v28, %v342_v28 }
  0x1f   : > { %v395_v34 = vrot.slane %v374_v29, %v3242_v17  ;;  %v396_v35 = vcombine.high %v381_v30, %v381_v30  ;;  %v388_v36 = vrot.slane %v373_v31, %v3242_v17 }
  0x20   : > { %v408_v37 = vcombine.low %v342_v28, %v356_v33  ;;  %v2878_v38 = vcombine.high %v342_v28, %v356_v33  ;;  %v410_v39 = vcombine.low %v349_v32, %v381_v30  ;;  %v358_v3 = vcombine.high %v356_v33, %v356_v33 }
  0x21   : > { %v411_v40 = vcombine.low %v395_v34, %v396_v35  ;;  %v397_v41 = vcombine.high %v395_v34, %v395_v34 }
  0x22   : > { %v418_v42 = vrot.slane %v408_v37, %v3242_v17  ;;  %v425_v43 = vrot.slane %v2878_v38, %v3242_v17  ;;  %v432_v44 = vrot.slane %v410_v39, %v3242_v17 }
  0x23   : > { %v439_v45 = vrot.slane %v411_v40, %v3242_v17  ;;  %v457_v46 = vcombine.low %v397_v41, %v388_v36 }
  0x24   : > { %v440_v47 = vcombine.low %v418_v42, %v425_v43 }
  0x25   : > { %v441_v48 = vcombine.low %v432_v44, %v439_v45  ;;  %v464_v49 = vrot.slane %v457_v46, %v3242_v17 }
  0x26   : > { %v448_v50 = vrot.slane %v440_v47, %v3242_v17 }
  0x27   : > { %v455_v51 = vrot.slane %v441_v48, %v3242_v17  ;;  %v471_v53 = vrot.slane %v464_v49, %v3242_v17 }
  0x29   : > { %v456_v52 = vcombine.low %v448_v50, %v455_v51  ;;  %v479_v55 = vsel %vm478_vm4, %v471_v53, 0.0 }
  0x2b   : > { %v475_v54 = vsel %vm474_vm3, %v456_v52, 0.0 }
  0x2c   : > { %476 = vadd.xlane.f32.xlu0 %v475_v54 }
  0x30   : > { %480 = vadd.xlane.f32.xlu0 %v479_v55 }
  0xb9   : > { %v477_v60 = vpop.xlane.xlu0 %476 }
  0xba   : > { %v483_v1 = vmul.f32 0.03125, %v477_v60  ;;  %v3125_v60 = vld [vmem:[%s3668_s2] sm:$0xff]  }
  0xbc   : > { %v490_v4 = vrot.slane %v483_v1, %v3265_v56  ;;  %v494_v5 = vrot.slane %v483_v1, %v3268_v57  ;;  %v498_v6 = vrot.slane %v483_v1, %v497_v58  ;;  %v502_v7 = vrot.slane %v483_v1, %v501_v59 }
  0xbd   : > { %v481_v8 = vpop.xlane.xlu0 %480  ;;  %v506_v9 = vrot.slane %v483_v1, %v505_v61  ;;  %v510_v11 = vrot.slane %v483_v1, %v509_v62  ;;  %v514_v12 = vrot.slane %v483_v1, %v513_v63  ;;  %v518_v13 = vrot.slane %v483_v1, %v517_v0 }
  0xbe   : > { %v484_v14 = vmul.f32 0.03125, %v481_v8  ;;  %v3290_v15 = vsub.f32 %v342_v28, %v490_v4  ;;  %v3292_v16 = vsub.f32 %v356_v33, %v494_v5  ;;  %v3294_v18 = vsub.f32 %v357_v2, %v498_v6  ;;  %v3126_v2 = vld [vmem:[%s3668_s2 + $0x8] sm:$0xff]  }
  0xbf   : > { %v3296_v19 = vsub.f32 %v358_v3, %v502_v7  ;;  %v3298_v20 = vsub.f32 %v349_v32, %v506_v9  ;;  %v3300_v21 = vsub.f32 %v381_v30, %v510_v11  ;;  %v3302_v22 = vsub.f32 %v395_v34, %v514_v12 }
  0xc0   : > { %v522_v23 = vrot.slane %v484_v14, %v3265_v56  ;;  %v526_v24 = vrot.slane %v484_v14, %v3268_v57  ;;  %v3306_v25 = vsub.f32 %v396_v35, %v518_v13  ;;  %v547_v26 = vmul.f32 %v3290_v15, %v3290_v15 }
  0xc1   : > { %v548_v27 = vmul.f32 %v3292_v16, %v3292_v16  ;;  %v549_v28 = vmul.f32 %v3294_v18, %v3294_v18  ;;  %v550_v29 = vmul.f32 %v3296_v19, %v3296_v19  ;;  %v551_v30 = vmul.f32 %v3298_v20, %v3298_v20 }
  0xc2   : > { %v3318_v31 = vsub.f32 %v397_v41, %v522_v23  ;;  %v3320_v32 = vsub.f32 %v388_v36, %v526_v24  ;;  %v552_v33 = vmul.f32 %v3300_v21, %v3300_v21  ;;  %v553_v34 = vmul.f32 %v3302_v22, %v3302_v22 }
  0xc3   : > { %v554_v35 = vmul.f32 %v3306_v25, %v3306_v25  ;;  %v567_v37 = vcombine.low %v547_v26, %v548_v27  ;;  %v568_v38 = vcombine.low %v549_v28, %v550_v29  ;;  %v3172_v1 = vmov 0.0  }
  0xc4   : > { %v555_v39 = vmul.f32 %v3318_v31, %v3318_v31  ;;  %v556_v40 = vmul.f32 %v3320_v32, %v3320_v32  ;;  %v569_v41 = vcombine.low %v551_v30, %v552_v33  ;;  %2960 = vmatprep.subr.bf16.mxu0 %v3172_v1  ;;  %2964 = vmatprep.mubr.msk.bf16.mxu0 %vm3173_vm5, %v3172_v1 }
  0xc5   : > { %v570_v36 = vcombine.low %v553_v34, %v554_v35  ;;  %v577_v42 = vrot.slane %v567_v37, %v3242_v17  ;;  %v584_v43 = vrot.slane %v568_v38, %v3242_v17  ;;  %2961 = vmatpush3.bf16.msra.mxu0 %v3125_v60  ;;  %2968 = vmatprep.subr.bf16.mxu1 %v3172_v1 }
  0xc6   : > { %v591_v44 = vrot.slane %v569_v41, %v3242_v17  ;;  %v616_v45 = vcombine.low %v555_v39, %v556_v40  ;;  %2962 = vmatprep.subr.bf16.mxu0 %v3172_v1  ;;  %2970 = vmatprep.mubr.msk.bf16.mxu1 %vm3173_vm5, %v3172_v1 }
  0xc7   : > { %v598_v46 = vrot.slane %v570_v36, %v3242_v17  ;;  %v599_v47 = vcombine.low %v577_v42, %v584_v43  ;;  %v2879_v36 = vld [vmem:[%s3669_s3] ss:$0 sm:$0xff] }
  0xc8   : > { %v623_v50 = vrot.slane %v616_v45, %v3242_v17 }
  0xc9   : > { %v600_v48 = vcombine.low %v591_v44, %v598_v46  ;;  %v607_v49 = vrot.slane %v599_v47, %v3242_v17  ;;  %2963 = vmatpush3.bf16.msra.mxu0 %v3126_v2 }
  0xca   : > { %v630_v53 = vrot.slane %v623_v50, %v3242_v17  ;;  %2974 = vmatprep.subr.bf16.mxu0 %v3172_v1 }
  0xcb   : > { %v614_v51 = vrot.slane %v600_v48, %v3242_v17 }
  0xcc   : > { %v636_v55 = vsel %vm478_vm4, %v630_v53, 0.0 }
  0xcd   : > { %v615_v52 = vcombine.low %v607_v49, %v614_v51 }
  0xcf   : > { %v633_v54 = vsel %vm474_vm3, %v615_v52, 0.0 }
  0xd0   : > { %634 = vadd.xlane.f32.xlu1 %v633_v54 }
  0xd4   : > { %637 = vadd.xlane.f32.xlu1 %v636_v55 }
 0x15d   : > { %v635_v3 = vpop.xlane.xlu1 %634 }
 0x15e   : > { %v639_v4 = vmul.f32 0.03125, %v635_v3 }
 0x160   : > { %v641_v5 = vadd.f32 1e-05, %v639_v4 }
 0x161   : > { %v638_v6 = vpop.xlane.xlu1 %637 }
 0x162   : > { %3127 = vrsqrt.f32 %v641_v5  ;;  %v640_v7 = vmul.f32 0.03125, %v638_v6 }
 0x164   : > { %v642_v8 = vadd.f32 1e-05, %v640_v7 }
 0x166   : > { %3129 = vrsqrt.f32 %v642_v8 }
 0x16c   : > { %v3128_v9 = vpop.eup %3127 }
 0x16d   : > { %v650_v11 = vrot.slane %v3128_v9, %v3265_v56  ;;  %v654_v12 = vrot.slane %v3128_v9, %v3268_v57  ;;  %v658_v13 = vrot.slane %v3128_v9, %v497_v58  ;;  %v662_v14 = vrot.slane %v3128_v9, %v501_v59 }
 0x16e   : > { %v666_v23 = vrot.slane %v3128_v9, %v505_v61  ;;  %v670_v24 = vrot.slane %v3128_v9, %v509_v62  ;;  %v674_v26 = vrot.slane %v3128_v9, %v513_v63  ;;  %v678_v27 = vrot.slane %v3128_v9, %v517_v0 }
 0x16f   : > { %v697_v28 = vmul.f32 %v650_v11, %v3290_v15  ;;  %v698_v29 = vmul.f32 %v654_v12, %v3292_v16  ;;  %v699_v58 = vmul.f32 %v658_v13, %v3294_v18  ;;  %v700_v59 = vmul.f32 %v662_v14, %v3296_v19 }
 0x170   : > { %v3130_v30 = vpop.eup %3129  ;;  %v701_v61 = vmul.f32 %v666_v23, %v3298_v20  ;;  %v702_v33 = vmul.f32 %v670_v24, %v3300_v21  ;;  %v703_v62 = vmul.f32 %v674_v26, %v3302_v22  ;;  %v704_v63 = vmul.f32 %v678_v27, %v3306_v25 }
 0x171   : > { %v682_v10 = vrot.slane %v3130_v30, %v3265_v56  ;;  %v686_v0 = vrot.slane %v3130_v30, %v3268_v57  ;;  %v717_v15 = vcombine.low %v697_v28, %v698_v29  ;;  %v718_v34 = vcombine.low %v699_v58, %v700_v59 }
 0x172   : > { %v719_v16 = vcombine.low %v701_v61, %v702_v33  ;;  %v720_v35 = vcombine.low %v703_v62, %v704_v63 }
 0x173   : > { %v705_v18 = vmul.f32 %v682_v10, %v3318_v31  ;;  %v706_v19 = vmul.f32 %v686_v0, %v3320_v32  ;;  %v727_v20 = vrot.slane %v717_v15, %v3242_v17  ;;  %v734_v21 = vrot.slane %v718_v34, %v3242_v17 }
 0x174   : > { %v741_v22 = vrot.slane %v719_v16, %v3242_v17  ;;  %v748_v25 = vrot.slane %v720_v35, %v3242_v17 }
 0x175   : > { %v749_v37 = vcombine.low %v727_v20, %v734_v21  ;;  %v766_v56 = vcombine.low %v705_v18, %v706_v19 }
 0x176   : > { %v750_v38 = vcombine.low %v741_v22, %v748_v25 }
 0x177   : > { %v757_v57 = vrot.slane %v749_v37, %v3242_v17  ;;  %v773_v39 = vrot.slane %v766_v56, %v3242_v17 }
 0x178   : > { %v764_v40 = vrot.slane %v750_v38, %v3242_v17 }
 0x179   : > { %v780_v31 = vrot.slane %v773_v39, %v3242_v17  ;;  %v3178_v39 = vmov 65535  }
 0x17a   : > { %v765_v32 = vcombine.low %v757_v57, %v764_v40  ;;  %v1092_v40 = vsel %vm1090_vm8, 4294967295, %v3178_v39 }
 0x17c   : > { %v783_v41 = vpack.c.bf16 %v780_v31, %v765_v32  ;;  %v3435_v32 = vsel %vm1091_vm9, %v1092_v40, 0 }
 0x17e   : > { %2965 = vmatmul.mubr.msk.bf16.vlgmr.msra.gmra.mrb[0].mxu0 %vm474_vm3, %v783_v41 }
 0x17f   : > { %2976 = vmatprep.mubr.msk.bf16.mxu0 %vm3173_vm5, %v3172_v1 }
 0x251   : > { %v844_v42 = vpop.f32.mrb[0].mxu0 }
 0x252   : > { %v2966_v43 = vpop.f32.mrb[1].mxu0  ;;  %v845_v45 = vadd.f32 %v2879_v36, %v844_v42 }
 0x253   : > { %v847_v44 = vpop.f32.mrb[2].mxu0 }
 0x254   : > { %v848_v46 = vadd.f32 %v2879_v36, %v847_v44  ;;  %v2967_v47 = vpop.f32.mrb[3].mxu0 }
 0x256   : > { %v851_v48 = vpack.c.bf16 %v848_v46, %v845_v45  ;;  %v2884_v49 = vpack.c.bf16 %v848_v46, %v848_v46 }
 0x258   : > { %v868_v50 = vrot.slane %v851_v48, %v3242_v17  ;;  %v875_v51 = vrot.slane %v2884_v49, %v3242_v17 }
 0x25a   : > { %v876_v52 = vcombine.high %v868_v50, %v868_v50  ;;  %v883_v53 = vrot.slane %v868_v50, %v3242_v17  ;;  %v890_v60 = vrot.slane %v875_v51, %v3242_v17 }
 0x25c   : > { %v897_v54 = vrot.slane %v876_v52, %v3242_v17  ;;  %v898_v55 = vcombine.high %v883_v53, %v883_v53  ;;  %v909_v9 = vunpack.i.h.s16 %v890_v60 }
 0x25e   : > { %v899_v2 = vcombine.high %v897_v54, %v897_v54  ;;  %v904_v3 = vunpack.i.l.s16 %v898_v55  ;;  %v905_v4 = vunpack.i.h.s16 %v898_v55  ;;  %v913_v5 = vcombine.low %v883_v53, %v897_v54  ;;  %v1332_v54 = vld [vmem:[%s3670_s4] sm:$0xf] }
 0x25f   : > { %v1002_v26 = vrot.slane %v909_v9, %v3242_v17  ;;  %v1338_v55 = vsel %vm1336_vm11, %v1332_v54, 0 }
 0x260   : > { %v907_v6 = vunpack.i.h.s16 %v899_v2  ;;  %v920_v7 = vrot.slane %v913_v5, %v3242_v17  ;;  %v927_v8 = vrot.slane %v904_v3, %v3242_v17  ;;  %v2886_v12 = vpack.i.b16 %v899_v2, %v905_v4 }
 0x262   : > { %v928_v11 = vcombine.low %v920_v7, %v927_v8  ;;  %v2887_v13 = vpack.i.b16 %v890_v60, %v907_v6 }
 0x264   : > { %v3404_v14 = vrot.slane %v928_v11, %v3242_v17  ;;  %v988_v23 = vcombine.low %v2886_v12, %v2887_v13 }
 0x266   : > { %v995_v24 = vrot.slane %v988_v23, %v3242_v17  ;;  %936 = vrot.lane.b32.xlu0 %v3404_v14, %s3174_s13 }
 0x268   : > { %v1003_v27 = vcombine.low %v995_v24, %v1002_v26 }
 0x26a   : > { %v3410_v28 = vrot.slane %v1003_v27, %v3242_v17 }
 0x26c   : > { %1011 = vrot.lane.b32.xlu1 %v3410_v28, %s3174_s13 }
 0x2d8   : > { %v937_v29 = vpop.permute.xlu0 %936 }
 0x2d9   : > { %v943_v58 = vsel %vm938_vm6, %v937_v29, 0 }
 0x2da   : > { %2969 = vmatpush3.bf16.xpose.msra.mxu1 %v943_v58 }
 0x2db   : > { %2980 = vmatprep.subr.bf16.mxu1 %v3172_v1 }
 0x2de   : > { %v1012_v59 = vpop.permute.xlu1 %1011 }
 0x2df   : > { %v1017_v30 = vsel %vm938_vm6, %v1012_v59, 0 }
 0x2e0   : > { %2975 = vmatpush3.bf16.xpose.msra.mxu0 %v1017_v30 }
 0x2e1   : > { %2971 = vmatmul.mubr.msk.bf16.vlgmr.msra.gmra.mrb[0].mxu1 %vm938_vm6, %v3404_v14  ;;  %2986 = vmatprep.subr.bf16.mxu0 %v3172_v1 }
 0x2e2   : > { %2982 = vmatprep.mubr.msk.bf16.mxu1 %vm3173_vm5, %v3172_v1 }
 0x2e7   : > { %2977 = vmatmul.mubr.msk.bf16.vlgmr.msra.gmra.mrb[4].mxu0 %vm938_vm6, %v3410_v28 }
 0x2e8   : > { %2988 = vmatprep.mubr.msk.bf16.mxu0 %vm3173_vm5, %v3172_v1 }
 0x3b4   : > { %v979_v61 = vpop.f32.mrb[0].mxu1 }
 0x3b5   : > { %v2972_v33 = vpop.f32.mrb[1].mxu1  ;;  %v1060_v62 = vsel %vm1059_vm7, %v979_v61, -inf }
 0x3b6   : > { %v982_v63 = vpop.f32.mrb[2].mxu1  ;;  %1061 = vmax.xlane.f32.xlu1 %v1060_v62 }
 0x3b7   : > { %v2973_v10 = vpop.f32.mrb[3].mxu1 }
 0x3ba   : > { %v1053_v0 = vpop.f32.mrb[4].mxu0 }
 0x3bb   : > { %v2978_v15 = vpop.f32.mrb[5].mxu0  ;;  %v1063_v34 = vsel %vm1059_vm7, %v1053_v0, -inf }
 0x3bc   : > { %1064 = vmax.xlane.f32.xlu0 %v1063_v34  ;;  %v1056_v16 = vpop.f32.mrb[6].mxu0 }
 0x3bd   : > { %v2979_v35 = vpop.f32.mrb[7].mxu0 }
 0x443   : > { %v1062_v18 = vpop.xlane.xlu1 %1061 }
 0x444   : > { %v1066_v19 = vsub.f32 %v979_v61, %v1062_v18 }
 0x446   : > { %v1068_v20 = vmul.f32 1.442695, %v1066_v19 }
 0x448   : > { %3131 = vpow2.f32 %v1068_v20 }
 0x449   : > { %v1065_v21 = vpop.xlane.xlu0 %1064 }
 0x44a   : > { %v1067_v22 = vsub.f32 %v1053_v0, %v1065_v21 }
 0x44c   : > { %v1070_v25 = vmul.f32 1.442695, %v1067_v22 }
 0x44e   : > { %3133 = vpow2.f32 %v1070_v25 }
 0x452   : > { %v3132_v37 = vpop.eup %3131 }
 0x453   : > { %v1072_v56 = vsel %vm1059_vm7, %v3132_v37, 0.0 }
 0x454   : > { %1073 = vadd.xlane.f32.xlu0 %v1072_v56 }
 0x458   : > { %v3134_v38 = vpop.eup %3133 }
 0x459   : > { %v1075_v57 = vsel %vm1059_vm7, %v3134_v38, 0.0 }
 0x45a   : > { %1076 = vadd.xlane.f32.xlu1 %v1075_v57 }
 0x46a   : > { %1084 = vrot.lane.b32.xlu0 %v3404_v14, %s3175_s14 }
 0x46b   : > { %1137 = vrot.lane.b32.xlu1 %v3410_v28, %s3175_s14 }
 0x46e   : > { %1435 = vrot.lane.b32.xlu0 %v3410_v28, %s3176_s15 }
 0x46f   : > { %1385 = vrot.lane.b32.xlu1 %v3404_v14, %s3176_s15  ;;  %s272_s15 = scalar_lea.vmem %s3672_s6, %s2875_s12 }
 0x473   : > { %1383 = vrot.lane.b32.xlu1 %v3404_v14, %s3177_s16 }
 0x477   : > { %1433 = vrot.lane.b32.xlu1 %v3410_v28, %s3177_s16 }
 0x4e1   : > { %v1074_v31 = vpop.xlane.xlu0 %1073 }
 0x4e2   : > { %3135 = vrcp.f32 %v1074_v31 }
 0x4e5   : > { %v1085_v41 = vpop.permute.xlu0 %1084 }
 0x4e6   : > { %v1095_v36 = vand.u32 %v3435_v32, %v1085_v41 }
 0x4e7   : > { %v1077_v42 = vpop.xlane.xlu1 %1076 }
 0x4e8   : > { %3137 = vrcp.f32 %v1077_v42  ;;  %2981 = vmatpush3.bf16.msra.mxu1 %v1095_v36 }
 0x4e9   : > { %2992 = vmatprep.subr.bf16.mxu1 %v3172_v1  ;;  %v1436_v42 = vpop.permute.xlu0 %1435 }
 0x4eb   : > { %v1138_v43 = vpop.permute.xlu1 %1137 }
 0x4ec   : > { %v3136_v44 = vpop.eup %3135  ;;  %v1143_v45 = vand.u32 %v1138_v43, %v3435_v32 }
 0x4ed   : > { %v1080_v46 = vmul.f32 %v3136_v44, %v3132_v37  ;;  %v1441_v44 = vsel %vm938_vm6, %v1436_v42, 0 }
 0x4ee   : > { %2987 = vmatpush3.bf16.msra.mxu0 %v1143_v45 }
 0x4ef   : > { %v1082_v47 = vpack.c.bf16 %v1080_v46, %v1080_v46  ;;  %2998 = vmatprep.subr.bf16.mxu0 %v3172_v1  ;;  %v1386_v50 = vpop.permute.xlu1 %1385 }
 0x4f0   : > { %v1391_v52 = vsel %vm938_vm6, %v1386_v50, 0 }
 0x4f1   : > { %2983 = vmatmul.mubr.msk.bf16.vlgmr.msra.gmra.mrb[4].mxu1 %vm1086_vm10, %v1082_v47 }
 0x4f2   : > { %v3138_v48 = vpop.eup %3137  ;;  %2994 = vmatprep.mubr.msk.bf16.mxu1 %vm3173_vm5, %v3172_v1  ;;  %2993 = vmatpush3.bf16.msra.mxu1 %v1338_v55 }
 0x4f3   : > { %v1081_v49 = vmul.f32 %v3138_v48, %v3134_v38  ;;  %v1384_v53 = vpop.permute.xlu1 %1383  ;;  %3004 = vmatprep.subr.bf16.mxu1 %v3172_v1 }
 0x4f5   : > { %v1083_v51 = vpack.c.bf16 %v1081_v49, %v1081_v49 }
 0x4f7   : > { %2989 = vmatmul.mubr.msk.bf16.vlgmr.msra.gmra.mrb[8].mxu0 %vm1086_vm10, %v1083_v51  ;;  %v1434_v45 = vpop.permute.xlu1 %1433 }
 0x4f8   : > { %2999 = vmatpush3.bf16.xpose.msra.mxu0 %v1391_v52  ;;  %3000 = vmatprep.mubr.msk.bf16.mxu0 %vm3173_vm5, %v3172_v1 }
 0x4f9   : > { %3010 = vmatprep.subr.bf16.mxu0 %v3172_v1 }
 0x4ff   : > { %3001 = vmatmul.mubr.msk.bf16.vlgmr.msra.gmra.mrb[12].mxu0 %vm938_vm6, %v1384_v53 }
 0x500   : > { %3012 = vmatprep.mubr.msk.bf16.mxu0 %vm3173_vm5, %v3172_v1 }
 0x5c4   : > { %v1131_v60 = vpop.f32.mrb[4].mxu1 }
 0x5c5   : > { %v1194_v2 = vrot.slane %v1131_v60, %v3242_v17  ;;  %v2984_v3 = vpop.f32.mrb[5].mxu1  ;;  %v1187_v4 = vcombine.high %v1131_v60, %v1131_v60 }
 0x5c6   : > { %v1134_v5 = vpop.f32.mrb[6].mxu1 }
 0x5c7   : > { %v1202_v6 = vcombine.high %v1194_v2, %v1194_v2  ;;  %v2985_v7 = vpop.f32.mrb[7].mxu1  ;;  %v1201_v9 = vrot.slane %v1187_v4, %v3242_v17  ;;  %v1209_v11 = vrot.slane %v1194_v2, %v3242_v17 }
 0x5c9   : > { %v1223_v8 = vrot.slane %v1202_v6, %v3242_v17  ;;  %v1216_v61 = vrot.slane %v1201_v9, %v3242_v17 }
 0x5ca   : > { %v1179_v12 = vpop.f32.mrb[8].mxu0 }
 0x5cb   : > { %v1226_v13 = vcombine.high %v1179_v12, %v1179_v12  ;;  %v1233_v23 = vrot.slane %v1179_v12, %v3242_v17  ;;  %v2990_v24 = vpop.f32.mrb[9].mxu0  ;;  %v1265_v26 = vcombine.low %v1209_v11, %v1223_v8  ;;  %v2891_v27 = vcombine.high %v1209_v11, %v1223_v8 }
 0x5cc   : > { %v1182_v29 = vpop.f32.mrb[10].mxu0 }
 0x5cd   : > { %v1240_v58 = vrot.slane %v1226_v13, %v3242_v17  ;;  %v1241_v59 = vcombine.high %v1233_v23, %v1233_v23  ;;  %v2991_v30 = vpop.f32.mrb[11].mxu0  ;;  %v1248_v33 = vrot.slane %v1233_v23, %v3242_v17  ;;  %v1275_v63 = vrot.slane %v1265_v26, %v3242_v17 }
 0x5ce   : > { %v1282_v10 = vrot.slane %v2891_v27, %v3242_v17 }
 0x5cf   : > { %v1262_v62 = vrot.slane %v1241_v59, %v3242_v17  ;;  %v1263_v0 = vcombine.high %v1248_v33, %v1248_v33  ;;  %v1267_v15 = vcombine.low %v1216_v61, %v1248_v33  ;;  %v1255_v34 = vrot.slane %v1240_v58, %v3242_v17 }
 0x5d0   : > { %v1297_v22 = vcombine.low %v1275_v63, %v1282_v10 }
 0x5d1   : > { %v1264_v16 = vcombine.high %v1262_v62, %v1262_v62  ;;  %v1268_v35 = vcombine.low %v1262_v62, %v1263_v0  ;;  %v1289_v25 = vrot.slane %v1267_v15, %v3242_v17 }
 0x5d2   : > { %v1427_v18 = vpop.f32.mrb[12].mxu0  ;;  %v1305_v40 = vrot.slane %v1297_v22, %v3242_v17 }
 0x5d3   : > { %v1314_v19 = vcombine.low %v1264_v16, %v1255_v34  ;;  %v3002_v20 = vpop.f32.mrb[13].mxu0  ;;  %v1483_v21 = vsel %vm1059_vm7, %v1427_v18, -inf  ;;  %v1296_v37 = vrot.slane %v1268_v35, %v3242_v17 }
 0x5d4   : > { %1484 = vmax.xlane.f32.xlu0 %v1483_v21  ;;  %v1430_v56 = vpop.f32.mrb[14].mxu0 }
 0x5d5   : > { %v3003_v38 = vpop.f32.mrb[15].mxu0  ;;  %v1298_v57 = vcombine.low %v1289_v25, %v1296_v37  ;;  %v1321_v39 = vrot.slane %v1314_v19, %v3242_v17 }
 0x5d7   : > { %v1312_v31 = vrot.slane %v1298_v57, %v3242_v17  ;;  %v1328_v36 = vrot.slane %v1321_v39, %v3242_v17  ;;  %v2898_v57 = vld [vmem:[%s3670_s4 + $0x4] sm:$0xf] }
 0x5d8   : > { %v1756_v39 = vsel %vm1336_vm11, %v2898_v57, 0 }
 0x5d9   : > { %v1313_v41 = vcombine.low %v1305_v40, %v1312_v31 }
 0x5db   : > { %v1331_v43 = vpack.c.bf16 %v1328_v36, %v1313_v41 }
 0x5dd   : > { %2995 = vmatmul.mubr.msk.bf16.vlgmr.msra.gmra.mrb[8].mxu1 %vm938_vm6, %v1331_v43 }
 0x5de   : > { %3005 = vmatpush3.bf16.xpose.msra.mxu1 %v1441_v44  ;;  %3006 = vmatprep.mubr.msk.bf16.mxu1 %vm3173_vm5, %v3172_v1 }
 0x5df   : > { %3016 = vmatprep.subr.bf16.mxu1 %v3172_v1 }
 0x5e5   : > { %3007 = vmatmul.mubr.msk.bf16.vlgmr.msra.gmra.mrb[12].mxu1 %vm938_vm6, %v1434_v45 }
 0x5e6   : > { %3018 = vmatprep.mubr.msk.bf16.mxu1 %vm3173_vm5, %v3172_v1 }
 0x5ea   : > { %1507 = vrot.lane.b32.xlu0 %v3404_v14, %s3179_s19 }
 0x5ee   : > { %1801 = vrot.lane.b32.xlu0 %v3404_v14, %s3180_s20 }
 0x5f2   : > { %1851 = vrot.lane.b32.xlu0 %v3410_v28, %s3180_s20 }
 0x661   : > { %v1485_v46 = vpop.xlane.xlu0 %1484 }
 0x662   : > { %v1489_v47 = vsub.f32 %v1427_v18, %v1485_v46 }
 0x664   : > { %v1491_v48 = vmul.f32 1.442695, %v1489_v47 }
 0x665   : > { %v1508_v49 = vpop.permute.xlu0 %1507 }
 0x666   : > { %3139 = vpow2.f32 %v1491_v48  ;;  %v1513_v50 = vand.u32 %v1508_v49, %v3435_v32 }
 0x668   : > { %3011 = vmatpush3.bf16.msra.mxu0 %v1513_v50 }
 0x669   : > { %3028 = vmatprep.subr.bf16.mxu0 %v3172_v1  ;;  %v1802_v11 = vpop.permute.xlu0 %1801 }
 0x66d   : > { %v1852_v13 = vpop.permute.xlu0 %1851 }
 0x670   : > { %v3140_v51 = vpop.eup %3139 }
 0x671   : > { %v1495_v52 = vsel %vm1059_vm7, %v3140_v51, 0.0 }
 0x672   : > { %1496 = vadd.xlane.f32.xlu1 %v1495_v52 }
 0x683   : > { %1803 = vrot.lane.b32.xlu1 %v3404_v14, %s3181_s22 }
 0x687   : > { %1853 = vrot.lane.b32.xlu1 %v3410_v28, %s3181_s22 }
 0x6b8   : > { %v1477_v53 = vpop.f32.mrb[12].mxu1 }
 0x6b9   : > { %v3008_v54 = vpop.f32.mrb[13].mxu1  ;;  %v1486_v55 = vsel %vm1059_vm7, %v1477_v53, -inf }
 0x6ba   : > { %v1480_v60 = vpop.f32.mrb[14].mxu1  ;;  %1487 = vmax.xlane.f32.xlu1 %v1486_v55 }
 0x6bb   : > { %v3009_v2 = vpop.f32.mrb[15].mxu1 }
 0x6ff   : > { %v1497_v3 = vpop.xlane.xlu1 %1496 }
 0x700   : > { %3141 = vrcp.f32 %v1497_v3 }
 0x703   : > { %v1804_v6 = vpop.permute.xlu1 %1803 }
 0x704   : > { %v1809_v8 = vsel %vm938_vm6, %v1804_v6, 0 }
 0x707   : > { %v1854_v9 = vpop.permute.xlu1 %1853 }
 0x708   : > { %v1859_v12 = vsel %vm938_vm6, %v1854_v9, 0 }
 0x70a   : > { %v3142_v4 = vpop.eup %3141 }
 0x70b   : > { %v1503_v5 = vmul.f32 %v3142_v4, %v3140_v51 }
 0x70d   : > { %v1505_v7 = vpack.c.bf16 %v1503_v5, %v1503_v5 }
 0x70f   : > { %3013 = vmatmul.mubr.msk.bf16.vlgmr.msra.gmra.mrb[16].mxu0 %vm1086_vm10, %v1505_v7 }
 0x710   : > { %3029 = vmatpush3.bf16.xpose.msra.mxu0 %v1809_v8  ;;  %3030 = vmatprep.mubr.msk.bf16.mxu0 %vm3173_vm5, %v3172_v1 }
 0x711   : > { %3034 = vmatprep.subr.bf16.mxu0 %v3172_v1 }
 0x717   : > { %3031 = vmatmul.mubr.msk.bf16.vlgmr.msra.gmra.mrb[20].mxu0 %vm938_vm6, %v1802_v11 }
 0x718   : > { %3035 = vmatpush3.bf16.xpose.msra.mxu0 %v1859_v12  ;;  %3036 = vmatprep.mubr.msk.bf16.mxu0 %vm3173_vm5, %v3172_v1 }
 0x719   : > { %3046 = vmatprep.subr.bf16.mxu0 %v3172_v1 }
 0x71f   : > { %3037 = vmatmul.mubr.msk.bf16.vlgmr.msra.gmra.mrb[24].mxu0 %vm938_vm6, %v1852_v13 }
 0x720   : > { %3048 = vmatprep.mubr.msk.bf16.mxu0 %vm3173_vm5, %v3172_v1 }
 0x747   : > { %v1488_v23 = vpop.xlane.xlu1 %1487 }
 0x748   : > { %v1490_v24 = vsub.f32 %v1477_v53, %v1488_v23 }
 0x74a   : > { %v1493_v26 = vmul.f32 1.442695, %v1490_v24 }
 0x74c   : > { %3143 = vpow2.f32 %v1493_v26 }
 0x756   : > { %v3144_v27 = vpop.eup %3143 }
 0x757   : > { %v1498_v29 = vsel %vm1059_vm7, %v3144_v27, 0.0 }
 0x758   : > { %1499 = vadd.xlane.f32.xlu0 %v1498_v29 }
 0x76e   : > { %1555 = vrot.lane.b32.xlu0 %v3410_v28, %s3179_s19 }
 0x772   : > { %1973 = vrot.lane.b32.xlu0 %v3410_v28, %s3182_s24 }
 0x776   : > { %2221 = vrot.lane.b32.xlu0 %v3404_v14, %s3183_s25 }
 0x77a   : > { %2271 = vrot.lane.b32.xlu0 %v3410_v28, %s3183_s25 }
 0x77e   : > { %2219 = vrot.lane.b32.xlu0 %v3404_v14, %s3184_s26 }
 0x7e2   : > { %v1549_v58 = vpop.f32.mrb[16].mxu0 }
 0x7e3   : > { %v3014_v59 = vpop.f32.mrb[17].mxu0  ;;  %v1612_v48 = vrot.slane %v1549_v58, %v3242_v17  ;;  %v1605_v50 = vcombine.high %v1549_v58, %v1549_v58 }
 0x7e4   : > { %v1552_v30 = vpop.f32.mrb[18].mxu0 }
 0x7e5   : > { %v3015_v61 = vpop.f32.mrb[19].mxu0  ;;  %v1500_v33 = vpop.xlane.xlu0 %1499  ;;  %v1620_v49 = vcombine.high %v1612_v48, %v1612_v48  ;;  %v1627_v52 = vrot.slane %v1612_v48, %v3242_v17  ;;  %v1619_v53 = vrot.slane %v1605_v50, %v3242_v17 }
 0x7e6   : > { %3145 = vrcp.f32 %v1500_v33 }
 0x7e7   : > { %v1641_v51 = vrot.slane %v1620_v49, %v3242_v17  ;;  %v1634_v6 = vrot.slane %v1619_v53, %v3242_v17 }
 0x7e9   : > { %v1556_v62 = vpop.permute.xlu0 %1555  ;;  %v1683_v54 = vcombine.low %v1627_v52, %v1641_v51  ;;  %v2897_v60 = vcombine.high %v1627_v52, %v1641_v51 }
 0x7ea   : > { %v1845_v63 = vpop.f32.mrb[20].mxu0  ;;  %v1561_v10 = vand.u32 %v1556_v62, %v3435_v32 }
 0x7eb   : > { %v3032_v0 = vpop.f32.mrb[21].mxu0  ;;  %v1901_v15 = vsel %vm1059_vm7, %v1845_v63, -inf  ;;  %v1693_v12 = vrot.slane %v1683_v54, %v3242_v17  ;;  %v1700_v13 = vrot.slane %v2897_v60, %v3242_v17 }
 0x7ec   : > { %1902 = vmax.xlane.f32.xlu1 %v1901_v15  ;;  %v1848_v34 = vpop.f32.mrb[22].mxu0  ;;  %3017 = vmatpush3.bf16.msra.mxu1 %v1561_v10 }
 0x7ed   : > { %v3033_v16 = vpop.f32.mrb[23].mxu0  ;;  %v1974_v35 = vpop.permute.xlu0 %1973  ;;  %3022 = vmatprep.subr.bf16.mxu1 %v3172_v1  ;;  %v1715_v59 = vcombine.low %v1693_v12, %v1700_v13 }
 0x7ee   : > { %v1979_v18 = vand.u32 %v1974_v35, %v3435_v32 }
 0x7ef   : > { %v1723_v10 = vrot.slane %v1715_v59, %v3242_v17 }
 0x7f0   : > { %v3146_v19 = vpop.eup %3145  ;;  %3047 = vmatpush3.bf16.msra.mxu0 %v1979_v18 }
 0x7f1   : > { %v1504_v20 = vmul.f32 %v3146_v19, %v3144_v27  ;;  %3058 = vmatprep.subr.bf16.mxu0 %v3172_v1 }
 0x7f2   : > { %v1895_v21 = vpop.f32.mrb[24].mxu0 }
 0x7f3   : > { %v3038_v22 = vpop.f32.mrb[25].mxu0  ;;  %v1904_v25 = vsel %vm1059_vm7, %v1895_v21, -inf  ;;  %v1506_v56 = vpack.c.bf16 %v1504_v20, %v1504_v20 }
 0x7f4   : > { %1905 = vmax.xlane.f32.xlu1 %v1904_v25  ;;  %v1898_v37 = vpop.f32.mrb[26].mxu0 }
 0x7f5   : > { %v3039_v38 = vpop.f32.mrb[27].mxu0  ;;  %3019 = vmatmul.mubr.msk.bf16.vlgmr.msra.gmra.mrb[16].mxu1 %vm1086_vm10, %v1506_v56  ;;  %v2222_v56 = vpop.permute.xlu0 %2221 }
 0x7f6   : > { %3024 = vmatprep.mubr.msk.bf16.mxu1 %vm3173_vm5, %v3172_v1  ;;  %3023 = vmatpush3.bf16.msra.mxu1 %v1756_v39  ;;  %v2227_v39 = vsel %vm938_vm6, %v2222_v56, 0 }
 0x7f7   : > { %3040 = vmatprep.subr.bf16.mxu1 %v3172_v1 }
 0x879   : > { %v1903_v40 = vpop.xlane.xlu1 %1902 }
 0x87a   : > { %v1907_v31 = vsub.f32 %v1845_v63, %v1903_v40  ;;  %v2272_v40 = vpop.permute.xlu0 %2271 }
 0x87c   : > { %v1909_v41 = vmul.f32 1.442695, %v1907_v31 }
 0x87e   : > { %3147 = vpow2.f32 %v1909_v41  ;;  %v2220_v31 = vpop.permute.xlu0 %2219  ;;  %v2905_v41 = vld [vmem:[%s3670_s4 + $0x8] sm:$0xf] }
 0x881   : > { %v1906_v36 = vpop.xlane.xlu1 %1905 }
 0x882   : > { %v1908_v42 = vsub.f32 %v1895_v21, %v1906_v36  ;;  %v2174_v36 = vsel %vm1336_vm11, %v2905_v41, 0 }
 0x884   : > { %v1911_v43 = vmul.f32 1.442695, %v1908_v42 }
 0x886   : > { %3149 = vpow2.f32 %v1911_v43 }
 0x888   : > { %v3148_v44 = vpop.eup %3147 }
 0x889   : > { %v1913_v45 = vsel %vm1059_vm7, %v3148_v44, 0.0 }
 0x88a   : > { %1914 = vadd.xlane.f32.xlu1 %v1913_v45 }
 0x890   : > { %v3150_v46 = vpop.eup %3149 }
 0x891   : > { %v1916_v47 = vsel %vm1059_vm7, %v3150_v46, 0.0 }
 0x892   : > { %1917 = vadd.xlane.f32.xlu1 %v1916_v47 }
 0x8a3   : > { %1925 = vrot.lane.b32.xlu1 %v3404_v14, %s3182_s24 }
 0x8a7   : > { %2269 = vrot.lane.b32.xlu1 %v3410_v28, %s3184_s26 }
 0x8c8   : > { %v1597_v55 = vpop.f32.mrb[16].mxu1 }
 0x8c9   : > { %v1644_v2 = vcombine.high %v1597_v55, %v1597_v55  ;;  %v1651_v3 = vrot.slane %v1597_v55, %v3242_v17  ;;  %v3020_v4 = vpop.f32.mrb[17].mxu1 }
 0x8ca   : > { %v1600_v5 = vpop.f32.mrb[18].mxu1 }
 0x8cb   : > { %v1658_v7 = vrot.slane %v1644_v2, %v3242_v17  ;;  %v1659_v8 = vcombine.high %v1651_v3, %v1651_v3  ;;  %v1666_v9 = vrot.slane %v1651_v3, %v3242_v17  ;;  %v3021_v11 = vpop.f32.mrb[19].mxu1 }
 0x8cd   : > { %v1680_v23 = vrot.slane %v1659_v8, %v3242_v17  ;;  %v1681_v24 = vcombine.high %v1666_v9, %v1666_v9  ;;  %v1685_v26 = vcombine.low %v1634_v6, %v1666_v9  ;;  %v1673_v27 = vrot.slane %v1658_v7, %v3242_v17 }
 0x8cf   : > { %v1682_v29 = vcombine.high %v1680_v23, %v1680_v23  ;;  %v1686_v58 = vcombine.low %v1680_v23, %v1681_v24  ;;  %v1707_v30 = vrot.slane %v1685_v26, %v3242_v17 }
 0x8d1   : > { %v1714_v61 = vrot.slane %v1686_v58, %v3242_v17  ;;  %v1732_v33 = vcombine.low %v1682_v29, %v1673_v27 }
 0x8d3   : > { %v1716_v62 = vcombine.low %v1707_v30, %v1714_v61  ;;  %v1739_v63 = vrot.slane %v1732_v33, %v3242_v17 }
 0x8d5   : > { %v1730_v0 = vrot.slane %v1716_v62, %v3242_v17  ;;  %v1746_v34 = vrot.slane %v1739_v63, %v3242_v17 }
 0x8d7   : > { %v1731_v15 = vcombine.low %v1723_v10, %v1730_v0 }
 0x8d9   : > { %v1749_v16 = vpack.c.bf16 %v1746_v34, %v1731_v15 }
 0x8db   : > { %3025 = vmatmul.mubr.msk.bf16.vlgmr.msra.gmra.mrb[8].mxu1 %vm938_vm6, %v1749_v16 }
 0x8dc   : > { %3042 = vmatprep.mubr.msk.bf16.mxu1 %vm3173_vm5, %v3172_v1 }
 0x917   : > { %v1915_v35 = vpop.xlane.xlu1 %1914 }
 0x918   : > { %3151 = vrcp.f32 %v1915_v35 }
 0x91f   : > { %v1918_v18 = vpop.xlane.xlu1 %1917 }
 0x920   : > { %3153 = vrcp.f32 %v1918_v18 }
 0x922   : > { %v3152_v19 = vpop.eup %3151 }
 0x923   : > { %v1921_v20 = vmul.f32 %v3152_v19, %v3148_v44  ;;  %v1926_v21 = vpop.permute.xlu1 %1925 }
 0x924   : > { %v1931_v22 = vand.u32 %v1926_v21, %v3435_v32 }
 0x925   : > { %v1923_v25 = vpack.c.bf16 %v1921_v20, %v1921_v20  ;;  %v2277_v20 = vsel %vm938_vm6, %v2272_v40, 0 }
 0x926   : > { %3041 = vmatpush3.bf16.msra.mxu1 %v1931_v22 }
 0x927   : > { %3052 = vmatprep.subr.bf16.mxu1 %v3172_v1  ;;  %v2270_v21 = vpop.permute.xlu1 %2269 }
 0x929   : > { %3043 = vmatmul.mubr.msk.bf16.vlgmr.msra.gmra.mrb[20].mxu1 %vm1086_vm10, %v1923_v25 }
 0x92a   : > { %v3154_v37 = vpop.eup %3153  ;;  %3054 = vmatprep.mubr.msk.bf16.mxu1 %vm3173_vm5, %v3172_v1  ;;  %3053 = vmatpush3.bf16.msra.mxu1 %v2174_v36 }
 0x92b   : > { %v1922_v38 = vmul.f32 %v3154_v37, %v3150_v46  ;;  %3064 = vmatprep.subr.bf16.mxu1 %v3172_v1 }
 0x92d   : > { %v1924_v57 = vpack.c.bf16 %v1922_v38, %v1922_v38 }
 0x92f   : > { %3049 = vmatmul.mubr.msk.bf16.vlgmr.msra.gmra.mrb[28].mxu0 %vm1086_vm10, %v1924_v57 }
 0x930   : > { %3059 = vmatpush3.bf16.xpose.msra.mxu0 %v2227_v39  ;;  %3060 = vmatprep.mubr.msk.bf16.mxu0 %vm3173_vm5, %v3172_v1 }
 0x931   : > { %3070 = vmatprep.subr.bf16.mxu0 %v3172_v1 }
 0x937   : > { %3061 = vmatmul.mubr.msk.bf16.vlgmr.msra.gmra.mrb[32].mxu0 %vm938_vm6, %v2220_v31 }
 0x938   : > { %3072 = vmatprep.mubr.msk.bf16.mxu0 %vm3173_vm5, %v3172_v1 }
 0x9fc   : > { %v1967_v42 = vpop.f32.mrb[20].mxu1 }
 0x9fd   : > { %v2030_v43 = vrot.slane %v1967_v42, %v3242_v17  ;;  %v3044_v44 = vpop.f32.mrb[21].mxu1  ;;  %v2023_v45 = vcombine.high %v1967_v42, %v1967_v42 }
 0x9fe   : > { %v1970_v46 = vpop.f32.mrb[22].mxu1 }
 0x9ff   : > { %v2038_v47 = vcombine.high %v2030_v43, %v2030_v43  ;;  %v3045_v48 = vpop.f32.mrb[23].mxu1  ;;  %v2037_v50 = vrot.slane %v2023_v45, %v3242_v17  ;;  %v2045_v51 = vrot.slane %v2030_v43, %v3242_v17 }
 0xa01   : > { %v2059_v49 = vrot.slane %v2038_v47, %v3242_v17  ;;  %v2052_v7 = vrot.slane %v2037_v50, %v3242_v17 }
 0xa02   : > { %v2015_v52 = vpop.f32.mrb[28].mxu0 }
 0xa03   : > { %v2062_v53 = vcombine.high %v2015_v52, %v2015_v52  ;;  %v2069_v54 = vrot.slane %v2015_v52, %v3242_v17  ;;  %v3050_v55 = vpop.f32.mrb[29].mxu0  ;;  %v2101_v60 = vcombine.low %v2045_v51, %v2059_v49  ;;  %v2904_v2 = vcombine.high %v2045_v51, %v2059_v49 }
 0xa04   : > { %v2018_v3 = vpop.f32.mrb[30].mxu0 }
 0xa05   : > { %v2076_v4 = vrot.slane %v2062_v53, %v3242_v17  ;;  %v2077_v5 = vcombine.high %v2069_v54, %v2069_v54  ;;  %v3051_v6 = vpop.f32.mrb[31].mxu0  ;;  %v2084_v8 = vrot.slane %v2069_v54, %v3242_v17  ;;  %v2111_v11 = vrot.slane %v2101_v60, %v3242_v17 }
 0xa06   : > { %v2118_v12 = vrot.slane %v2904_v2, %v3242_v17 }
 0xa07   : > { %v2098_v9 = vrot.slane %v2077_v5, %v3242_v17  ;;  %v2099_v13 = vcombine.high %v2084_v8, %v2084_v8  ;;  %v2103_v23 = vcombine.low %v2052_v7, %v2084_v8  ;;  %v2091_v24 = vrot.slane %v2076_v4, %v3242_v17 }
 0xa08   : > { %v2133_v61 = vcombine.low %v2111_v11, %v2118_v12 }
 0xa09   : > { %v2100_v26 = vcombine.high %v2098_v9, %v2098_v9  ;;  %v2104_v27 = vcombine.low %v2098_v9, %v2099_v13  ;;  %v2125_v33 = vrot.slane %v2103_v23, %v3242_v17 }
 0xa0a   : > { %v2263_v29 = vpop.f32.mrb[32].mxu0  ;;  %v2141_v34 = vrot.slane %v2133_v61, %v3242_v17 }
 0xa0b   : > { %v2150_v58 = vcombine.low %v2100_v26, %v2091_v24  ;;  %v3062_v59 = vpop.f32.mrb[33].mxu0  ;;  %v2319_v30 = vsel %vm1059_vm7, %v2263_v29, -inf  ;;  %v2132_v62 = vrot.slane %v2104_v27, %v3242_v17 }
 0xa0c   : > { %2320 = vmax.xlane.f32.xlu0 %v2319_v30  ;;  %v2266_v63 = vpop.f32.mrb[34].mxu0 }
 0xa0d   : > { %v3063_v10 = vpop.f32.mrb[35].mxu0  ;;  %v2134_v0 = vcombine.low %v2125_v33, %v2132_v62  ;;  %v2157_v15 = vrot.slane %v2150_v58, %v3242_v17 }
 0xa0f   : > { %v2148_v16 = vrot.slane %v2134_v0, %v3242_v17  ;;  %v2164_v18 = vrot.slane %v2157_v15, %v3242_v17 }
 0xa11   : > { %v2149_v35 = vcombine.low %v2141_v34, %v2148_v16 }
 0xa13   : > { %v2167_v19 = vpack.c.bf16 %v2164_v18, %v2149_v35 }
 0xa15   : > { %3055 = vmatmul.mubr.msk.bf16.vlgmr.msra.gmra.mrb[8].mxu1 %vm938_vm6, %v2167_v19 }
 0xa16   : > { %3065 = vmatpush3.bf16.xpose.msra.mxu1 %v2277_v20  ;;  %3066 = vmatprep.mubr.msk.bf16.mxu1 %vm3173_vm5, %v3172_v1 }
 0xa17   : > { %3076 = vmatprep.subr.bf16.mxu1 %v3172_v1 }
 0xa1d   : > { %3067 = vmatmul.mubr.msk.bf16.vlgmr.msra.gmra.mrb[24].mxu1 %vm938_vm6, %v2270_v21 }
 0xa1e   : > { %3078 = vmatprep.mubr.msk.bf16.mxu1 %vm3173_vm5, %v3172_v1 }
 0xa99   : > { %v2321_v22 = vpop.xlane.xlu0 %2320 }
 0xa9a   : > { %v2325_v25 = vsub.f32 %v2263_v29, %v2321_v22 }
 0xa9c   : > { %v2327_v37 = vmul.f32 1.442695, %v2325_v25 }
 0xa9e   : > { %3155 = vpow2.f32 %v2327_v37 }
 0xaa8   : > { %v3156_v56 = vpop.eup %3155 }
 0xaa9   : > { %v2331_v38 = vsel %vm1059_vm7, %v3156_v56, 0.0 }
 0xaaa   : > { %2332 = vadd.xlane.f32.xlu0 %v2331_v38 }
 0xaf0   : > { %v2313_v57 = vpop.f32.mrb[24].mxu1 }
 0xaf1   : > { %v3068_v39 = vpop.f32.mrb[25].mxu1  ;;  %v2322_v40 = vsel %vm1059_vm7, %v2313_v57, -inf }
 0xaf2   : > { %2323 = vmax.xlane.f32.xlu1 %v2322_v40  ;;  %v2316_v31 = vpop.f32.mrb[26].mxu1  ;;  %v2883_v40 = vld [vmem:[%s3671_s5] ss:$0 sm:$0xff] }
 0xaf3   : > { %v3069_v41 = vpop.f32.mrb[27].mxu1 }
 0xb03   : > { %2391 = vrot.lane.b32.xlu1 %v3410_v28, %s3185_s7 }
 0xb37   : > { %v2333_v48 = vpop.xlane.xlu0 %2332 }
 0xb7f   : > { %v2324_v36 = vpop.xlane.xlu1 %2323 }
 0xb80   : > { %v2326_v42 = vsub.f32 %v2313_v57, %v2324_v36 }
 0xb82   : > { %v2329_v43 = vmul.f32 1.442695, %v2326_v42 }
 0xb83   : > { %v2392_v44 = vpop.permute.xlu1 %2391 }
 0xb84   : > { %3157 = vpow2.f32 %v2329_v43  ;;  %v2397_v45 = vand.u32 %v2392_v44, %v3435_v32 }
 0xb85   : > { %3159 = vrcp.f32 %v2333_v48 }
 0xb86   : > { %3077 = vmatpush3.bf16.msra.mxu1 %v2397_v45 }
 0xb87   : > { %3082 = vmatprep.subr.bf16.mxu1 %v3172_v1 }
 0xb8e   : > { %v3158_v46 = vpop.eup %3157 }
 0xb8f   : > { %v2334_v47 = vsel %vm1059_vm7, %v3158_v46, 0.0  ;;  %v3160_v28 = vpop.eup %3159 }
 0xb90   : > { %2335 = vadd.xlane.f32.xlu0 %v2334_v47  ;;  %v2339_v50 = vmul.f32 %v3160_v28, %v3156_v56 }
 0xb92   : > { %v2341_v53 = vpack.c.bf16 %v2339_v50, %v2339_v50 }
 0xba6   : > { %2343 = vrot.lane.b32.xlu0 %v3404_v14, %s3185_s7  ;;  %v2912_v14 = vld [vmem:[%s3670_s4 + $0xc] sm:$0xf] }
 0xba7   : > { %v2592_v2 = vsel %vm1336_vm11, %v2912_v14, 0 }
 0xc1d   : > { %v2336_v49 = vpop.xlane.xlu0 %2335 }
 0xc1e   : > { %3161 = vrcp.f32 %v2336_v49 }
 0xc21   : > { %v2344_v51 = vpop.permute.xlu0 %2343 }
 0xc22   : > { %v2349_v52 = vand.u32 %v2344_v51, %v3435_v32 }
 0xc24   : > { %3071 = vmatpush3.bf16.msra.mxu0 %v2349_v52 }
 0xc27   : > { %3073 = vmatmul.mubr.msk.bf16.vlgmr.msra.gmra.mrb[36].mxu0 %vm1086_vm10, %v2341_v53 }
 0xc28   : > { %v3162_v54 = vpop.eup %3161 }
 0xc29   : > { %v2340_v55 = vmul.f32 %v3162_v54, %v3158_v46 }
 0xc2b   : > { %v2342_v60 = vpack.c.bf16 %v2340_v55, %v2340_v55 }
 0xc2d   : > { %3079 = vmatmul.mubr.msk.bf16.vlgmr.msra.gmra.mrb[28].mxu1 %vm1086_vm10, %v2342_v60 }
 0xc2e   : > { %3084 = vmatprep.mubr.msk.bf16.mxu1 %vm3173_vm5, %v3172_v1  ;;  %3083 = vmatpush3.bf16.msra.mxu1 %v2592_v2 }
 0xcfa   : > { %v2385_v32 = vpop.f32.mrb[36].mxu0 }
 0xcfb   : > { %v2448_v3 = vrot.slane %v2385_v32, %v3242_v17  ;;  %v3074_v4 = vpop.f32.mrb[37].mxu0  ;;  %v2441_v5 = vcombine.high %v2385_v32, %v2385_v32 }
 0xcfc   : > { %v2388_v6 = vpop.f32.mrb[38].mxu0 }
 0xcfd   : > { %v2456_v7 = vcombine.high %v2448_v3, %v2448_v3  ;;  %v3075_v8 = vpop.f32.mrb[39].mxu0  ;;  %v2455_v11 = vrot.slane %v2441_v5, %v3242_v17  ;;  %v2463_v1 = vrot.slane %v2448_v3, %v3242_v17 }
 0xcff   : > { %v2477_v9 = vrot.slane %v2456_v7, %v3242_v17  ;;  %v2470_v61 = vrot.slane %v2455_v11, %v3242_v17 }
 0xd00   : > { %v2433_v12 = vpop.f32.mrb[28].mxu1 }
 0xd01   : > { %v2480_v13 = vcombine.high %v2433_v12, %v2433_v12  ;;  %v2487_v23 = vrot.slane %v2433_v12, %v3242_v17  ;;  %v3080_v24 = vpop.f32.mrb[29].mxu1  ;;  %v2519_v26 = vcombine.low %v2463_v1, %v2477_v9  ;;  %v2911_v27 = vcombine.high %v2463_v1, %v2477_v9 }
 0xd02   : > { %v2436_v29 = vpop.f32.mrb[30].mxu1 }
 0xd03   : > { %v2494_v58 = vrot.slane %v2480_v13, %v3242_v17  ;;  %v2495_v59 = vcombine.high %v2487_v23, %v2487_v23  ;;  %v3081_v30 = vpop.f32.mrb[31].mxu1  ;;  %v2502_v33 = vrot.slane %v2487_v23, %v3242_v17  ;;  %v2529_v63 = vrot.slane %v2519_v26, %v3242_v17 }
 0xd04   : > { %v2536_v10 = vrot.slane %v2911_v27, %v3242_v17  ;;  %v2795_v27 = vld [vmem:[%s272_s15] sm:$0x7] }
 0xd05   : > { %v2516_v62 = vrot.slane %v2495_v59, %v3242_v17  ;;  %v2517_v0 = vcombine.high %v2502_v33, %v2502_v33  ;;  %v2521_v15 = vcombine.low %v2470_v61, %v2502_v33  ;;  %v2509_v34 = vrot.slane %v2494_v58, %v3242_v17 }
 0xd06   : > { %v2551_v19 = vcombine.low %v2529_v63, %v2536_v10 }
 0xd07   : > { %v2518_v16 = vcombine.high %v2516_v62, %v2516_v62  ;;  %v2522_v35 = vcombine.low %v2516_v62, %v2517_v0  ;;  %v2543_v20 = vrot.slane %v2521_v15, %v3242_v17  ;;  %v2798_v62 = vld [vmem:[%s272_s15 + $0x4] sm:$0x7] }
 0xd08   : > { %v2559_v37 = vrot.slane %v2551_v19, %v3242_v17 }
 0xd09   : > { %v2568_v18 = vcombine.low %v2518_v16, %v2509_v34  ;;  %v2550_v21 = vrot.slane %v2522_v35, %v3242_v17 }
 0xd0b   : > { %v2552_v22 = vcombine.low %v2543_v20, %v2550_v21  ;;  %v2575_v25 = vrot.slane %v2568_v18, %v3242_v17 }
 0xd0d   : > { %v2566_v56 = vrot.slane %v2552_v22, %v3242_v17  ;;  %v2582_v57 = vrot.slane %v2575_v25, %v3242_v17 }
 0xd0f   : > { %v2567_v38 = vcombine.low %v2559_v37, %v2566_v56 }
 0xd11   : > { %v2585_v39 = vpack.c.bf16 %v2582_v57, %v2567_v38 }
 0xd13   : > { %3085 = vmatmul.mubr.msk.bf16.vlgmr.msra.gmra.mrb[8].mxu1 %vm938_vm6, %v2585_v39 }
 0xde6   : > { %v2628_v31 = vpop.f32.mrb[8].mxu1 }
 0xde7   : > { %v3088_v41 = vadd.f32 %v2883_v40, %v2628_v31  ;;  %v3086_v36 = vpop.f32.mrb[9].mxu1 }
 0xde8   : > { %v2631_v42 = vpop.f32.mrb[10].mxu1 }
 0xde9   : > { %v2639_v43 = vcombine.high %v3088_v41, %v3088_v41  ;;  %v2646_v44 = vrot.slane %v3088_v41, %v3242_v17  ;;  %v3089_v45 = vadd.f32 %v2883_v40, %v2631_v42  ;;  %v3087_v46 = vpop.f32.mrb[11].mxu1 }
 0xdeb   : > { %v2653_v47 = vrot.slane %v2639_v43, %v3242_v17  ;;  %v2654_v48 = vcombine.high %v2646_v44, %v2646_v44  ;;  %v2694_v49 = vrot.slane %v3089_v45, %v3242_v17  ;;  %v2662_v28 = vrot.slane %v2646_v44, %v3242_v17 }
 0xded   : > { %v2655_v50 = vcombine.high %v2653_v47, %v2653_v47  ;;  %v2669_v51 = vrot.slane %v2653_v47, %v3242_v17  ;;  %v2676_v52 = vrot.slane %v2654_v48, %v3242_v17  ;;  %v2695_v53 = vcombine.high %v2694_v49, %v2694_v49 }
 0xdee   : > { %v2702_v32 = vrot.slane %v2694_v49, %v3242_v17 }
 0xdef   : > { %v2683_v54 = vrot.slane %v2655_v50, %v3242_v17  ;;  %v2685_v55 = vcombine.high %v2669_v51, %v2669_v51  ;;  %v2710_v60 = vcombine.low %v2662_v28, %v2676_v52  ;;  %v2914_v14 = vcombine.high %v2662_v28, %v2676_v52 }
 0xdf0   : > { %v2732_v2 = vrot.slane %v2669_v51, %v3242_v17  ;;  %v2709_v3 = vrot.slane %v2695_v53, %v3242_v17 }
 0xdf1   : > { %v2718_v4 = vrot.slane %v2710_v60, %v3242_v17  ;;  %v2725_v5 = vrot.slane %v2914_v14, %v3242_v17  ;;  %v2749_v6 = vcombine.low %v2683_v54, %v2685_v55  ;;  %v2687_v7 = vcombine.high %v2683_v54, %v2683_v54 }
 0xdf2   : > { %v2747_v11 = vrot.slane %v2732_v2, %v3242_v17  ;;  %v2771_v23 = vrot.slane %v2709_v3, %v3242_v17 }
 0xdf3   : > { %v2733_v8 = vcombine.low %v2718_v4, %v2725_v5  ;;  %v2750_v9 = vcombine.low %v2687_v7, %v2702_v32  ;;  %v2757_v12 = vrot.slane %v2749_v6, %v3242_v17 }
 0xdf4   : > { %v2786_v59 = vrot.slane %v2771_v23, %v3242_v17 }
 0xdf5   : > { %v2740_v1 = vrot.slane %v2733_v8, %v3242_v17  ;;  %v2764_v13 = vrot.slane %v2750_v9, %v3242_v17 }
 0xdf7   : > { %v2748_v24 = vcombine.low %v2740_v1, %v2747_v11  ;;  %v2772_v26 = vcombine.low %v2757_v12, %v2764_v13 }
 0xdf9   : > { %v2790_v29 = vpack.c.bf16 %v2748_v24, %v2748_v24  ;;  %v2779_v58 = vrot.slane %v2772_v26, %v3242_v17 }
 0xdfb   : > { %v2796_v30 = vsel %vm2794_vm14, %v2790_v29, %v2795_v27  ;;  %v2787_v61 = vcombine.low %v2779_v58, %v2786_v59 }
 0xdfc   : > { %2797 = vst [vmem:[%s272_s15] sm:$0x7] %v2796_v30 }
 0xdfd   : > { %v2791_v33 = vpack.c.bf16 %v2787_v61, %v2787_v61 }
 0xdff   : > { %v2799_v63 = vsel %vm2794_vm14, %v2791_v33, %v2798_v62 }
 0xe00   : > { %2800 = vst [vmem:[%s272_s15 + $0x4] sm:$0x7] %v2799_v63 }
 0xe01 PF: > { %s16_s21 = sadd.s32 1, %s3169_s21  }
 0xe02   : > { %p13_p4 = scmp.ge.s32.totalorder %s16_s21, 4  }
 0xe04   :  { %15 = sbr.rel (!%p13_p4) target bundleno = 1 (0x1), region = 80 }

// kernel: residual_attention_block_forward.3
= control target key start
LH: loop header
LB: loop body
LE: loop exit
PB: predicated region body
PF: predicated region fallthrough
CT: control target
= control target key end

     0   :  { %s3336_s24 = smov 0   ;;  %s3736_s0 = inlined_call_operand.vmem [shape: bf16[8,2,32], index: 0, kind: input, shape index: {}]   ;;  %s3737_s1 = inlined_call_operand.vmem [shape: bf16[32,96], index: 1, kind: input, shape index: {}]   ;;  %s3738_s2 = inlined_call_operand.vmem [shape: f32[1,96], index: 2, kind: input, shape index: {}]   ;;  %s3739_s3 = inlined_call_operand.vmem [shape: bf16[4,8,32], index: 3, kind: input, shape index: {}]   ;;  %s3740_s4 = inlined_call_operand.vmem [shape: f32[1,32], index: 4, kind: input, shape index: {}]   ;;  %s3741_s5 = inlined_call_operand.vmem [shape: bf16[32,32], index: 5, kind: input, shape index: {}]   ;;  %s3742_s6 = inlined_call_operand.vmem [shape: f32[1,32], index: 6, kind: input, shape index: {}]   ;;  %s3743_s7 = inlined_call_operand.vmem [shape: bf16[8,2,32], index: 7, kind: output, shape index: {}]  }
   0x1 LB: > { %s2792_s25 = sadd.s32 4294967295, %s3275_s24   ;;  %p2796_p0 = scmp.ge.s32.totalorder %s3275_s24, 1  ;;  %s3275_s24 = sphi %s3336_s24, %s17_s24  }
   0x2   : > { %p237_p1 = scmp.lt.s32.totalorder %s3275_s24, 3 }
   0x4   : > { %p238_p2 = pnand %p2796_p0, %p237_p1 }
   0x5   : > { %s2797_s26 = sshll.u32 (!%p238_p2), %s2792_s25, 2  ;;  %v295_v0 = vlaneseq (!%p238_p2)  ;;  %v3277_v1 = vmov (!%p238_p2), 1983009808   ;;  %vm308_vm0 = vcmask (!%p238_p2), 261120   ;;  %v3278_v20 = vmov (!%p238_p2), 269488144  }
   0x6   : > { %241 = sbr.rel (%p238_p2) target bundleno = 4184 (0x1058), region = 48  ;;  %p268_p3 = scmp.lt.s32.totalorder (!%p238_p2), %s2797_s26, 7  ;;  %v293_v2 = vunpack.c.l.s4 (!%p238_p2), %v3277_v1  ;;  %v316_v21 = vunpack.c.l.s4 (!%p238_p2), %v3278_v20  ;;  %v3279_v22 = vmov (!%p238_p2), 842150450   ;;  %v3280_v24 = vmov (!%p238_p2), 1414812756  }
   0x7   : > { %v3346_v4 = vshrl.u32 (!%p238_p2), %v295_v0, 7  ;;  %v323_v23 = vunpack.c.l.s4 (!%p238_p2), %v3279_v22  ;;  %v330_v25 = vunpack.c.l.s4 (!%p238_p2), %v3280_v24  ;;  %v3281_v26 = vmov (!%p238_p2), 1987475062   ;;  %v3199_v56 = vld [vmem:[%s3737_s1] sm:$0xff] (!%p238_p2)   ;;  %v3200_v58 = vld [vmem:[%s3737_s1 + $0x8] sm:$0xff] (!%p238_p2)   ;;  %s3285_s13 = smov (!%p238_p2), 96  }
   0x8   : > { %v294_v3 = vunpack.c.0.s8 (!%p238_p2), %v293_v2  ;;  %v337_v27 = vunpack.c.l.s4 (!%p238_p2), %v3281_v26  ;;  %v317_v28 = vunpack.c.0.s8 (!%p238_p2), %v316_v21  ;;  %v3282_v57 = vmov (!%p238_p2), 0.0   ;;  %v2799_v22 = vld [vmem:[%s3738_s2] ss:$0 sm:$0xff] (!%p238_p2)  ;;  %s3286_s14 = smov (!%p238_p2), 64   ;;  %s3287_s15 = smov (!%p238_p2), 88  }
   0x9   : > { %v324_v29 = vunpack.c.0.s8 (!%p238_p2), %v323_v23  ;;  %v331_v30 = vunpack.c.0.s8 (!%p238_p2), %v330_v25  ;;  %2927 = vmatprep.subr.bf16.mxu0 (!%p238_p2), %v3282_v57  ;;  %vm3283_vm1 = vmmov (!%p238_p2), 0   ;;  %2935 = vmatprep.subr.bf16.mxu1 (!%p238_p2), %v3282_v57  ;;  %vm559_vm2 = vcmask (!%p238_p2), 64512   ;;  %s3288_s16 = smov (!%p238_p2), 120   ;;  %s3289_s19 = smov (!%p238_p2), 56  }
   0xa   : > { %v3359_v12 = vsub.s32 (!%p238_p2), %v294_v3, %v3346_v4  ;;  %v338_v31 = vunpack.c.0.s8 (!%p238_p2), %v337_v27  ;;  %v320_v32 = vsub.s32 (!%p238_p2), %v317_v28, %v3346_v4  ;;  %2931 = vmatprep.mubr.msk.bf16.mxu0 (!%p238_p2), %vm3283_vm1, %v3282_v57  ;;  %2928 = vmatpush3.bf16.msra.mxu0 (!%p238_p2), %v3199_v56  ;;  %vm792_vm3 = vcmask (!%p238_p2), 9216   ;;  %s3290_s20 = smov (!%p238_p2), 80   ;;  %s3291_s21 = smov (!%p238_p2), 112  }
   0xb   : > { %v327_v33 = vsub.s32 (!%p238_p2), %v324_v29, %v3346_v4  ;;  %v334_v34 = vsub.s32 (!%p238_p2), %v331_v30, %v3346_v4  ;;  %2929 = vmatprep.subr.bf16.mxu0 (!%p238_p2), %v3282_v57  ;;  %2937 = vmatprep.mubr.msk.bf16.mxu1 (!%p238_p2), %vm3283_vm1, %v3282_v57  ;;  %vm847_vm4 = vcmask (!%p238_p2), 1040384   ;;  %vm843_vm5 = vcmask (!%p238_p2), 15360   ;;  %s3292_s25 = smov (!%p238_p2), 48   ;;  %s3293_s27 = smov (!%p238_p2), 72  }
   0xc   : > { %v341_v35 = vsub.s32 (!%p238_p2), %v338_v31, %v3346_v4  ;;  %vm1062_vm6 = vcmask (!%p238_p2), 1043456   ;;  %s3294_s28 = smov (!%p238_p2), 104   ;;  %s3295_s8 = smov (!%p238_p2), 40   ;;  %vm2740_vm7 = vcmask (!%p238_p2), 253952  }
   0xd   : > { %s3745_s26 = smov (!%p268_p3, %s2797_s26), 7 }
   0xe   : > { %s270_s29 = scalar_lea.vmem %s3736_s0, %s3745_s26  ;;  %2930 = vmatpush3.bf16.msra.mxu0 %v3200_v58 }
   0xf   : > { %v278_v5 = vld [vmem:[%s270_s29] sm:$0x1]  ;;  %v279_v6 = vld [vmem:[%s270_s29 + $0x1] sm:$0x1]  ;;  %v280_v7 = vld [vmem:[%s270_s29 + $0x2] sm:$0x1]  ;;  %2941 = vmatprep.subr.bf16.mxu0 %v3282_v57 }
  0x10   : > { %v281_v8 = vld [vmem:[%s270_s29 + $0x3] sm:$0x1]  ;;  %v3352_v9 = vunpack.c.l.bf16 %v278_v5  ;;  %v3354_v10 = vunpack.c.l.bf16 %v279_v6  ;;  %v3356_v11 = vunpack.c.l.bf16 %v280_v7 }
  0x11   : > { %v3361_v13 = vunpack.c.l.bf16 %v281_v8 }
  0x12   : > { %v290_v14 = vcombine.low %v3352_v9, %v3354_v10 }
  0x13   : > { %v291_v15 = vcombine.low %v3356_v11, %v3361_v13 }
  0x14   : > { %v298_v16 = vrot.slane %v290_v14, %v3359_v12 }
  0x15   : > { %v305_v17 = vrot.slane %v291_v15, %v3359_v12 }
  0x17   : > { %v306_v18 = vcombine.low %v298_v16, %v305_v17 }
  0x19   : > { %v309_v19 = vsel %vm308_vm0, %v306_v18, 0.0 }
  0x1a   : > { %310 = vadd.xlane.f32.xlu0 %v309_v19  ;;  %v3284_v19 = vmov 1966171168  }
  0x1b   : > { %v520_v20 = vunpack.c.l.s4 %v3284_v19 }
  0x1d   : > { %v521_v21 = vunpack.c.0.s8 %v520_v20 }
  0x1f   : > { %v524_v25 = vsub.s32 %v521_v21, %v3346_v4 }
  0xa7   : > { %v311_v36 = vpop.xlane.xlu0 %310 }
  0xa8   : > { %v313_v37 = vmul.f32 0.03125, %v311_v36 }
  0xaa   : > { %v321_v38 = vrot.slane %v313_v37, %v320_v32  ;;  %v328_v39 = vrot.slane %v313_v37, %v327_v33  ;;  %v335_v40 = vrot.slane %v313_v37, %v334_v34  ;;  %v342_v41 = vrot.slane %v313_v37, %v341_v35 }
  0xac   : > { %v347_v42 = vsub.f32 %v3352_v9, %v321_v38  ;;  %v348_v43 = vsub.f32 %v3354_v10, %v328_v39  ;;  %v349_v44 = vsub.f32 %v3356_v11, %v335_v40  ;;  %v350_v45 = vsub.f32 %v3361_v13, %v342_v41 }
  0xae   : > { %v351_v46 = vmul.f32 %v347_v42, %v347_v42  ;;  %v352_v47 = vmul.f32 %v348_v43, %v348_v43  ;;  %v353_v48 = vmul.f32 %v349_v44, %v349_v44  ;;  %v354_v49 = vmul.f32 %v350_v45, %v350_v45 }
  0xb0   : > { %v359_v50 = vcombine.low %v351_v46, %v352_v47  ;;  %v360_v51 = vcombine.low %v353_v48, %v354_v49 }
  0xb2   : > { %v367_v52 = vrot.slane %v359_v50, %v3359_v12  ;;  %v374_v53 = vrot.slane %v360_v51, %v3359_v12 }
  0xb4   : > { %v375_v54 = vcombine.low %v367_v52, %v374_v53 }
  0xb6   : > { %v377_v55 = vsel %vm308_vm0, %v375_v54, 0.0 }
  0xb7   : > { %378 = vadd.xlane.f32.xlu0 %v377_v55 }
 0x144   : > { %v379_v59 = vpop.xlane.xlu0 %378 }
 0x145   : > { %v380_v60 = vmul.f32 0.03125, %v379_v59 }
 0x147   : > { %v381_v61 = vadd.f32 1e-05, %v380_v60 }
 0x149   : > { %3203 = vrsqrt.f32 %v381_v61 }
 0x153   : > { %v3204_v62 = vpop.eup %3203 }
 0x154   : > { %v390_v63 = vrot.slane %v3204_v62, %v320_v32  ;;  %v397_v0 = vrot.slane %v3204_v62, %v327_v33  ;;  %v404_v1 = vrot.slane %v3204_v62, %v334_v34  ;;  %v411_v2 = vrot.slane %v3204_v62, %v341_v35 }
 0x156   : > { %v416_v3 = vmul.f32 %v390_v63, %v347_v42  ;;  %v417_v5 = vmul.f32 %v397_v0, %v348_v43  ;;  %v418_v6 = vmul.f32 %v404_v1, %v349_v44  ;;  %v419_v7 = vmul.f32 %v411_v2, %v350_v45 }
 0x158   : > { %v424_v8 = vcombine.low %v416_v3, %v417_v5  ;;  %v425_v14 = vcombine.low %v418_v6, %v419_v7 }
 0x15a   : > { %v432_v15 = vrot.slane %v424_v8, %v3359_v12  ;;  %v439_v16 = vrot.slane %v425_v14, %v3359_v12 }
 0x15c   : > { %v440_v17 = vcombine.low %v432_v15, %v439_v16 }
 0x15e   : > { %v442_v18 = vpack.c.bf16 %v440_v17, %v440_v17 }
 0x160   : > { %2932 = vmatmul.mubr.msk.bf16.vlgmr.msra.gmra.mrb[0].mxu0 %vm308_vm0, %v442_v18 }
 0x161   : > { %2943 = vmatprep.mubr.msk.bf16.mxu0 %vm3283_vm1, %v3282_v57 }
 0x233   : > { %v503_v23 = vpop.f32.mrb[0].mxu0 }
 0x234   : > { %v504_v24 = vadd.f32 %v2799_v22, %v503_v23  ;;  %v2933_v26 = vpop.f32.mrb[1].mxu0 }
 0x235   : > { %v506_v27 = vpop.f32.mrb[2].mxu0 }
 0x236   : > { %v509_v28 = vpack.c.bf16 %v504_v24, %v504_v24  ;;  %v2934_v29 = vpop.f32.mrb[3].mxu0 }
 0x238   : > { %v525_v30 = vrot.slane %v509_v28, %v524_v25 }
 0x23a   : > { %v526_v31 = vcombine.high %v525_v30, %v525_v30  ;;  %v533_v32 = vrot.slane %v525_v30, %v524_v25 }
 0x23c   : > { %v540_v33 = vrot.slane %v526_v31, %v524_v25  ;;  %v541_v34 = vcombine.high %v533_v32, %v533_v32  ;;  %v549_v35 = vrot.slane %v533_v32, %v524_v25 }
 0x23e   : > { %v542_v36 = vcombine.high %v540_v33, %v540_v33  ;;  %v3404_v37 = vrot.slane %v549_v35, %v524_v25  ;;  %v612_v38 = vrot.slane %v540_v33, %v524_v25  ;;  %v674_v39 = vrot.slane %v541_v34, %v524_v25 }
 0x240   : > { %v3406_v40 = vrot.slane %v674_v39, %v524_v25  ;;  %557 = vrot.lane.b32.xlu1 %v3404_v37, %s3285_s13  ;;  %v3409_v4 = vrot.slane %v612_v38, %v524_v25  ;;  %v736_v41 = vrot.slane %v542_v36, %v524_v25 }
 0x242   : > { %682 = vrot.lane.b32.xlu0 %v3406_v40, %s3285_s13  ;;  %v3413_v42 = vrot.slane %v736_v41, %v524_v25 }
 0x244   : > { %620 = vrot.lane.b32.xlu1 %v3409_v4, %s3285_s13 }
 0x248   : > { %744 = vrot.lane.b32.xlu1 %v3413_v42, %s3285_s13 }
 0x2b2   : > { %v558_v43 = vpop.permute.xlu1 %557 }
 0x2b3   : > { %v564_v44 = vsel %vm559_vm2, %v558_v43, 0 }
 0x2b4   : > { %2936 = vmatpush3.bf16.xpose.msra.mxu1 %v564_v44  ;;  %v683_v47 = vpop.permute.xlu0 %682 }
 0x2b5   : > { %2947 = vmatprep.subr.bf16.mxu1 %v3282_v57  ;;  %v688_v48 = vsel %vm559_vm2, %v683_v47, 0 }
 0x2b6   : > { %v621_v45 = vpop.permute.xlu1 %620 }
 0x2b7   : > { %v626_v46 = vsel %vm559_vm2, %v621_v45, 0 }
 0x2b8   : > { %2942 = vmatpush3.bf16.xpose.msra.mxu0 %v626_v46 }
 0x2b9   : > { %2953 = vmatprep.subr.bf16.mxu0 %v3282_v57 }
 0x2ba   : > { %v745_v49 = vpop.permute.xlu1 %744 }
 0x2bb   : > { %2938 = vmatmul.mubr.msk.bf16.vlgmr.msra.gmra.mrb[0].mxu1 %vm559_vm2, %v533_v32  ;;  %v750_v50 = vsel %vm559_vm2, %v745_v49, 0 }
 0x2bc   : > { %2948 = vmatpush3.bf16.xpose.msra.mxu1 %v688_v48  ;;  %2949 = vmatprep.mubr.msk.bf16.mxu1 %vm3283_vm1, %v3282_v57 }
 0x2bd   : > { %2959 = vmatprep.subr.bf16.mxu1 %v3282_v57 }
 0x2bf   : > { %2944 = vmatmul.mubr.msk.bf16.vlgmr.msra.gmra.mrb[4].mxu0 %vm559_vm2, %v540_v33 }
 0x2c0   : > { %2954 = vmatpush3.bf16.xpose.msra.mxu0 %v750_v50  ;;  %2955 = vmatprep.mubr.msk.bf16.mxu0 %vm3283_vm1, %v3282_v57 }
 0x2c1   : > { %2965 = vmatprep.subr.bf16.mxu0 %v3282_v57 }
 0x2c3   : > { %2950 = vmatmul.mubr.msk.bf16.vlgmr.msra.gmra.mrb[4].mxu1 %vm559_vm2, %v541_v34 }
 0x2c4   : > { %2961 = vmatprep.mubr.msk.bf16.mxu1 %vm3283_vm1, %v3282_v57 }
 0x2c7   : > { %2956 = vmatmul.mubr.msk.bf16.vlgmr.msra.gmra.mrb[8].mxu0 %vm559_vm2, %v542_v36 }
 0x2c8   : > { %2967 = vmatprep.mubr.msk.bf16.mxu0 %vm3283_vm1, %v3282_v57 }
 0x38e   : > { %v600_v51 = vpop.f32.mrb[0].mxu1 }
 0x38f   : > { %v2939_v52 = vpop.f32.mrb[1].mxu1  ;;  %v793_v53 = vsel %vm792_vm3, %v600_v51, -inf }
 0x390   : > { %v603_v54 = vpop.f32.mrb[2].mxu1  ;;  %794 = vmax.xlane.f32.xlu1 %v793_v53 }
 0x391   : > { %v2940_v55 = vpop.f32.mrb[3].mxu1 }
 0x392   : > { %v662_v56 = vpop.f32.mrb[4].mxu0 }
 0x393   : > { %v2945_v58 = vpop.f32.mrb[5].mxu0  ;;  %v796_v59 = vsel %vm792_vm3, %v662_v56, -inf }
 0x394   : > { %797 = vmax.xlane.f32.xlu0 %v796_v59  ;;  %v665_v60 = vpop.f32.mrb[6].mxu0 }
 0x395   : > { %v2946_v61 = vpop.f32.mrb[7].mxu0 }
 0x396   : > { %v724_v62 = vpop.f32.mrb[4].mxu1 }
 0x397   : > { %v2951_v63 = vpop.f32.mrb[5].mxu1  ;;  %v799_v0 = vsel %vm792_vm3, %v724_v62, -inf }
 0x398   : > { %v727_v1 = vpop.f32.mrb[6].mxu1  ;;  %800 = vmax.xlane.f32.xlu1 %v799_v0 }
 0x399   : > { %v2952_v2 = vpop.f32.mrb[7].mxu1 }
 0x39a   : > { %v786_v3 = vpop.f32.mrb[8].mxu0 }
 0x39b   : > { %v2957_v5 = vpop.f32.mrb[9].mxu0  ;;  %v802_v6 = vsel %vm792_vm3, %v786_v3, -inf }
 0x39c   : > { %803 = vmax.xlane.f32.xlu1 %v802_v6  ;;  %v789_v7 = vpop.f32.mrb[10].mxu0  ;;  %v1058_v5 = vld [vmem:[%s3739_s3] sm:$0xf] }
 0x39d   : > { %v2958_v8 = vpop.f32.mrb[11].mxu0  ;;  %v1064_v6 = vsel %vm1062_vm6, %v1058_v5, 0 }
 0x3aa   : > { %841 = vrot.lane.b32.xlu0 %v3404_v37, %s3286_s14 }
 0x3ad   : > { %891 = vrot.lane.b32.xlu1 %v3409_v4, %s3286_s14 }
 0x41d   : > { %v795_v14 = vpop.xlane.xlu1 %794 }
 0x41e   : > { %v805_v15 = vsub.f32 %v600_v51, %v795_v14 }
 0x420   : > { %v809_v16 = vmul.f32 1.442695, %v805_v15 }
 0x421   : > { %v798_v17 = vpop.xlane.xlu0 %797 }
 0x422   : > { %3205 = vpow2.f32 %v809_v16  ;;  %v806_v18 = vsub.f32 %v662_v56, %v798_v17 }
 0x424   : > { %v811_v19 = vmul.f32 1.442695, %v806_v18 }
 0x425   : > { %v801_v20 = vpop.xlane.xlu1 %800  ;;  %v842_v21 = vpop.permute.xlu0 %841 }
 0x426   : > { %3207 = vpow2.f32 %v811_v19  ;;  %v807_v22 = vsub.f32 %v724_v62, %v801_v20  ;;  %v849_v23 = vsel %vm847_vm4, %v842_v21, 0 }
 0x427   : > { %2960 = vmatpush3.bf16.msra.mxu1 %v849_v23 }
 0x428   : > { %v813_v24 = vmul.f32 1.442695, %v807_v22  ;;  %2971 = vmatprep.subr.bf16.mxu1 %v3282_v57 }
 0x429   : > { %v804_v25 = vpop.xlane.xlu1 %803 }
 0x42a   : > { %3209 = vpow2.f32 %v813_v24  ;;  %v808_v26 = vsub.f32 %v786_v3, %v804_v25 }
 0x42c   : > { %v3206_v27 = vpop.eup %3205  ;;  %v815_v28 = vmul.f32 1.442695, %v808_v26 }
 0x42d   : > { %v892_v29 = vpop.permute.xlu1 %891  ;;  %v817_v30 = vsel %vm792_vm3, %v3206_v27, 0.0 }
 0x42e   : > { %3211 = vpow2.f32 %v815_v28  ;;  %v897_v31 = vsel %vm847_vm4, %v892_v29, 0  ;;  %818 = vadd.xlane.f32.xlu1 %v817_v30 }
 0x42f   : > { %2966 = vmatpush3.bf16.msra.mxu0 %v897_v31 }
 0x430   : > { %v3208_v32 = vpop.eup %3207  ;;  %2977 = vmatprep.subr.bf16.mxu0 %v3282_v57 }
 0x431   : > { %v820_v33 = vsel %vm792_vm3, %v3208_v32, 0.0 }
 0x432   : > { %821 = vadd.xlane.f32.xlu1 %v820_v33 }
 0x434   : > { %v3210_v34 = vpop.eup %3209 }
 0x435   : > { %v823_v35 = vsel %vm792_vm3, %v3210_v34, 0.0 }
 0x436   : > { %824 = vadd.xlane.f32.xlu0 %v823_v35 }
 0x438   : > { %v3212_v36 = vpop.eup %3211 }
 0x439   : > { %v826_v38 = vsel %vm792_vm3, %v3212_v36, 0.0 }
 0x43a   : > { %827 = vadd.xlane.f32.xlu1 %v826_v38 }
 0x44b   : > { %939 = vrot.lane.b32.xlu1 %v3406_v40, %s3286_s14 }
 0x44c   : > { %987 = vrot.lane.b32.xlu0 %v3413_v42, %s3286_s14 }
 0x44f   : > { %1109 = vrot.lane.b32.xlu1 %v3404_v37, %s3287_s15 }
 0x450   : > { %1159 = vrot.lane.b32.xlu0 %v3409_v4, %s3287_s15 }
 0x453   : > { %1107 = vrot.lane.b32.xlu1 %v3404_v37, %s3288_s16 }
 0x454   : > { %1157 = vrot.lane.b32.xlu0 %v3409_v4, %s3288_s16 }
 0x457   : > { %1209 = vrot.lane.b32.xlu1 %v3406_v40, %s3287_s15 }
 0x458   : > { %1259 = vrot.lane.b32.xlu0 %v3413_v42, %s3287_s15 }
 0x45b   : > { %1207 = vrot.lane.b32.xlu1 %v3406_v40, %s3288_s16 }
 0x45c   : > { %1257 = vrot.lane.b32.xlu0 %v3413_v42, %s3288_s16 }
 0x4bb   : > { %v819_v39 = vpop.xlane.xlu1 %818 }
 0x4bc   : > { %3213 = vrcp.f32 %v819_v39 }
 0x4bf   : > { %v822_v41 = vpop.xlane.xlu1 %821 }
 0x4c0   : > { %3215 = vrcp.f32 %v822_v41 }
 0x4c3   : > { %v825_v43 = vpop.xlane.xlu0 %824 }
 0x4c4   : > { %3217 = vrcp.f32 %v825_v43 }
 0x4c6   : > { %v3214_v44 = vpop.eup %3213 }
 0x4c7   : > { %v833_v45 = vmul.f32 %v3214_v44, %v3206_v27  ;;  %v828_v46 = vpop.xlane.xlu1 %827  ;;  %v988_v51 = vpop.permute.xlu0 %987 }
 0x4c8   : > { %3219 = vrcp.f32 %v828_v46  ;;  %v993_v56 = vsel %vm847_vm4, %v988_v51, 0 }
 0x4c9   : > { %v837_v47 = vpack.c.bf16 %v833_v45, %v833_v45 }
 0x4ca   : > { %v3216_v48 = vpop.eup %3215 }
 0x4cb   : > { %v834_v49 = vmul.f32 %v3216_v48, %v3208_v32  ;;  %2962 = vmatmul.mubr.msk.bf16.vlgmr.msra.gmra.mrb[8].mxu1 %vm843_vm5, %v837_v47  ;;  %v940_v50 = vpop.permute.xlu1 %939  ;;  %v1160_v28 = vpop.permute.xlu0 %1159 }
 0x4cc   : > { %v945_v52 = vsel %vm847_vm4, %v940_v50, 0  ;;  %2973 = vmatprep.mubr.msk.bf16.mxu1 %vm3283_vm1, %v3282_v57 }
 0x4cd   : > { %2972 = vmatpush3.bf16.msra.mxu1 %v945_v52  ;;  %v838_v53 = vpack.c.bf16 %v834_v49, %v834_v49 }
 0x4ce   : > { %v3218_v54 = vpop.eup %3217  ;;  %2983 = vmatprep.subr.bf16.mxu1 %v3282_v57 }
 0x4cf   : > { %v835_v55 = vmul.f32 %v3218_v54, %v3210_v34  ;;  %2968 = vmatmul.mubr.msk.bf16.vlgmr.msra.gmra.mrb[12].mxu0 %vm843_vm5, %v838_v53  ;;  %v1110_v58 = vpop.permute.xlu1 %1109  ;;  %v1158_v35 = vpop.permute.xlu0 %1157 }
 0x4d0   : > { %2978 = vmatpush3.bf16.msra.mxu0 %v993_v56  ;;  %2979 = vmatprep.mubr.msk.bf16.mxu0 %vm3283_vm1, %v3282_v57  ;;  %v1115_v0 = vsel %vm559_vm2, %v1110_v58, 0 }
 0x4d1   : > { %v839_v59 = vpack.c.bf16 %v835_v55, %v835_v55  ;;  %2989 = vmatprep.subr.bf16.mxu0 %v3282_v57 }
 0x4d2   : > { %v3220_v60 = vpop.eup %3219 }
 0x4d3   : > { %v836_v61 = vmul.f32 %v3220_v60, %v3212_v36  ;;  %2974 = vmatmul.mubr.msk.bf16.vlgmr.msra.gmra.mrb[12].mxu1 %vm843_vm5, %v839_v59  ;;  %v1108_v63 = vpop.permute.xlu1 %1107  ;;  %v1165_v36 = vsel %vm559_vm2, %v1160_v28, 0  ;;  %v1260_v45 = vpop.permute.xlu0 %1259 }
 0x4d4   : > { %2985 = vmatprep.mubr.msk.bf16.mxu1 %vm3283_vm1, %v3282_v57  ;;  %2984 = vmatpush3.bf16.msra.mxu1 %v1064_v6  ;;  %v1265_v46 = vsel %vm559_vm2, %v1260_v45, 0 }
 0x4d5   : > { %v840_v62 = vpack.c.bf16 %v836_v61, %v836_v61  ;;  %2995 = vmatprep.subr.bf16.mxu1 %v3282_v57 }
 0x4d7   : > { %2980 = vmatmul.mubr.msk.bf16.vlgmr.msra.gmra.mrb[16].mxu0 %vm843_vm5, %v840_v62  ;;  %v1210_v1 = vpop.permute.xlu1 %1209  ;;  %v1258_v51 = vpop.permute.xlu0 %1257 }
 0x4d8   : > { %2991 = vmatprep.mubr.msk.bf16.mxu0 %vm3283_vm1, %v3282_v57  ;;  %v1215_v2 = vsel %vm559_vm2, %v1210_v1, 0 }
 0x4d9   : > { %2990 = vmatpush3.bf16.xpose.msra.mxu0 %v1115_v0 }
 0x4da   : > { %3001 = vmatprep.subr.bf16.mxu0 %v3282_v57 }
 0x4db   : > { %v1208_v3 = vpop.permute.xlu1 %1207 }
 0x4e0   : > { %2992 = vmatmul.mubr.msk.bf16.vlgmr.msra.gmra.mrb[20].mxu0 %vm559_vm2, %v1108_v63 }
 0x4e1   : > { %3002 = vmatpush3.bf16.xpose.msra.mxu0 %v1215_v2  ;;  %3003 = vmatprep.mubr.msk.bf16.mxu0 %vm3283_vm1, %v3282_v57 }
 0x4e2   : > { %3013 = vmatprep.subr.bf16.mxu0 %v3282_v57 }
 0x4e8   : > { %3004 = vmatmul.mubr.msk.bf16.vlgmr.msra.gmra.mrb[24].mxu0 %vm559_vm2, %v1208_v3 }
 0x4e9   : > { %3015 = vmatprep.mubr.msk.bf16.mxu0 %vm3283_vm1, %v3282_v57 }
 0x59e   : > { %v885_v7 = vpop.f32.mrb[8].mxu1 }
 0x59f   : > { %v2963_v8 = vpop.f32.mrb[9].mxu1 }
 0x5a0   : > { %v888_v14 = vpop.f32.mrb[10].mxu1 }
 0x5a1   : > { %v2964_v15 = vpop.f32.mrb[11].mxu1 }
 0x5a2   : > { %v933_v16 = vpop.f32.mrb[12].mxu0 }
 0x5a3   : > { %v1039_v17 = vcombine.low %v885_v7, %v933_v16  ;;  %v2969_v18 = vpop.f32.mrb[13].mxu0 }
 0x5a4   : > { %v936_v19 = vpop.f32.mrb[14].mxu0 }
 0x5a5   : > { %v2970_v20 = vpop.f32.mrb[15].mxu0  ;;  %v1047_v30 = vrot.slane %v1039_v17, %v3359_v12 }
 0x5a6   : > { %v981_v21 = vpop.f32.mrb[12].mxu1 }
 0x5a7   : > { %v2975_v22 = vpop.f32.mrb[13].mxu1 }
 0x5a8   : > { %v984_v23 = vpop.f32.mrb[14].mxu1 }
 0x5a9   : > { %v2976_v24 = vpop.f32.mrb[15].mxu1 }
 0x5aa   : > { %v1029_v25 = vpop.f32.mrb[16].mxu0 }
 0x5ab   : > { %v1040_v26 = vcombine.low %v981_v21, %v1029_v25  ;;  %v2981_v27 = vpop.f32.mrb[17].mxu0 }
 0x5ac   : > { %v1032_v29 = vpop.f32.mrb[18].mxu0 }
 0x5ad   : > { %v1054_v31 = vrot.slane %v1040_v26, %v3359_v12  ;;  %v2982_v32 = vpop.f32.mrb[19].mxu0 }
 0x5af   : > { %v1055_v33 = vcombine.low %v1047_v30, %v1054_v31 }
 0x5b1   : > { %v1057_v34 = vpack.c.bf16 %v1055_v33, %v1055_v33 }
 0x5b3   : > { %v1151_v38 = vpop.f32.mrb[20].mxu0  ;;  %2986 = vmatmul.mubr.msk.bf16.vlgmr.msra.gmra.mrb[16].mxu1 %vm559_vm2, %v1057_v34 }
 0x5b4   : > { %v2993_v39 = vpop.f32.mrb[21].mxu0  ;;  %2996 = vmatpush3.bf16.xpose.msra.mxu1 %v1165_v36  ;;  %v1307_v41 = vsel %vm792_vm3, %v1151_v38, -inf  ;;  %2997 = vmatprep.mubr.msk.bf16.mxu1 %vm3283_vm1, %v3282_v57 }
 0x5b5   : > { %1308 = vmax.xlane.f32.xlu1 %v1307_v41  ;;  %v1154_v43 = vpop.f32.mrb[22].mxu0  ;;  %3007 = vmatprep.subr.bf16.mxu1 %v3282_v57 }
 0x5b6   : > { %v2994_v44 = vpop.f32.mrb[23].mxu0 }
 0x5bb   : > { %v1251_v47 = vpop.f32.mrb[24].mxu0  ;;  %2998 = vmatmul.mubr.msk.bf16.vlgmr.msra.gmra.mrb[20].mxu1 %vm559_vm2, %v1158_v35 }
 0x5bc   : > { %v3005_v48 = vpop.f32.mrb[25].mxu0  ;;  %3008 = vmatpush3.bf16.xpose.msra.mxu1 %v1265_v46  ;;  %3009 = vmatprep.mubr.msk.bf16.mxu1 %vm3283_vm1, %v3282_v57  ;;  %v1313_v61 = vsel %vm792_vm3, %v1251_v47, -inf }
 0x5bd   : > { %v1254_v49 = vpop.f32.mrb[26].mxu0  ;;  %3019 = vmatprep.subr.bf16.mxu1 %v3282_v57 }
 0x5be   : > { %v3006_v50 = vpop.f32.mrb[27].mxu0 }
 0x5c3   : > { %3010 = vmatmul.mubr.msk.bf16.vlgmr.msra.gmra.mrb[24].mxu1 %vm559_vm2, %v1258_v51 }
 0x5c4   : > { %3021 = vmatprep.mubr.msk.bf16.mxu1 %vm3283_vm1, %v3282_v57 }
 0x642   : > { %v1309_v52 = vpop.xlane.xlu1 %1308 }
 0x643   : > { %v1319_v53 = vsub.f32 %v1151_v38, %v1309_v52 }
 0x645   : > { %v1323_v54 = vmul.f32 1.442695, %v1319_v53 }
 0x647   : > { %3221 = vpow2.f32 %v1323_v54 }
 0x651   : > { %v3222_v62 = vpop.eup %3221 }
 0x652   : > { %v1331_v2 = vsel %vm792_vm3, %v3222_v62, 0.0 }
 0x68e   : > { %v1201_v55 = vpop.f32.mrb[20].mxu1 }
 0x68f   : > { %v2999_v56 = vpop.f32.mrb[21].mxu1  ;;  %v1310_v58 = vsel %vm792_vm3, %v1201_v55, -inf }
 0x690   : > { %1311 = vmax.xlane.f32.xlu0 %v1310_v58  ;;  %v1204_v59 = vpop.f32.mrb[22].mxu1 }
 0x691   : > { %v3000_v60 = vpop.f32.mrb[23].mxu1 }
 0x694   : > { %1314 = vmax.xlane.f32.xlu0 %v1313_v61 }
 0x696   : > { %v1301_v63 = vpop.f32.mrb[24].mxu1 }
 0x697   : > { %v3011_v0 = vpop.f32.mrb[25].mxu1  ;;  %v1316_v1 = vsel %vm792_vm3, %v1301_v63, -inf }
 0x698   : > { %v1304_v3 = vpop.f32.mrb[26].mxu1  ;;  %1317 = vmax.xlane.f32.xlu1 %v1316_v1  ;;  %1332 = vadd.xlane.f32.xlu0 %v1331_v2 }
 0x699   : > { %v3012_v5 = vpop.f32.mrb[27].mxu1 }
 0x6a9   : > { %1403 = vrot.lane.b32.xlu1 %v3409_v4, %s3289_s19 }
 0x71d   : > { %v1312_v6 = vpop.xlane.xlu0 %1311 }
 0x71e   : > { %v1320_v7 = vsub.f32 %v1201_v55, %v1312_v6 }
 0x720   : > { %v1325_v8 = vmul.f32 1.442695, %v1320_v7 }
 0x721   : > { %v1315_v14 = vpop.xlane.xlu0 %1314 }
 0x722   : > { %3223 = vpow2.f32 %v1325_v8  ;;  %v1321_v15 = vsub.f32 %v1251_v47, %v1315_v14 }
 0x724   : > { %v1327_v16 = vmul.f32 1.442695, %v1321_v15 }
 0x725   : > { %v1318_v17 = vpop.xlane.xlu1 %1317  ;;  %v1333_v28 = vpop.xlane.xlu0 %1332 }
 0x726   : > { %3225 = vpow2.f32 %v1327_v16  ;;  %v1322_v18 = vsub.f32 %v1301_v63, %v1318_v17  ;;  %v2821_v63 = vld [vmem:[%s3739_s3 + $0x4] sm:$0xf] }
 0x727   : > { %v1576_v0 = vsel %vm1062_vm6, %v2821_v63, 0 }
 0x728   : > { %v1329_v19 = vmul.f32 1.442695, %v1322_v18 }
 0x729   : > { %v1404_v20 = vpop.permute.xlu1 %1403 }
 0x72a   : > { %3227 = vpow2.f32 %v1329_v19  ;;  %v1409_v21 = vsel %vm847_vm4, %v1404_v20, 0 }
 0x72b   : > { %3020 = vmatpush3.bf16.msra.mxu1 %v1409_v21  ;;  %3229 = vrcp.f32 %v1333_v28 }
 0x72c   : > { %v3224_v22 = vpop.eup %3223  ;;  %3031 = vmatprep.subr.bf16.mxu1 %v3282_v57 }
 0x72d   : > { %v1334_v23 = vsel %vm792_vm3, %v3224_v22, 0.0 }
 0x72e   : > { %1335 = vadd.xlane.f32.xlu1 %v1334_v23 }
 0x730   : > { %v3226_v24 = vpop.eup %3225 }
 0x731   : > { %v1337_v25 = vsel %vm792_vm3, %v3226_v24, 0.0 }
 0x732   : > { %1338 = vadd.xlane.f32.xlu0 %v1337_v25 }
 0x734   : > { %v3228_v26 = vpop.eup %3227 }
 0x735   : > { %v1340_v27 = vsel %vm792_vm3, %v3228_v26, 0.0  ;;  %v3230_v30 = vpop.eup %3229 }
 0x736   : > { %1341 = vadd.xlane.f32.xlu1 %v1340_v27  ;;  %v1347_v32 = vmul.f32 %v3230_v30, %v3222_v62 }
 0x738   : > { %v1351_v38 = vpack.c.bf16 %v1347_v32, %v1347_v32 }
 0x747   : > { %1451 = vrot.lane.b32.xlu1 %v3406_v40, %s3289_s19 }
 0x748   : > { %1355 = vrot.lane.b32.xlu0 %v3404_v37, %s3289_s19 }
 0x74b   : > { %1621 = vrot.lane.b32.xlu1 %v3404_v37, %s3290_s20 }
 0x74c   : > { %1499 = vrot.lane.b32.xlu0 %v3413_v42, %s3289_s19 }
 0x74f   : > { %1671 = vrot.lane.b32.xlu1 %v3409_v4, %s3290_s20 }
 0x750   : > { %1619 = vrot.lane.b32.xlu0 %v3404_v37, %s3291_s21 }
 0x753   : > { %1721 = vrot.lane.b32.xlu1 %v3406_v40, %s3290_s20 }
 0x754   : > { %1669 = vrot.lane.b32.xlu0 %v3409_v4, %s3291_s21 }
 0x757   : > { %1719 = vrot.lane.b32.xlu1 %v3406_v40, %s3291_s21 }
 0x758   : > { %1771 = vrot.lane.b32.xlu0 %v3413_v42, %s3290_s20 }
 0x75c   : > { %1769 = vrot.lane.b32.xlu0 %v3413_v42, %s3291_s21  ;;  %s275_s21 = scalar_lea.vmem %s3743_s7, %s3745_s26 }
 0x7bb   : > { %v1336_v29 = vpop.xlane.xlu1 %1335 }
 0x7bc   : > { %3231 = vrcp.f32 %v1336_v29 }
 0x7bf   : > { %v1339_v31 = vpop.xlane.xlu0 %1338 }
 0x7c0   : > { %3233 = vrcp.f32 %v1339_v31 }
 0x7c3   : > { %v1342_v33 = vpop.xlane.xlu1 %1341  ;;  %v1356_v34 = vpop.permute.xlu0 %1355 }
 0x7c4   : > { %3235 = vrcp.f32 %v1342_v33  ;;  %v1361_v35 = vsel %vm847_vm4, %v1356_v34, 0 }
 0x7c5   : > { %3014 = vmatpush3.bf16.msra.mxu0 %v1361_v35 }
 0x7c6   : > { %v3232_v36 = vpop.eup %3231  ;;  %3025 = vmatprep.subr.bf16.mxu0 %v3282_v57 }
 0x7c7   : > { %v1348_v39 = vmul.f32 %v3232_v36, %v3224_v22  ;;  %v1452_v41 = vpop.permute.xlu1 %1451  ;;  %v1500_v44 = vpop.permute.xlu0 %1499 }
 0x7c8   : > { %v1457_v43 = vsel %vm847_vm4, %v1452_v41, 0  ;;  %3016 = vmatmul.mubr.msk.bf16.vlgmr.msra.gmra.mrb[28].mxu0 %vm843_vm5, %v1351_v38  ;;  %v1505_v48 = vsel %vm847_vm4, %v1500_v44, 0 }
 0x7c9   : > { %3026 = vmatpush3.bf16.msra.mxu0 %v1457_v43  ;;  %v1352_v45 = vpack.c.bf16 %v1348_v39, %v1348_v39  ;;  %3027 = vmatprep.mubr.msk.bf16.mxu0 %vm3283_vm1, %v3282_v57 }
 0x7ca   : > { %v3234_v46 = vpop.eup %3233  ;;  %3043 = vmatprep.subr.bf16.mxu0 %v3282_v57 }
 0x7cb   : > { %v1349_v47 = vmul.f32 %v3234_v46, %v3226_v24  ;;  %3022 = vmatmul.mubr.msk.bf16.vlgmr.msra.gmra.mrb[28].mxu1 %vm843_vm5, %v1352_v45  ;;  %v1622_v51 = vpop.permute.xlu1 %1621  ;;  %v1620_v55 = vpop.permute.xlu0 %1619 }
 0x7cc   : > { %3032 = vmatpush3.bf16.msra.mxu1 %v1505_v48  ;;  %3033 = vmatprep.mubr.msk.bf16.mxu1 %vm3283_vm1, %v3282_v57  ;;  %v1627_v53 = vsel %vm559_vm2, %v1622_v51, 0 }
 0x7cd   : > { %v1353_v49 = vpack.c.bf16 %v1349_v47, %v1349_v47  ;;  %3037 = vmatprep.subr.bf16.mxu1 %v3282_v57 }
 0x7ce   : > { %v3236_v50 = vpop.eup %3235 }
 0x7cf   : > { %v1350_v52 = vmul.f32 %v3236_v50, %v3228_v26  ;;  %v1672_v56 = vpop.permute.xlu1 %1671  ;;  %v1670_v58 = vpop.permute.xlu0 %1669 }
 0x7d0   : > { %3028 = vmatmul.mubr.msk.bf16.vlgmr.msra.gmra.mrb[32].mxu0 %vm843_vm5, %v1353_v49  ;;  %v1677_v59 = vsel %vm559_vm2, %v1672_v56, 0 }
 0x7d1   : > { %v1354_v54 = vpack.c.bf16 %v1350_v52, %v1350_v52  ;;  %3045 = vmatprep.mubr.msk.bf16.mxu0 %vm3283_vm1, %v3282_v57 }
 0x7d2   : > { %3044 = vmatpush3.bf16.xpose.msra.mxu0 %v1627_v53 }
 0x7d3   : > { %3034 = vmatmul.mubr.msk.bf16.vlgmr.msra.gmra.mrb[32].mxu1 %vm843_vm5, %v1354_v54  ;;  %3049 = vmatprep.subr.bf16.mxu0 %v3282_v57  ;;  %v1772_v60 = vpop.permute.xlu0 %1771  ;;  %v1722_v28 = vpop.permute.xlu1 %1721 }
 0x7d4   : > { %3039 = vmatprep.mubr.msk.bf16.mxu1 %vm3283_vm1, %v3282_v57  ;;  %v1777_v61 = vsel %vm559_vm2, %v1772_v60, 0  ;;  %3038 = vmatpush3.bf16.msra.mxu1 %v1576_v0  ;;  %v1727_v34 = vsel %vm559_vm2, %v1722_v28, 0 }
 0x7d5   : > { %3055 = vmatprep.subr.bf16.mxu1 %v3282_v57 }
 0x7d7   : > { %v1770_v62 = vpop.permute.xlu0 %1769  ;;  %v1720_v41 = vpop.permute.xlu1 %1719 }
 0x7d9   : > { %3046 = vmatmul.mubr.msk.bf16.vlgmr.msra.gmra.mrb[36].mxu0 %vm559_vm2, %v1620_v55 }
 0x7da   : > { %3050 = vmatpush3.bf16.xpose.msra.mxu0 %v1677_v59  ;;  %3051 = vmatprep.mubr.msk.bf16.mxu0 %vm3283_vm1, %v3282_v57 }
 0x7db   : > { %3061 = vmatprep.subr.bf16.mxu0 %v3282_v57 }
 0x7e1   : > { %3052 = vmatmul.mubr.msk.bf16.vlgmr.msra.gmra.mrb[40].mxu0 %vm559_vm2, %v1670_v58 }
 0x7e2   : > { %3062 = vmatpush3.bf16.xpose.msra.mxu0 %v1777_v61  ;;  %3063 = vmatprep.mubr.msk.bf16.mxu0 %vm3283_vm1, %v3282_v57 }
 0x7e3   : > { %3073 = vmatprep.subr.bf16.mxu0 %v3282_v57 }
 0x7e9   : > { %3064 = vmatmul.mubr.msk.bf16.vlgmr.msra.gmra.mrb[44].mxu0 %vm559_vm2, %v1770_v62 }
 0x7ea   : > { %3075 = vmatprep.mubr.msk.bf16.mxu0 %vm3283_vm1, %v3282_v57 }
 0x89b   : > { %v1397_v1 = vpop.f32.mrb[28].mxu0 }
 0x89c   : > { %v3017_v2 = vpop.f32.mrb[29].mxu0 }
 0x89d   : > { %v1400_v3 = vpop.f32.mrb[30].mxu0 }
 0x89e   : > { %v3018_v5 = vpop.f32.mrb[31].mxu0  ;;  %v1445_v6 = vpop.f32.mrb[28].mxu1 }
 0x89f   : > { %v1551_v7 = vcombine.low %v1397_v1, %v1445_v6  ;;  %v3023_v8 = vpop.f32.mrb[29].mxu1 }
 0x8a0   : > { %v1448_v14 = vpop.f32.mrb[30].mxu1 }
 0x8a1   : > { %v3024_v15 = vpop.f32.mrb[31].mxu1  ;;  %v1559_v24 = vrot.slane %v1551_v7, %v3359_v12 }
 0x8a3   : > { %v1493_v16 = vpop.f32.mrb[32].mxu0 }
 0x8a4   : > { %v3029_v17 = vpop.f32.mrb[33].mxu0 }
 0x8a5   : > { %v1496_v18 = vpop.f32.mrb[34].mxu0 }
 0x8a6   : > { %v3030_v19 = vpop.f32.mrb[35].mxu0  ;;  %v1541_v20 = vpop.f32.mrb[32].mxu1 }
 0x8a7   : > { %v1552_v21 = vcombine.low %v1493_v16, %v1541_v20  ;;  %v3035_v22 = vpop.f32.mrb[33].mxu1 }
 0x8a8   : > { %v1544_v23 = vpop.f32.mrb[34].mxu1 }
 0x8a9   : > { %v1566_v25 = vrot.slane %v1552_v21, %v3359_v12  ;;  %v3036_v26 = vpop.f32.mrb[35].mxu1 }
 0x8ab   : > { %v1567_v27 = vcombine.low %v1559_v24, %v1566_v25 }
 0x8ac   : > { %v1663_v29 = vpop.f32.mrb[36].mxu0 }
 0x8ad   : > { %v1569_v30 = vpack.c.bf16 %v1567_v27, %v1567_v27  ;;  %v3047_v31 = vpop.f32.mrb[37].mxu0  ;;  %v1819_v32 = vsel %vm792_vm3, %v1663_v29, -inf }
 0x8ae   : > { %1820 = vmax.xlane.f32.xlu1 %v1819_v32  ;;  %v1666_v33 = vpop.f32.mrb[38].mxu0 }
 0x8af   : > { %3040 = vmatmul.mubr.msk.bf16.vlgmr.msra.gmra.mrb[16].mxu1 %vm559_vm2, %v1569_v30  ;;  %v3048_v35 = vpop.f32.mrb[39].mxu0 }
 0x8b0   : > { %3056 = vmatpush3.bf16.xpose.msra.mxu1 %v1727_v34  ;;  %3057 = vmatprep.mubr.msk.bf16.mxu1 %vm3283_vm1, %v3282_v57 }
 0x8b1   : > { %3067 = vmatprep.subr.bf16.mxu1 %v3282_v57 }
 0x8b4   : > { %v1713_v36 = vpop.f32.mrb[40].mxu0 }
 0x8b5   : > { %v3053_v38 = vpop.f32.mrb[41].mxu0  ;;  %v1822_v39 = vsel %vm792_vm3, %v1713_v36, -inf }
 0x8b6   : > { %1823 = vmax.xlane.f32.xlu0 %v1822_v39  ;;  %v1716_v43 = vpop.f32.mrb[42].mxu0 }
 0x8b7   : > { %v3054_v44 = vpop.f32.mrb[43].mxu0  ;;  %3058 = vmatmul.mubr.msk.bf16.vlgmr.msra.gmra.mrb[36].mxu1 %vm559_vm2, %v1720_v41 }
 0x8b8   : > { %3069 = vmatprep.mubr.msk.bf16.mxu1 %vm3283_vm1, %v3282_v57 }
 0x8bc   : > { %v1813_v45 = vpop.f32.mrb[44].mxu0 }
 0x8bd   : > { %v3065_v46 = vpop.f32.mrb[45].mxu0  ;;  %v1828_v47 = vsel %vm792_vm3, %v1813_v45, -inf }
 0x8be   : > { %1829 = vmax.xlane.f32.xlu1 %v1828_v47  ;;  %v1816_v48 = vpop.f32.mrb[46].mxu0 }
 0x8bf   : > { %v3066_v49 = vpop.f32.mrb[47].mxu0 }
 0x93b   : > { %v1821_v53 = vpop.xlane.xlu1 %1820 }
 0x93c   : > { %v1831_v62 = vsub.f32 %v1663_v29, %v1821_v53 }
 0x93e   : > { %v1835_v63 = vmul.f32 1.442695, %v1831_v62 }
 0x943   : > { %v1824_v50 = vpop.xlane.xlu0 %1823 }
 0x944   : > { %v1832_v51 = vsub.f32 %v1713_v36, %v1824_v50 }
 0x946   : > { %v1837_v52 = vmul.f32 1.442695, %v1832_v51 }
 0x948   : > { %3237 = vpow2.f32 %v1837_v52 }
 0x94b   : > { %v1830_v54 = vpop.xlane.xlu1 %1829 }
 0x94c   : > { %v1834_v55 = vsub.f32 %v1813_v45, %v1830_v54 }
 0x94e   : > { %v1841_v56 = vmul.f32 1.442695, %v1834_v55 }
 0x950   : > { %3239 = vpow2.f32 %v1841_v56 }
 0x951   : > { %3241 = vpow2.f32 %v1835_v63 }
 0x952   : > { %v3238_v58 = vpop.eup %3237 }
 0x953   : > { %v1846_v59 = vsel %vm792_vm3, %v3238_v58, 0.0 }
 0x954   : > { %1847 = vadd.xlane.f32.xlu1 %v1846_v59 }
 0x95a   : > { %v3588_v60 = vpop.eup %3239 }
 0x95b   : > { %v1852_v61 = vsel %vm792_vm3, %v3588_v60, 0.0  ;;  %v3242_v3 = vpop.eup %3241 }
 0x95c   : > { %1853 = vadd.xlane.f32.xlu1 %v1852_v61  ;;  %v1843_v7 = vsel %vm792_vm3, %v3242_v3, 0.0  ;;  %v2831_v61 = vld [vmem:[%s3739_s3 + $0x8] sm:$0xf] }
 0x95d   : > { %v2088_v62 = vsel %vm1062_vm6, %v2831_v61, 0 }
 0x96d   : > { %1915 = vrot.lane.b32.xlu1 %v3409_v4, %s3292_s25 }
 0x971   : > { %1963 = vrot.lane.b32.xlu1 %v3406_v40, %s3292_s25 }
 0x975   : > { %2133 = vrot.lane.b32.xlu1 %v3404_v37, %s3293_s27 }
 0x979   : > { %2131 = vrot.lane.b32.xlu1 %v3404_v37, %s3294_s28 }
 0x97d   : > { %2233 = vrot.lane.b32.xlu1 %v3406_v40, %s3293_s27 }
 0x981   : > { %2231 = vrot.lane.b32.xlu1 %v3406_v40, %s3294_s28 }
 0x98a   : > { %v1763_v0 = vpop.f32.mrb[36].mxu1 }
 0x98b   : > { %v3059_v1 = vpop.f32.mrb[37].mxu1  ;;  %v1825_v2 = vsel %vm792_vm3, %v1763_v0, -inf }
 0x98c   : > { %v1766_v5 = vpop.f32.mrb[38].mxu1  ;;  %1826 = vmax.xlane.f32.xlu0 %v1825_v2 }
 0x98d   : > { %v3060_v6 = vpop.f32.mrb[39].mxu1 }
 0x990   : > { %1844 = vadd.xlane.f32.xlu0 %v1843_v7 }
 0x9a6   : > { %1867 = vrot.lane.b32.xlu0 %v3404_v37, %s3292_s25 }
 0x9e1   : > { %v1848_v8 = vpop.xlane.xlu1 %1847 }
 0x9e2   : > { %3243 = vrcp.f32 %v1848_v8 }
 0x9e9   : > { %v1854_v14 = vpop.xlane.xlu1 %1853 }
 0x9ec   : > { %v3244_v15 = vpop.eup %3243 }
 0x9ed   : > { %v1860_v16 = vmul.f32 %v3244_v15, %v3238_v58  ;;  %v1916_v17 = vpop.permute.xlu1 %1915 }
 0x9ee   : > { %v1921_v18 = vsel %vm847_vm4, %v1916_v17, 0 }
 0x9ef   : > { %3074 = vmatpush3.bf16.msra.mxu0 %v1921_v18  ;;  %v1864_v19 = vpack.c.bf16 %v1860_v16, %v1860_v16 }
 0x9f0   : > { %3085 = vmatprep.subr.bf16.mxu0 %v3282_v57 }
 0x9f1   : > { %v1964_v30 = vpop.permute.xlu1 %1963 }
 0x9f2   : > { %3076 = vmatmul.mubr.msk.bf16.vlgmr.msra.gmra.mrb[48].mxu0 %vm843_vm5, %v1864_v19  ;;  %v1969_v32 = vsel %vm847_vm4, %v1964_v30, 0 }
 0x9f3   : > { %3087 = vmatprep.mubr.msk.bf16.mxu0 %vm3283_vm1, %v3282_v57 }
 0x9f5   : > { %v2134_v39 = vpop.permute.xlu1 %2133 }
 0x9f6   : > { %v2139_v46 = vsel %vm559_vm2, %v2134_v39, 0 }
 0x9f9   : > { %v2132_v45 = vpop.permute.xlu1 %2131 }
 0x9fd   : > { %v2234_v52 = vpop.permute.xlu1 %2233 }
 0x9fe   : > { %v2239_v53 = vsel %vm559_vm2, %v2234_v52, 0 }
 0xa01   : > { %v2232_v54 = vpop.permute.xlu1 %2231 }
 0xa19   : > { %v1827_v20 = vpop.xlane.xlu0 %1826 }
 0xa1a   : > { %v1833_v21 = vsub.f32 %v1763_v0, %v1827_v20 }
 0xa1c   : > { %v1839_v22 = vmul.f32 1.442695, %v1833_v21 }
 0xa1d   : > { %v1845_v23 = vpop.xlane.xlu0 %1844 }
 0xa1e   : > { %3245 = vpow2.f32 %v1839_v22 }
 0xa1f   : > { %3247 = vrcp.f32 %v1845_v23 }
 0xa20   : > { %3249 = vrcp.f32 %v1854_v14 }
 0xa21   : > { %v1868_v24 = vpop.permute.xlu0 %1867 }
 0xa22   : > { %v1873_v25 = vsel %vm847_vm4, %v1868_v24, 0 }
 0xa23   : > { %3068 = vmatpush3.bf16.msra.mxu1 %v1873_v25 }
 0xa24   : > { %3079 = vmatprep.subr.bf16.mxu1 %v3282_v57 }
 0xa28   : > { %v3246_v26 = vpop.eup %3245 }
 0xa29   : > { %v3248_v27 = vpop.eup %3247  ;;  %v1849_v28 = vsel %vm792_vm3, %v3246_v26, 0.0 }
 0xa2a   : > { %v1859_v29 = vmul.f32 %v3248_v27, %v3242_v3  ;;  %1850 = vadd.xlane.f32.xlu0 %v1849_v28  ;;  %v3250_v33 = vpop.eup %3249 }
 0xa2b   : > { %v1862_v35 = vmul.f32 %v3250_v33, %v3588_v60 }
 0xa2c   : > { %v1863_v31 = vpack.c.bf16 %v1859_v29, %v1859_v29 }
 0xa2d   : > { %v1866_v41 = vpack.c.bf16 %v1862_v35, %v1862_v35 }
 0xa2e   : > { %3070 = vmatmul.mubr.msk.bf16.vlgmr.msra.gmra.mrb[40].mxu1 %vm843_vm5, %v1863_v31 }
 0xa2f   : > { %3080 = vmatpush3.bf16.msra.mxu1 %v1969_v32  ;;  %3081 = vmatprep.mubr.msk.bf16.mxu1 %vm3283_vm1, %v3282_v57 }
 0xa30   : > { %3091 = vmatprep.subr.bf16.mxu1 %v3282_v57 }
 0xa40   : > { %2011 = vrot.lane.b32.xlu0 %v3413_v42, %s3292_s25 }
 0xa44   : > { %2183 = vrot.lane.b32.xlu0 %v3409_v4, %s3293_s27 }
 0xa48   : > { %2181 = vrot.lane.b32.xlu0 %v3409_v4, %s3294_s28 }
 0xa4c   : > { %2283 = vrot.lane.b32.xlu0 %v3413_v42, %s3293_s27 }
 0xa50   : > { %2281 = vrot.lane.b32.xlu0 %v3413_v42, %s3294_s28 }
 0xab7   : > { %v1851_v34 = vpop.xlane.xlu0 %1850 }
 0xab8   : > { %3251 = vrcp.f32 %v1851_v34 }
 0xabb   : > { %v2012_v36 = vpop.permute.xlu0 %2011 }
 0xabc   : > { %v2017_v38 = vsel %vm847_vm4, %v2012_v36, 0 }
 0xabd   : > { %3086 = vmatpush3.bf16.msra.mxu0 %v2017_v38 }
 0xabe   : > { %3097 = vmatprep.subr.bf16.mxu0 %v3282_v57 }
 0xabf   : > { %v2184_v7 = vpop.permute.xlu0 %2183 }
 0xac0   : > { %3088 = vmatmul.mubr.msk.bf16.vlgmr.msra.gmra.mrb[52].mxu0 %vm843_vm5, %v1866_v41  ;;  %v2189_v24 = vsel %vm559_vm2, %v2184_v7, 0 }
 0xac1   : > { %3099 = vmatprep.mubr.msk.bf16.mxu0 %vm3283_vm1, %v3282_v57 }
 0xac2   : > { %v3252_v43 = vpop.eup %3251 }
 0xac3   : > { %v1861_v44 = vmul.f32 %v3252_v43, %v3246_v26  ;;  %v2182_v22 = vpop.permute.xlu0 %2181 }
 0xac5   : > { %v1957_v47 = vpop.f32.mrb[48].mxu0  ;;  %v1865_v48 = vpack.c.bf16 %v1861_v44, %v1861_v44 }
 0xac6   : > { %v3077_v49 = vpop.f32.mrb[49].mxu0  ;;  %3098 = vmatpush3.bf16.xpose.msra.mxu0 %v2139_v46 }
 0xac7   : > { %v1960_v50 = vpop.f32.mrb[50].mxu0  ;;  %3082 = vmatmul.mubr.msk.bf16.vlgmr.msra.gmra.mrb[44].mxu1 %vm843_vm5, %v1865_v48  ;;  %3109 = vmatprep.subr.bf16.mxu0 %v3282_v57  ;;  %v2284_v26 = vpop.permute.xlu0 %2283 }
 0xac8   : > { %v3078_v51 = vpop.f32.mrb[51].mxu0  ;;  %3093 = vmatprep.mubr.msk.bf16.mxu1 %vm3283_vm1, %v3282_v57  ;;  %3092 = vmatpush3.bf16.msra.mxu1 %v2088_v62  ;;  %v2289_v30 = vsel %vm559_vm2, %v2284_v26, 0 }
 0xac9   : > { %3103 = vmatprep.subr.bf16.mxu1 %v3282_v57 }
 0xacb   : > { %v2282_v32 = vpop.permute.xlu0 %2281 }
 0xacd   : > { %3100 = vmatmul.mubr.msk.bf16.vlgmr.msra.gmra.mrb[56].mxu0 %vm559_vm2, %v2132_v45 }
 0xace   : > { %3110 = vmatpush3.bf16.xpose.msra.mxu0 %v2239_v53  ;;  %3111 = vmatprep.mubr.msk.bf16.mxu0 %vm3283_vm1, %v3282_v57 }
 0xacf   : > { %3121 = vmatprep.subr.bf16.mxu0 %v3282_v57 }
 0xad5   : > { %3112 = vmatmul.mubr.msk.bf16.vlgmr.msra.gmra.mrb[60].mxu0 %vm559_vm2, %v2232_v54 }
 0xad6   : > { %3123 = vmatprep.mubr.msk.bf16.mxu0 %vm3283_vm1, %v3282_v57 }
 0xb01   : > { %v1909_v55 = vpop.f32.mrb[40].mxu1 }
 0xb02   : > { %v2063_v56 = vcombine.low %v1909_v55, %v1957_v47  ;;  %v3071_v58 = vpop.f32.mrb[41].mxu1 }
 0xb03   : > { %v1912_v59 = vpop.f32.mrb[42].mxu1 }
 0xb04   : > { %v3072_v60 = vpop.f32.mrb[43].mxu1  ;;  %v2071_v14 = vrot.slane %v2063_v56, %v3359_v12 }
 0xb93   : > { %v2053_v63 = vpop.f32.mrb[52].mxu0 }
 0xb94   : > { %v3089_v0 = vpop.f32.mrb[53].mxu0 }
 0xb95   : > { %v2056_v1 = vpop.f32.mrb[54].mxu0 }
 0xb96   : > { %v3090_v2 = vpop.f32.mrb[55].mxu0 }
 0xb9a   : > { %v2005_v3 = vpop.f32.mrb[44].mxu1 }
 0xb9b   : > { %v2064_v5 = vcombine.low %v2005_v3, %v2053_v63  ;;  %v3083_v6 = vpop.f32.mrb[45].mxu1 }
 0xb9c   : > { %v2008_v8 = vpop.f32.mrb[46].mxu1 }
 0xb9d   : > { %v2078_v15 = vrot.slane %v2064_v5, %v3359_v12  ;;  %v3084_v16 = vpop.f32.mrb[47].mxu1 }
 0xb9f   : > { %v2079_v17 = vcombine.low %v2071_v14, %v2078_v15 }
 0xba0   : > { %v2175_v18 = vpop.f32.mrb[56].mxu0 }
 0xba1   : > { %v2081_v19 = vpack.c.bf16 %v2079_v17, %v2079_v17  ;;  %v3101_v20 = vpop.f32.mrb[57].mxu0  ;;  %v2331_v21 = vsel %vm792_vm3, %v2175_v18, -inf }
 0xba2   : > { %2332 = vmax.xlane.f32.xlu1 %v2331_v21  ;;  %v2178_v23 = vpop.f32.mrb[58].mxu0 }
 0xba3   : > { %3094 = vmatmul.mubr.msk.bf16.vlgmr.msra.gmra.mrb[16].mxu1 %vm559_vm2, %v2081_v19  ;;  %v3102_v25 = vpop.f32.mrb[59].mxu0 }
 0xba4   : > { %3104 = vmatpush3.bf16.xpose.msra.mxu1 %v2189_v24  ;;  %3105 = vmatprep.mubr.msk.bf16.mxu1 %vm3283_vm1, %v3282_v57 }
 0xba5   : > { %3115 = vmatprep.subr.bf16.mxu1 %v3282_v57 }
 0xba8   : > { %v2275_v27 = vpop.f32.mrb[60].mxu0 }
 0xba9   : > { %v3113_v28 = vpop.f32.mrb[61].mxu0  ;;  %v2337_v44 = vsel %vm792_vm3, %v2275_v27, -inf }
 0xbaa   : > { %v2278_v29 = vpop.f32.mrb[62].mxu0 }
 0xbab   : > { %3106 = vmatmul.mubr.msk.bf16.vlgmr.msra.gmra.mrb[48].mxu1 %vm559_vm2, %v2182_v22  ;;  %v3114_v31 = vpop.f32.mrb[63].mxu0 }
 0xbac   : > { %3116 = vmatpush3.bf16.xpose.msra.mxu1 %v2289_v30  ;;  %3117 = vmatprep.mubr.msk.bf16.mxu1 %vm3283_vm1, %v3282_v57  ;;  %v2841_v30 = vld [vmem:[%s3739_s3 + $0xc] sm:$0xf] }
 0xbad   : > { %3127 = vmatprep.subr.bf16.mxu1 %v3282_v57  ;;  %v2600_v31 = vsel %vm1062_vm6, %v2841_v30, 0 }
 0xbb3   : > { %3118 = vmatmul.mubr.msk.bf16.vlgmr.msra.gmra.mrb[52].mxu1 %vm559_vm2, %v2282_v32  ;;  %v3201_v32 = vld [vmem:[%s3741_s5] sm:$0xff]  }
 0xbb4   : > { %3129 = vmatprep.mubr.msk.bf16.mxu1 %vm3283_vm1, %v3282_v57 }
 0xc2f   : > { %v2333_v33 = vpop.xlane.xlu1 %2332 }
 0xc30   : > { %v2343_v34 = vsub.f32 %v2175_v18, %v2333_v33 }
 0xc32   : > { %v2347_v35 = vmul.f32 1.442695, %v2343_v34 }
 0xc34   : > { %3253 = vpow2.f32 %v2347_v35 }
 0xc3e   : > { %v3254_v45 = vpop.eup %3253 }
 0xc3f   : > { %v2355_v49 = vsel %vm792_vm3, %v3254_v45, 0.0 }
 0xc7e   : > { %v2225_v36 = vpop.f32.mrb[48].mxu1 }
 0xc7f   : > { %v3107_v38 = vpop.f32.mrb[49].mxu1  ;;  %v2334_v39 = vsel %vm792_vm3, %v2225_v36, -inf }
 0xc80   : > { %2335 = vmax.xlane.f32.xlu0 %v2334_v39  ;;  %v2228_v41 = vpop.f32.mrb[50].mxu1 }
 0xc81   : > { %v3108_v43 = vpop.f32.mrb[51].mxu1 }
 0xc84   : > { %2338 = vmax.xlane.f32.xlu0 %v2337_v44 }
 0xc86   : > { %v2325_v46 = vpop.f32.mrb[52].mxu1 }
 0xc87   : > { %v3119_v47 = vpop.f32.mrb[53].mxu1  ;;  %v2340_v48 = vsel %vm792_vm3, %v2325_v46, -inf }
 0xc88   : > { %v2328_v50 = vpop.f32.mrb[54].mxu1  ;;  %2341 = vmax.xlane.f32.xlu1 %v2340_v48  ;;  %2356 = vadd.xlane.f32.xlu0 %v2355_v49 }
 0xc89   : > { %v3120_v51 = vpop.f32.mrb[55].mxu1 }
 0xc99   : > { %2427 = vrot.lane.b32.xlu1 %v3409_v4, %s3295_s8 }
 0xd0d   : > { %v2336_v52 = vpop.xlane.xlu0 %2335 }
 0xd0e   : > { %v2344_v53 = vsub.f32 %v2225_v36, %v2336_v52 }
 0xd10   : > { %v2349_v54 = vmul.f32 1.442695, %v2344_v53 }
 0xd11   : > { %v2339_v55 = vpop.xlane.xlu0 %2338 }
 0xd12   : > { %3255 = vpow2.f32 %v2349_v54  ;;  %v2345_v56 = vsub.f32 %v2275_v27, %v2339_v55 }
 0xd14   : > { %v2351_v58 = vmul.f32 1.442695, %v2345_v56 }
 0xd15   : > { %v2342_v59 = vpop.xlane.xlu1 %2341  ;;  %v2357_v6 = vpop.xlane.xlu0 %2356 }
 0xd16   : > { %3257 = vpow2.f32 %v2351_v58  ;;  %v2346_v60 = vsub.f32 %v2325_v46, %v2342_v59  ;;  %v3202_v58 = vld [vmem:[%s3741_s5 + $0x8] sm:$0xff]   ;;  %v2803_v59 = vld [vmem:[%s3740_s4] ss:$0 sm:$0xff] }
 0xd18   : > { %v2353_v61 = vmul.f32 1.442695, %v2346_v60 }
 0xd19   : > { %v2428_v62 = vpop.permute.xlu1 %2427 }
 0xd1a   : > { %3259 = vpow2.f32 %v2353_v61  ;;  %v2433_v63 = vsel %vm847_vm4, %v2428_v62, 0 }
 0xd1b   : > { %3128 = vmatpush3.bf16.msra.mxu1 %v2433_v63  ;;  %3261 = vrcp.f32 %v2357_v6 }
 0xd1c   : > { %v3256_v0 = vpop.eup %3255  ;;  %3139 = vmatprep.subr.bf16.mxu1 %v3282_v57 }
 0xd1d   : > { %v2358_v4 = vsel %vm792_vm3, %v3256_v0, 0.0 }
 0xd1e   : > { %2359 = vadd.xlane.f32.xlu1 %v2358_v4 }
 0xd20   : > { %v3258_v1 = vpop.eup %3257 }
 0xd21   : > { %v2361_v2 = vsel %vm792_vm3, %v3258_v1, 0.0 }
 0xd22   : > { %2362 = vadd.xlane.f32.xlu0 %v2361_v2 }
 0xd24   : > { %v3260_v3 = vpop.eup %3259 }
 0xd25   : > { %v2364_v5 = vsel %vm792_vm3, %v3260_v3, 0.0  ;;  %v3262_v8 = vpop.eup %3261 }
 0xd26   : > { %2365 = vadd.xlane.f32.xlu1 %v2364_v5  ;;  %v2371_v15 = vmul.f32 %v3262_v8, %v3254_v45 }
 0xd37   : > { %2475 = vrot.lane.b32.xlu1 %v3406_v40, %s3295_s8  ;;  %v2375_v40 = vpack.c.bf16 %v2371_v15, %v2371_v15 }
 0xd38   : > { %2379 = vrot.lane.b32.xlu0 %v3404_v37, %s3295_s8 }
 0xd3c   : > { %2523 = vrot.lane.b32.xlu0 %v3413_v42, %s3295_s8 }
 0xdab   : > { %v2360_v7 = vpop.xlane.xlu1 %2359 }
 0xdac   : > { %3263 = vrcp.f32 %v2360_v7 }
 0xdaf   : > { %v2363_v14 = vpop.xlane.xlu0 %2362 }
 0xdb0   : > { %3265 = vrcp.f32 %v2363_v14 }
 0xdb3   : > { %v2366_v16 = vpop.xlane.xlu1 %2365  ;;  %v2380_v17 = vpop.permute.xlu0 %2379 }
 0xdb4   : > { %3267 = vrcp.f32 %v2366_v16  ;;  %v2385_v18 = vsel %vm847_vm4, %v2380_v17, 0 }
 0xdb5   : > { %3122 = vmatpush3.bf16.msra.mxu0 %v2385_v18 }
 0xdb6   : > { %v3264_v19 = vpop.eup %3263  ;;  %3133 = vmatprep.subr.bf16.mxu0 %v3282_v57 }
 0xdb7   : > { %v2372_v37 = vmul.f32 %v3264_v19, %v3256_v0  ;;  %v2476_v42 = vpop.permute.xlu1 %2475  ;;  %v2524_v21 = vpop.permute.xlu0 %2523 }
 0xdb8   : > { %v2481_v20 = vsel %vm847_vm4, %v2476_v42, 0  ;;  %3124 = vmatmul.mubr.msk.bf16.vlgmr.msra.gmra.mrb[64].mxu0 %vm843_vm5, %v2375_v40  ;;  %v2529_v25 = vsel %vm847_vm4, %v2524_v21, 0 }
 0xdb9   : > { %3134 = vmatpush3.bf16.msra.mxu0 %v2481_v20  ;;  %v2376_v22 = vpack.c.bf16 %v2372_v37, %v2372_v37  ;;  %3135 = vmatprep.mubr.msk.bf16.mxu0 %vm3283_vm1, %v3282_v57 }
 0xdba   : > { %v3266_v23 = vpop.eup %3265  ;;  %3151 = vmatprep.subr.bf16.mxu0 %v3282_v57 }
 0xdbb   : > { %v2373_v24 = vmul.f32 %v3266_v23, %v3258_v1  ;;  %3130 = vmatmul.mubr.msk.bf16.vlgmr.msra.gmra.mrb[56].mxu1 %vm843_vm5, %v2376_v22  ;;  %v2843_v1 = vld [vmem:[%s3742_s6] ss:$0 sm:$0xff] }
 0xdbc   : > { %3140 = vmatpush3.bf16.msra.mxu1 %v2529_v25  ;;  %3141 = vmatprep.mubr.msk.bf16.mxu1 %vm3283_vm1, %v3282_v57 }
 0xdbd   : > { %v2377_v26 = vpack.c.bf16 %v2373_v24, %v2373_v24  ;;  %3145 = vmatprep.subr.bf16.mxu1 %v3282_v57 }
 0xdbe   : > { %v3268_v27 = vpop.eup %3267 }
 0xdbf   : > { %v2374_v28 = vmul.f32 %v3268_v27, %v3260_v3 }
 0xdc0   : > { %3136 = vmatmul.mubr.msk.bf16.vlgmr.msra.gmra.mrb[68].mxu0 %vm843_vm5, %v2377_v26 }
 0xdc1   : > { %v2378_v29 = vpack.c.bf16 %v2374_v28, %v2374_v28  ;;  %3155 = vmatprep.mubr.msk.bf16.mxu0 %vm3283_vm1, %v3282_v57  ;;  %3152 = vmatpush3.bf16.msra.mxu0 %v3201_v32 }
 0xdc2   : > { %3153 = vmatprep.subr.bf16.mxu0 %v3282_v57 }
 0xdc3   : > { %3142 = vmatmul.mubr.msk.bf16.vlgmr.msra.gmra.mrb[60].mxu1 %vm843_vm5, %v2378_v29 }
 0xdc4   : > { %3147 = vmatprep.mubr.msk.bf16.mxu1 %vm3283_vm1, %v3282_v57  ;;  %3146 = vmatpush3.bf16.msra.mxu1 %v2600_v31 }
 0xdc5   : > { %3154 = vmatpush3.bf16.msra.mxu0 %v3202_v58 }
 0xe8b   : > { %v2421_v33 = vpop.f32.mrb[64].mxu0 }
 0xe8c   : > { %v3125_v34 = vpop.f32.mrb[65].mxu0 }
 0xe8d   : > { %v2424_v35 = vpop.f32.mrb[66].mxu0 }
 0xe8e   : > { %v3126_v36 = vpop.f32.mrb[67].mxu0  ;;  %v2469_v38 = vpop.f32.mrb[56].mxu1 }
 0xe8f   : > { %v2575_v39 = vcombine.low %v2421_v33, %v2469_v38  ;;  %v3131_v41 = vpop.f32.mrb[57].mxu1 }
 0xe90   : > { %v2472_v43 = vpop.f32.mrb[58].mxu1 }
 0xe91   : > { %v3132_v44 = vpop.f32.mrb[59].mxu1  ;;  %v2583_v53 = vrot.slane %v2575_v39, %v3359_v12 }
 0xe93   : > { %v2517_v45 = vpop.f32.mrb[68].mxu0 }
 0xe94   : > { %v3137_v46 = vpop.f32.mrb[69].mxu0 }
 0xe95   : > { %v2520_v47 = vpop.f32.mrb[70].mxu0 }
 0xe96   : > { %v3138_v48 = vpop.f32.mrb[71].mxu0  ;;  %v2565_v49 = vpop.f32.mrb[60].mxu1 }
 0xe97   : > { %v2576_v50 = vcombine.low %v2517_v45, %v2565_v49  ;;  %v3143_v51 = vpop.f32.mrb[61].mxu1 }
 0xe98   : > { %v2568_v52 = vpop.f32.mrb[62].mxu1 }
 0xe99   : > { %v2590_v57 = vrot.slane %v2576_v50, %v3359_v12  ;;  %v3144_v54 = vpop.f32.mrb[63].mxu1 }
 0xe9b   : > { %v2591_v55 = vcombine.low %v2583_v53, %v2590_v57 }
 0xe9d   : > { %v2593_v56 = vpack.c.bf16 %v2591_v55, %v2591_v55 }
 0xe9f   : > { %3148 = vmatmul.mubr.msk.bf16.vlgmr.msra.gmra.mrb[16].mxu1 %vm559_vm2, %v2593_v56 }
 0xf72   : > { %v2636_v60 = vpop.f32.mrb[16].mxu1 }
 0xf73   : > { %v3159_v61 = vadd.f32 %v2803_v59, %v2636_v60  ;;  %v3149_v62 = vpop.f32.mrb[17].mxu1 }
 0xf74   : > { %v2639_v63 = vpop.f32.mrb[18].mxu1 }
 0xf75   : > { %v2643_v0 = vpack.c.bf16 %v3159_v61, %v3159_v61  ;;  %v3150_v4 = vpop.f32.mrb[19].mxu1 }
 0xf77   : > { %3156 = vmatmul.mubr.msk.bf16.vlgmr.msra.gmra.mrb[72].mxu0 %vm308_vm0, %v2643_v0 }
0x104a   : > { %v2704_v2 = vpop.f32.mrb[72].mxu0 }
0x104b   : > { %v2705_v3 = vadd.f32 %v2843_v1, %v2704_v2  ;;  %v3157_v5 = vpop.f32.mrb[73].mxu0 }
0x104c   : > { %v2707_v6 = vpop.f32.mrb[74].mxu0 }
0x104d   : > { %v2711_v7 = vcombine.high %v2705_v3, %v2705_v3  ;;  %v2718_v8 = vrot.slane %v2705_v3, %v3359_v12  ;;  %v3158_v14 = vpop.f32.mrb[75].mxu0 }
0x104f   : > { %v2725_v15 = vrot.slane %v2711_v7, %v3359_v12  ;;  %v2726_v16 = vcombine.high %v2718_v8, %v2718_v8  ;;  %v2732_v17 = vadd.f32 %v2718_v8, %v3352_v9 }
0x1051   : > { %v2727_v18 = vcombine.high %v2725_v15, %v2725_v15  ;;  %v2733_v19 = vadd.f32 %v2726_v16, %v3354_v10  ;;  %v2734_v40 = vadd.f32 %v2725_v15, %v3356_v11  ;;  %v2736_v37 = vpack.c.bf16 %v2732_v17, %v2732_v17 }
0x1053   : > { %v2735_v42 = vadd.f32 %v2727_v18, %v3361_v13  ;;  %v2737_v20 = vpack.c.bf16 %v2733_v19, %v2733_v19  ;;  %v2738_v21 = vpack.c.bf16 %v2734_v40, %v2734_v40  ;;  %2741 = vst.msk [vmem:[%s275_s21] sm:$0x1] %vm2740_vm7, %v2736_v37 }
0x1055   : > { %v2739_v12 = vpack.c.bf16 %v2735_v42, %v2735_v42  ;;  %2742 = vst.msk [vmem:[%s275_s21 + $0x1] sm:$0x1] %vm2740_vm7, %v2737_v20  ;;  %2743 = vst.msk [vmem:[%s275_s21 + $0x2] sm:$0x1] %vm2740_vm7, %v2738_v21 }
0x1057   : > { %2744 = vst.msk [vmem:[%s275_s21 + $0x3] sm:$0x1] %vm2740_vm7, %v2739_v12 }
0x1058 PF: > { %s17_s24 = sadd.s32 1, %s3275_s24  }
0x1059   : > { %p14_p4 = scmp.ge.s32.totalorder %s17_s24, 4  }
0x105b   :  { %16 = sbr.rel (!%p14_p4) target bundleno = 1 (0x1), region = 81 }

</bundles_post_ra>
